<compile_context>
chip_gen: v7x
topology: tpu7x:2x2x1
jax: 0.10.0
libtpu: 0.0.40
codegen_flags: <defaults>
</compile_context>

<pallas_src>
import math

import jax
import jax.numpy as jnp
from jax.experimental import pallas as pl
from jax.experimental.pallas import tpu as pltpu

DAY_HEAD = 4        # day_head
DAY_GROUPS = 2      # day_groups
W_SPATIAL = 7       # gram is 7x7; GroupFC kernel covers the full 7x7
PRELU_A = 0.25      # torch nn.PReLU default init
BN_EPS = 1e-5
TILE_N = 8          # batch rows per grid step (multiple of 8; kept modest to
                    # bound in-kernel register pressure of the VPU gram stage)

FLAT_F = DAY_HEAD * W_SPATIAL * W_SPATIAL   # 196


# ---------------- Fused Pallas kernel ----------------

def _sdm_fused_kernel(x_ref, w_ref, b_ref, a_ref, o_ref, g_ref):
    # x_ref: (TILE_N, HEADS, W, D)   day_input tile (D on the lane axis)
    # w_ref: (196, O)                BN-folded block-diagonal FC weight
    # b_ref: (1, O)                  BN-folded bias
    # a_ref: (1, 1) in SMEM          PReLU slope
    # o_ref: (TILE_N, O)             output tile
    # g_ref: (TILE_N, 196) VMEM      lane-dense gram scratch
    for h in range(DAY_HEAD):
        xh = x_ref[:, h, :, :]                          # (TN, W, D)
        for q in range(W_SPATIAL):
            xq = x_ref[:, h, q:q + 1, :]                # (TN, 1, D)
            # gram[:, h, q, k] = sum_d day[:,h,q,d] * day[:,h,k,d]
            row = jnp.sum(xq * xh, axis=-1)             # (TN, W)  VPU mul + lane reduce
            off = (h * W_SPATIAL + q) * W_SPATIAL
            g_ref[:, off:off + W_SPATIAL] = row

    # Single MXU matmul over the flattened gram, then folded-BN bias + PReLU.
    z = jnp.dot(g_ref[...], w_ref[...], preferred_element_type=jnp.float32)
    z = z + b_ref[...]
    a = a_ref[0, 0]
    o_ref[...] = jnp.where(z > 0, z, a * z)


def _sdm_fused_pallas(day_input, w_fold, b_fold, prelu_a, tile_n):
    Np, H, W, D = day_input.shape
    F, O = w_fold.shape
    assert Np % tile_n == 0 and H == DAY_HEAD and W == W_SPATIAL and F == FLAT_F
    return pl.pallas_call(
        _sdm_fused_kernel,
        out_shape=jax.ShapeDtypeStruct((Np, O), jnp.float32),
        grid=(Np // tile_n,),
        in_specs=[
            pl.BlockSpec((tile_n, H, W, D), lambda i: (i, 0, 0, 0)),
            pl.BlockSpec((F, O), lambda i: (0, 0)),        # resident weight
            pl.BlockSpec((1, O), lambda i: (0, 0)),        # resident bias
            pl.BlockSpec(memory_space=pltpu.MemorySpace.SMEM),  # PReLU scalar
        ],
        out_specs=pl.BlockSpec((tile_n, O), lambda i: (i, 0)),
        scratch_shapes=[pltpu.VMEM((tile_n, F), jnp.float32)],
        compiler_params=pltpu.CompilerParams(
            dimension_semantics=("parallel",)),
    )(day_input, w_fold, b_fold, prelu_a)


# ---------------- Glue (padding / layout / param setup) ----------------

def _make_day_input(x):
    N, C, H, W = x.shape
    # torch: H_pad_num = day_head - H % day_head; pads even when H % day_head == 0
    h_pad = DAY_HEAD - H % DAY_HEAD
    xp = jnp.concatenate(
        [jnp.broadcast_to(x[:, :, :1, :], (N, C, h_pad, W)), x], axis=2)
    Hp = H + h_pad
    D = C * Hp // DAY_HEAD
    # (N, C, Hp, W) -> (N, HEADS, D, W) is a pure (free) reshape; one transpose
    # of the last two axes puts the contraction dim D on the lane axis.
    return xp.reshape(N, DAY_HEAD, D, W).transpose(0, 1, 3, 2)   # (N, HEADS, W, D)


def sdm_forward(x, params, *, tile_n=TILE_N):
    N = x.shape[0]
    day = _make_day_input(x)                     # (N, HEADS, W, D)
    n_pad = -N % tile_n
    if n_pad:
        day = jnp.pad(day, ((0, n_pad), (0, 0), (0, 0), (0, 0)))
    out = _sdm_fused_pallas(day, params["w_fold"], params["b_fold"],
                            params["prelu_a"], tile_n)
    # TODO(synk): Dropout(p=0.7) training-mode RNG not implemented (identity in eval).
    return out[:N]


def init_params(key, output_dim):
    in_pg = DAY_HEAD // DAY_GROUPS                 # input channels per conv group
    fan_in = in_pg * W_SPATIAL * W_SPATIAL
    k = 1.0 / math.sqrt(fan_in)
    k1, k2 = jax.random.split(key)
    conv_w = jax.random.uniform(k1, (output_dim, in_pg, W_SPATIAL, W_SPATIAL),
                                jnp.float32, -k, k)
    conv_b = jax.random.uniform(k2, (output_dim,), jnp.float32, -k, k)

    # Expand grouped conv weight into a block-diagonal full FC matrix (196, O).
    opg = output_dim // DAY_GROUPS
    w_full = jnp.zeros((output_dim, DAY_HEAD, W_SPATIAL, W_SPATIAL), jnp.float32)
    for g in range(DAY_GROUPS):
        w_full = w_full.at[g * opg:(g + 1) * opg,
                           g * in_pg:(g + 1) * in_pg].set(conv_w[g * opg:(g + 1) * opg])
    w_mat = w_full.reshape(output_dim, FLAT_F).T   # (196, O), row = h*49 + q*7 + k

    # BatchNorm1d eval-mode (fresh module defaults: gamma=1, beta=0, mean=0, var=1).
    gamma = jnp.ones((output_dim,), jnp.float32)
    beta = jnp.zeros((output_dim,), jnp.float32)
    r_mean = jnp.zeros((output_dim,), jnp.float32)
    r_var = jnp.ones((output_dim,), jnp.float32)
    scale = gamma / jnp.sqrt(r_var + BN_EPS)
    shift = beta - r_mean * scale

    # Fold BN into the FC weight/bias (exact in eval mode).
    w_fold = w_mat * scale[None, :]
    b_fold = (conv_b * scale + shift).reshape(1, output_dim)

    return dict(
        # kernel params (BN folded)
        w_fold=w_fold,
        b_fold=b_fold,
        prelu_a=jnp.full((1, 1), PRELU_A, jnp.float32),
        # unfolded params kept for the pure-JAX reference
        w_mat=w_mat,
        bias=conv_b.reshape(1, output_dim),
        scale=scale.reshape(1, output_dim),
        shift=shift.reshape(1, output_dim),
    )


def sdm_reference(x, params):
    """Pure-JAX reference of the same eval-mode forward (unfolded BN path)."""
    N = x.shape[0]
    di = _make_day_input(x)
    gram = jnp.einsum('bnqd,bnkd->bnqk', di, di)
    flat = gram.reshape(N, -1)
    z = flat @ params["w_mat"] + params["bias"]
    z = z * params["scale"] + params["shift"]
    return jnp.where(z > 0, z, params["prelu_a"][0, 0] * z)


if __name__ == "__main__":
    key = jax.random.PRNGKey(0)
    kx, kp = jax.random.split(key)
    # Small shapes: W must be 7 (GroupFC kernel size); H arbitrary (padded to mult of 4).
    N, C, H, W = 2, 4, 12, 7
    OUTPUT_DIM = 128   # lane-dense output width for the demo
    x = jax.random.normal(kx, (N, C, H, W), jnp.float32)
    params = init_params(kp, OUTPUT_DIM)

    out = jax.block_until_ready(sdm_forward(x, params))
    ref = sdm_reference(x, params)

    assert out.shape == (N, OUTPUT_DIM)
    assert jnp.allclose(out, ref, atol=1e-4, rtol=1e-4), \
        "Pallas output mismatch vs JAX reference"
    print("KERNEL_OK")
</pallas_src>

<mosaic_0001>
module attributes {stable_mosaic.version = 11 : i64} {
  func.func @_sdm_fused_kernel(%arg0: i32, %arg1: memref<8x4x7x16xf32, #tpu.memory_space<vmem>>, %arg2: memref<196x128xf32, #tpu.memory_space<vmem>>, %arg3: memref<1x128xf32, #tpu.memory_space<vmem>>, %arg4: memref<1x1xf32, #tpu.memory_space<smem>>, %arg5: memref<8x128xf32, #tpu.memory_space<vmem>>, %arg6: memref<8x196xf32, #tpu.memory_space<vmem>>) attributes {dimension_semantics = [#tpu.dimension_semantics<parallel>], iteration_bounds = array<i64: 1>, scalar_prefetch = 0 : i64, scratch_operands = 1 : i64, tpu.core_type = #tpu.core_type<tc>, window_params = [{transform_indices = @transform_0, window_bounds = array<i64: 8, 4, 7, 16>}, {pipeline_mode = #tpu.pipeline_mode<synchronous>, transform_indices = @transform_1, window_bounds = array<i64: 196, 128>}, {pipeline_mode = #tpu.pipeline_mode<synchronous>, transform_indices = @transform_2, window_bounds = array<i64: 1, 128>}, {transform_indices = @transform_3, window_bounds = array<i64: 1, 1>}, {transform_indices = @transform_4, window_bounds = array<i64: 8, 128>}]} {
    %c0 = arith.constant 0 : index
    %c0_0 = arith.constant 0 : index
    %c0_1 = arith.constant 0 : index
    %c0_2 = arith.constant 0 : index
    %0 = vector.load %arg1[%c0, %c0_0, %c0_1, %c0_2] : memref<8x4x7x16xf32, #tpu.memory_space<vmem>>, vector<8x1x7x16xf32>
    %1 = vector.shape_cast %0 : vector<8x1x7x16xf32> to vector<8x7x16xf32>
    %c0_3 = arith.constant 0 : index
    %c0_4 = arith.constant 0 : index
    %c0_5 = arith.constant 0 : index
    %c0_6 = arith.constant 0 : index
    %2 = vector.load %arg1[%c0_3, %c0_4, %c0_5, %c0_6] : memref<8x4x7x16xf32, #tpu.memory_space<vmem>>, vector<8x1x1x16xf32>
    %3 = vector.shape_cast %2 : vector<8x1x1x16xf32> to vector<8x1x16xf32>
    %4 = vector.broadcast %3 : vector<8x1x16xf32> to vector<8x7x16xf32>
    %5 = arith.mulf %4, %1 : vector<8x7x16xf32>
    %cst = arith.constant dense<0.000000e+00> : vector<8x7xf32>
    %6 = vector.multi_reduction <add>, %5, %cst [2] : vector<8x7x16xf32> to vector<8x7xf32>
    %c0_7 = arith.constant 0 : index
    %c0_8 = arith.constant 0 : index
    %7 = vector.load %arg6[%c0_7, %c0_8] : memref<8x196xf32, #tpu.memory_space<vmem>>, vector<8x7xf32>
    tpu.vector_store %arg6[%c0_7, %c0_8], %6 {strides = array<i32>} : memref<8x196xf32, #tpu.memory_space<vmem>>, vector<8x7xf32>,
    %c0_9 = arith.constant 0 : index
    %c0_10 = arith.constant 0 : index
    %c1 = arith.constant 1 : index
    %c0_11 = arith.constant 0 : index
    %8 = vector.load %arg1[%c0_9, %c0_10, %c1, %c0_11] : memref<8x4x7x16xf32, #tpu.memory_space<vmem>>, vector<8x1x1x16xf32>
    %9 = vector.shape_cast %8 : vector<8x1x1x16xf32> to vector<8x1x16xf32>
    %10 = vector.broadcast %9 : vector<8x1x16xf32> to vector<8x7x16xf32>
    %11 = arith.mulf %10, %1 : vector<8x7x16xf32>
    %cst_12 = arith.constant dense<0.000000e+00> : vector<8x7xf32>
    %12 = vector.multi_reduction <add>, %11, %cst_12 [2] : vector<8x7x16xf32> to vector<8x7xf32>
    %c0_13 = arith.constant 0 : index
    %c7 = arith.constant 7 : index
    %13 = vector.load %arg6[%c0_13, %c7] : memref<8x196xf32, #tpu.memory_space<vmem>>, vector<8x7xf32>
    tpu.vector_store %arg6[%c0_13, %c7], %12 {strides = array<i32>} : memref<8x196xf32, #tpu.memory_space<vmem>>, vector<8x7xf32>,
    %c0_14 = arith.constant 0 : index
    %c0_15 = arith.constant 0 : index
    %c2 = arith.constant 2 : index
    %c0_16 = arith.constant 0 : index
    %14 = vector.load %arg1[%c0_14, %c0_15, %c2, %c0_16] : memref<8x4x7x16xf32, #tpu.memory_space<vmem>>, vector<8x1x1x16xf32>
    %15 = vector.shape_cast %14 : vector<8x1x1x16xf32> to vector<8x1x16xf32>
    %16 = vector.broadcast %15 : vector<8x1x16xf32> to vector<8x7x16xf32>
    %17 = arith.mulf %16, %1 : vector<8x7x16xf32>
    %cst_17 = arith.constant dense<0.000000e+00> : vector<8x7xf32>
    %18 = vector.multi_reduction <add>, %17, %cst_17 [2] : vector<8x7x16xf32> to vector<8x7xf32>
    %c0_18 = arith.constant 0 : index
    %c14 = arith.constant 14 : index
    %19 = vector.load %arg6[%c0_18, %c14] : memref<8x196xf32, #tpu.memory_space<vmem>>, vector<8x7xf32>
    tpu.vector_store %arg6[%c0_18, %c14], %18 {strides = array<i32>} : memref<8x196xf32, #tpu.memory_space<vmem>>, vector<8x7xf32>,
    %c0_19 = arith.constant 0 : index
    %c0_20 = arith.constant 0 : index
    %c3 = arith.constant 3 : index
    %c0_21 = arith.constant 0 : index
    %20 = vector.load %arg1[%c0_19, %c0_20, %c3, %c0_21] : memref<8x4x7x16xf32, #tpu.memory_space<vmem>>, vector<8x1x1x16xf32>
    %21 = vector.shape_cast %20 : vector<8x1x1x16xf32> to vector<8x1x16xf32>
    %22 = vector.broadcast %21 : vector<8x1x16xf32> to vector<8x7x16xf32>
    %23 = arith.mulf %22, %1 : vector<8x7x16xf32>
    %cst_22 = arith.constant dense<0.000000e+00> : vector<8x7xf32>
    %24 = vector.multi_reduction <add>, %23, %cst_22 [2] : vector<8x7x16xf32> to vector<8x7xf32>
    %c0_23 = arith.constant 0 : index
    %c21 = arith.constant 21 : index
    %25 = vector.load %arg6[%c0_23, %c21] : memref<8x196xf32, #tpu.memory_space<vmem>>, vector<8x7xf32>
    tpu.vector_store %arg6[%c0_23, %c21], %24 {strides = array<i32>} : memref<8x196xf32, #tpu.memory_space<vmem>>, vector<8x7xf32>,
    %c0_24 = arith.constant 0 : index
    %c0_25 = arith.constant 0 : index
    %c4 = arith.constant 4 : index
    %c0_26 = arith.constant 0 : index
    %26 = vector.load %arg1[%c0_24, %c0_25, %c4, %c0_26] : memref<8x4x7x16xf32, #tpu.memory_space<vmem>>, vector<8x1x1x16xf32>
    %27 = vector.shape_cast %26 : vector<8x1x1x16xf32> to vector<8x1x16xf32>
    %28 = vector.broadcast %27 : vector<8x1x16xf32> to vector<8x7x16xf32>
    %29 = arith.mulf %28, %1 : vector<8x7x16xf32>
    %cst_27 = arith.constant dense<0.000000e+00> : vector<8x7xf32>
    %30 = vector.multi_reduction <add>, %29, %cst_27 [2] : vector<8x7x16xf32> to vector<8x7xf32>
    %c0_28 = arith.constant 0 : index
    %c28 = arith.constant 28 : index
    %31 = vector.load %arg6[%c0_28, %c28] : memref<8x196xf32, #tpu.memory_space<vmem>>, vector<8x7xf32>
    tpu.vector_store %arg6[%c0_28, %c28], %30 {strides = array<i32>} : memref<8x196xf32, #tpu.memory_space<vmem>>, vector<8x7xf32>,
    %c0_29 = arith.constant 0 : index
    %c0_30 = arith.constant 0 : index
    %c5 = arith.constant 5 : index
    %c0_31 = arith.constant 0 : index
    %32 = vector.load %arg1[%c0_29, %c0_30, %c5, %c0_31] : memref<8x4x7x16xf32, #tpu.memory_space<vmem>>, vector<8x1x1x16xf32>
    %33 = vector.shape_cast %32 : vector<8x1x1x16xf32> to vector<8x1x16xf32>
    %34 = vector.broadcast %33 : vector<8x1x16xf32> to vector<8x7x16xf32>
    %35 = arith.mulf %34, %1 : vector<8x7x16xf32>
    %cst_32 = arith.constant dense<0.000000e+00> : vector<8x7xf32>
    %36 = vector.multi_reduction <add>, %35, %cst_32 [2] : vector<8x7x16xf32> to vector<8x7xf32>
    %c0_33 = arith.constant 0 : index
    %c35 = arith.constant 35 : index
    %37 = vector.load %arg6[%c0_33, %c35] : memref<8x196xf32, #tpu.memory_space<vmem>>, vector<8x7xf32>
    tpu.vector_store %arg6[%c0_33, %c35], %36 {strides = array<i32>} : memref<8x196xf32, #tpu.memory_space<vmem>>, vector<8x7xf32>,
    %c0_34 = arith.constant 0 : index
    %c0_35 = arith.constant 0 : index
    %c6 = arith.constant 6 : index
    %c0_36 = arith.constant 0 : index
    %38 = vector.load %arg1[%c0_34, %c0_35, %c6, %c0_36] : memref<8x4x7x16xf32, #tpu.memory_space<vmem>>, vector<8x1x1x16xf32>
    %39 = vector.shape_cast %38 : vector<8x1x1x16xf32> to vector<8x1x16xf32>
    %40 = vector.broadcast %39 : vector<8x1x16xf32> to vector<8x7x16xf32>
    %41 = arith.mulf %40, %1 : vector<8x7x16xf32>
    %cst_37 = arith.constant dense<0.000000e+00> : vector<8x7xf32>
    %42 = vector.multi_reduction <add>, %41, %cst_37 [2] : vector<8x7x16xf32> to vector<8x7xf32>
    %c0_38 = arith.constant 0 : index
    %c42 = arith.constant 42 : index
    %43 = vector.load %arg6[%c0_38, %c42] : memref<8x196xf32, #tpu.memory_space<vmem>>, vector<8x7xf32>
    tpu.vector_store %arg6[%c0_38, %c42], %42 {strides = array<i32>} : memref<8x196xf32, #tpu.memory_space<vmem>>, vector<8x7xf32>,
    %c0_39 = arith.constant 0 : index
    %c1_40 = arith.constant 1 : index
    %c0_41 = arith.constant 0 : index
    %c0_42 = arith.constant 0 : index
    %44 = vector.load %arg1[%c0_39, %c1_40, %c0_41, %c0_42] : memref<8x4x7x16xf32, #tpu.memory_space<vmem>>, vector<8x1x7x16xf32>
    %45 = vector.shape_cast %44 : vector<8x1x7x16xf32> to vector<8x7x16xf32>
    %c0_43 = arith.constant 0 : index
    %c1_44 = arith.constant 1 : index
    %c0_45 = arith.constant 0 : index
    %c0_46 = arith.constant 0 : index
    %46 = vector.load %arg1[%c0_43, %c1_44, %c0_45, %c0_46] : memref<8x4x7x16xf32, #tpu.memory_space<vmem>>, vector<8x1x1x16xf32>
    %47 = vector.shape_cast %46 : vector<8x1x1x16xf32> to vector<8x1x16xf32>
    %48 = vector.broadcast %47 : vector<8x1x16xf32> to vector<8x7x16xf32>
    %49 = arith.mulf %48, %45 : vector<8x7x16xf32>
    %cst_47 = arith.constant dense<0.000000e+00> : vector<8x7xf32>
    %50 = vector.multi_reduction <add>, %49, %cst_47 [2] : vector<8x7x16xf32> to vector<8x7xf32>
    %c0_48 = arith.constant 0 : index
    %c49 = arith.constant 49 : index
    %51 = vector.load %arg6[%c0_48, %c49] : memref<8x196xf32, #tpu.memory_space<vmem>>, vector<8x7xf32>
    tpu.vector_store %arg6[%c0_48, %c49], %50 {strides = array<i32>} : memref<8x196xf32, #tpu.memory_space<vmem>>, vector<8x7xf32>,
    %c0_49 = arith.constant 0 : index
    %c1_50 = arith.constant 1 : index
    %c1_51 = arith.constant 1 : index
    %c0_52 = arith.constant 0 : index
    %52 = vector.load %arg1[%c0_49, %c1_50, %c1_51, %c0_52] : memref<8x4x7x16xf32, #tpu.memory_space<vmem>>, vector<8x1x1x16xf32>
    %53 = vector.shape_cast %52 : vector<8x1x1x16xf32> to vector<8x1x16xf32>
    %54 = vector.broadcast %53 : vector<8x1x16xf32> to vector<8x7x16xf32>
    %55 = arith.mulf %54, %45 : vector<8x7x16xf32>
    %cst_53 = arith.constant dense<0.000000e+00> : vector<8x7xf32>
    %56 = vector.multi_reduction <add>, %55, %cst_53 [2] : vector<8x7x16xf32> to vector<8x7xf32>
    %c0_54 = arith.constant 0 : index
    %c56 = arith.constant 56 : index
    %57 = vector.load %arg6[%c0_54, %c56] : memref<8x196xf32, #tpu.memory_space<vmem>>, vector<8x7xf32>
    tpu.vector_store %arg6[%c0_54, %c56], %56 {strides = array<i32>} : memref<8x196xf32, #tpu.memory_space<vmem>>, vector<8x7xf32>,
    %c0_55 = arith.constant 0 : index
    %c1_56 = arith.constant 1 : index
    %c2_57 = arith.constant 2 : index
    %c0_58 = arith.constant 0 : index
    %58 = vector.load %arg1[%c0_55, %c1_56, %c2_57, %c0_58] : memref<8x4x7x16xf32, #tpu.memory_space<vmem>>, vector<8x1x1x16xf32>
    %59 = vector.shape_cast %58 : vector<8x1x1x16xf32> to vector<8x1x16xf32>
    %60 = vector.broadcast %59 : vector<8x1x16xf32> to vector<8x7x16xf32>
    %61 = arith.mulf %60, %45 : vector<8x7x16xf32>
    %cst_59 = arith.constant dense<0.000000e+00> : vector<8x7xf32>
    %62 = vector.multi_reduction <add>, %61, %cst_59 [2] : vector<8x7x16xf32> to vector<8x7xf32>
    %c0_60 = arith.constant 0 : index
    %c63 = arith.constant 63 : index
    %63 = vector.load %arg6[%c0_60, %c63] : memref<8x196xf32, #tpu.memory_space<vmem>>, vector<8x7xf32>
    tpu.vector_store %arg6[%c0_60, %c63], %62 {strides = array<i32>} : memref<8x196xf32, #tpu.memory_space<vmem>>, vector<8x7xf32>,
    %c0_61 = arith.constant 0 : index
    %c1_62 = arith.constant 1 : index
    %c3_63 = arith.constant 3 : index
    %c0_64 = arith.constant 0 : index
    %64 = vector.load %arg1[%c0_61, %c1_62, %c3_63, %c0_64] : memref<8x4x7x16xf32, #tpu.memory_space<vmem>>, vector<8x1x1x16xf32>
    %65 = vector.shape_cast %64 : vector<8x1x1x16xf32> to vector<8x1x16xf32>
    %66 = vector.broadcast %65 : vector<8x1x16xf32> to vector<8x7x16xf32>
    %67 = arith.mulf %66, %45 : vector<8x7x16xf32>
    %cst_65 = arith.constant dense<0.000000e+00> : vector<8x7xf32>
    %68 = vector.multi_reduction <add>, %67, %cst_65 [2] : vector<8x7x16xf32> to vector<8x7xf32>
    %c0_66 = arith.constant 0 : index
    %c70 = arith.constant 70 : index
    %69 = vector.load %arg6[%c0_66, %c70] : memref<8x196xf32, #tpu.memory_space<vmem>>, vector<8x7xf32>
    tpu.vector_store %arg6[%c0_66, %c70], %68 {strides = array<i32>} : memref<8x196xf32, #tpu.memory_space<vmem>>, vector<8x7xf32>,
    %c0_67 = arith.constant 0 : index
    %c1_68 = arith.constant 1 : index
    %c4_69 = arith.constant 4 : index
    %c0_70 = arith.constant 0 : index
    %70 = vector.load %arg1[%c0_67, %c1_68, %c4_69, %c0_70] : memref<8x4x7x16xf32, #tpu.memory_space<vmem>>, vector<8x1x1x16xf32>
    %71 = vector.shape_cast %70 : vector<8x1x1x16xf32> to vector<8x1x16xf32>
    %72 = vector.broadcast %71 : vector<8x1x16xf32> to vector<8x7x16xf32>
    %73 = arith.mulf %72, %45 : vector<8x7x16xf32>
    %cst_71 = arith.constant dense<0.000000e+00> : vector<8x7xf32>
    %74 = vector.multi_reduction <add>, %73, %cst_71 [2] : vector<8x7x16xf32> to vector<8x7xf32>
    %c0_72 = arith.constant 0 : index
    %c77 = arith.constant 77 : index
    %75 = vector.load %arg6[%c0_72, %c77] : memref<8x196xf32, #tpu.memory_space<vmem>>, vector<8x7xf32>
    tpu.vector_store %arg6[%c0_72, %c77], %74 {strides = array<i32>} : memref<8x196xf32, #tpu.memory_space<vmem>>, vector<8x7xf32>,
    %c0_73 = arith.constant 0 : index
    %c1_74 = arith.constant 1 : index
    %c5_75 = arith.constant 5 : index
    %c0_76 = arith.constant 0 : index
    %76 = vector.load %arg1[%c0_73, %c1_74, %c5_75, %c0_76] : memref<8x4x7x16xf32, #tpu.memory_space<vmem>>, vector<8x1x1x16xf32>
    %77 = vector.shape_cast %76 : vector<8x1x1x16xf32> to vector<8x1x16xf32>
    %78 = vector.broadcast %77 : vector<8x1x16xf32> to vector<8x7x16xf32>
    %79 = arith.mulf %78, %45 : vector<8x7x16xf32>
    %cst_77 = arith.constant dense<0.000000e+00> : vector<8x7xf32>
    %80 = vector.multi_reduction <add>, %79, %cst_77 [2] : vector<8x7x16xf32> to vector<8x7xf32>
    %c0_78 = arith.constant 0 : index
    %c84 = arith.constant 84 : index
    %81 = vector.load %arg6[%c0_78, %c84] : memref<8x196xf32, #tpu.memory_space<vmem>>, vector<8x7xf32>
    tpu.vector_store %arg6[%c0_78, %c84], %80 {strides = array<i32>} : memref<8x196xf32, #tpu.memory_space<vmem>>, vector<8x7xf32>,
    %c0_79 = arith.constant 0 : index
    %c1_80 = arith.constant 1 : index
    %c6_81 = arith.constant 6 : index
    %c0_82 = arith.constant 0 : index
    %82 = vector.load %arg1[%c0_79, %c1_80, %c6_81, %c0_82] : memref<8x4x7x16xf32, #tpu.memory_space<vmem>>, vector<8x1x1x16xf32>
    %83 = vector.shape_cast %82 : vector<8x1x1x16xf32> to vector<8x1x16xf32>
    %84 = vector.broadcast %83 : vector<8x1x16xf32> to vector<8x7x16xf32>
    %85 = arith.mulf %84, %45 : vector<8x7x16xf32>
    %cst_83 = arith.constant dense<0.000000e+00> : vector<8x7xf32>
    %86 = vector.multi_reduction <add>, %85, %cst_83 [2] : vector<8x7x16xf32> to vector<8x7xf32>
    %c0_84 = arith.constant 0 : index
    %c91 = arith.constant 91 : index
    %87 = vector.load %arg6[%c0_84, %c91] : memref<8x196xf32, #tpu.memory_space<vmem>>, vector<8x7xf32>
    tpu.vector_store %arg6[%c0_84, %c91], %86 {strides = array<i32>} : memref<8x196xf32, #tpu.memory_space<vmem>>, vector<8x7xf32>,
    %c0_85 = arith.constant 0 : index
    %c2_86 = arith.constant 2 : index
    %c0_87 = arith.constant 0 : index
    %c0_88 = arith.constant 0 : index
    %88 = vector.load %arg1[%c0_85, %c2_86, %c0_87, %c0_88] : memref<8x4x7x16xf32, #tpu.memory_space<vmem>>, vector<8x1x7x16xf32>
    %89 = vector.shape_cast %88 : vector<8x1x7x16xf32> to vector<8x7x16xf32>
    %c0_89 = arith.constant 0 : index
    %c2_90 = arith.constant 2 : index
    %c0_91 = arith.constant 0 : index
    %c0_92 = arith.constant 0 : index
    %90 = vector.load %arg1[%c0_89, %c2_90, %c0_91, %c0_92] : memref<8x4x7x16xf32, #tpu.memory_space<vmem>>, vector<8x1x1x16xf32>
    %91 = vector.shape_cast %90 : vector<8x1x1x16xf32> to vector<8x1x16xf32>
    %92 = vector.broadcast %91 : vector<8x1x16xf32> to vector<8x7x16xf32>
    %93 = arith.mulf %92, %89 : vector<8x7x16xf32>
    %cst_93 = arith.constant dense<0.000000e+00> : vector<8x7xf32>
    %94 = vector.multi_reduction <add>, %93, %cst_93 [2] : vector<8x7x16xf32> to vector<8x7xf32>
    %c0_94 = arith.constant 0 : index
    %c98 = arith.constant 98 : index
    %95 = vector.load %arg6[%c0_94, %c98] : memref<8x196xf32, #tpu.memory_space<vmem>>, vector<8x7xf32>
    tpu.vector_store %arg6[%c0_94, %c98], %94 {strides = array<i32>} : memref<8x196xf32, #tpu.memory_space<vmem>>, vector<8x7xf32>,
    %c0_95 = arith.constant 0 : index
    %c2_96 = arith.constant 2 : index
    %c1_97 = arith.constant 1 : index
    %c0_98 = arith.constant 0 : index
    %96 = vector.load %arg1[%c0_95, %c2_96, %c1_97, %c0_98] : memref<8x4x7x16xf32, #tpu.memory_space<vmem>>, vector<8x1x1x16xf32>
    %97 = vector.shape_cast %96 : vector<8x1x1x16xf32> to vector<8x1x16xf32>
    %98 = vector.broadcast %97 : vector<8x1x16xf32> to vector<8x7x16xf32>
    %99 = arith.mulf %98, %89 : vector<8x7x16xf32>
    %cst_99 = arith.constant dense<0.000000e+00> : vector<8x7xf32>
    %100 = vector.multi_reduction <add>, %99, %cst_99 [2] : vector<8x7x16xf32> to vector<8x7xf32>
    %c0_100 = arith.constant 0 : index
    %c105 = arith.constant 105 : index
    %101 = vector.load %arg6[%c0_100, %c105] : memref<8x196xf32, #tpu.memory_space<vmem>>, vector<8x7xf32>
    tpu.vector_store %arg6[%c0_100, %c105], %100 {strides = array<i32>} : memref<8x196xf32, #tpu.memory_space<vmem>>, vector<8x7xf32>,
    %c0_101 = arith.constant 0 : index
    %c2_102 = arith.constant 2 : index
    %c2_103 = arith.constant 2 : index
    %c0_104 = arith.constant 0 : index
    %102 = vector.load %arg1[%c0_101, %c2_102, %c2_103, %c0_104] : memref<8x4x7x16xf32, #tpu.memory_space<vmem>>, vector<8x1x1x16xf32>
    %103 = vector.shape_cast %102 : vector<8x1x1x16xf32> to vector<8x1x16xf32>
    %104 = vector.broadcast %103 : vector<8x1x16xf32> to vector<8x7x16xf32>
    %105 = arith.mulf %104, %89 : vector<8x7x16xf32>
    %cst_105 = arith.constant dense<0.000000e+00> : vector<8x7xf32>
    %106 = vector.multi_reduction <add>, %105, %cst_105 [2] : vector<8x7x16xf32> to vector<8x7xf32>
    %c0_106 = arith.constant 0 : index
    %c112 = arith.constant 112 : index
    %107 = vector.load %arg6[%c0_106, %c112] : memref<8x196xf32, #tpu.memory_space<vmem>>, vector<8x7xf32>
    tpu.vector_store %arg6[%c0_106, %c112], %106 {strides = array<i32>} : memref<8x196xf32, #tpu.memory_space<vmem>>, vector<8x7xf32>,
    %c0_107 = arith.constant 0 : index
    %c2_108 = arith.constant 2 : index
    %c3_109 = arith.constant 3 : index
    %c0_110 = arith.constant 0 : index
    %108 = vector.load %arg1[%c0_107, %c2_108, %c3_109, %c0_110] : memref<8x4x7x16xf32, #tpu.memory_space<vmem>>, vector<8x1x1x16xf32>
    %109 = vector.shape_cast %108 : vector<8x1x1x16xf32> to vector<8x1x16xf32>
    %110 = vector.broadcast %109 : vector<8x1x16xf32> to vector<8x7x16xf32>
    %111 = arith.mulf %110, %89 : vector<8x7x16xf32>
    %cst_111 = arith.constant dense<0.000000e+00> : vector<8x7xf32>
    %112 = vector.multi_reduction <add>, %111, %cst_111 [2] : vector<8x7x16xf32> to vector<8x7xf32>
    %c0_112 = arith.constant 0 : index
    %c119 = arith.constant 119 : index
    %113 = vector.load %arg6[%c0_112, %c119] : memref<8x196xf32, #tpu.memory_space<vmem>>, vector<8x7xf32>
    tpu.vector_store %arg6[%c0_112, %c119], %112 {strides = array<i32>} : memref<8x196xf32, #tpu.memory_space<vmem>>, vector<8x7xf32>,
    %c0_113 = arith.constant 0 : index
    %c2_114 = arith.constant 2 : index
    %c4_115 = arith.constant 4 : index
    %c0_116 = arith.constant 0 : index
    %114 = vector.load %arg1[%c0_113, %c2_114, %c4_115, %c0_116] : memref<8x4x7x16xf32, #tpu.memory_space<vmem>>, vector<8x1x1x16xf32>
    %115 = vector.shape_cast %114 : vector<8x1x1x16xf32> to vector<8x1x16xf32>
    %116 = vector.broadcast %115 : vector<8x1x16xf32> to vector<8x7x16xf32>
    %117 = arith.mulf %116, %89 : vector<8x7x16xf32>
    %cst_117 = arith.constant dense<0.000000e+00> : vector<8x7xf32>
    %118 = vector.multi_reduction <add>, %117, %cst_117 [2] : vector<8x7x16xf32> to vector<8x7xf32>
    %c0_118 = arith.constant 0 : index
    %c126 = arith.constant 126 : index
    %119 = vector.load %arg6[%c0_118, %c126] : memref<8x196xf32, #tpu.memory_space<vmem>>, vector<8x7xf32>
    tpu.vector_store %arg6[%c0_118, %c126], %118 {strides = array<i32>} : memref<8x196xf32, #tpu.memory_space<vmem>>, vector<8x7xf32>,
    %c0_119 = arith.constant 0 : index
    %c2_120 = arith.constant 2 : index
    %c5_121 = arith.constant 5 : index
    %c0_122 = arith.constant 0 : index
    %120 = vector.load %arg1[%c0_119, %c2_120, %c5_121, %c0_122] : memref<8x4x7x16xf32, #tpu.memory_space<vmem>>, vector<8x1x1x16xf32>
    %121 = vector.shape_cast %120 : vector<8x1x1x16xf32> to vector<8x1x16xf32>
    %122 = vector.broadcast %121 : vector<8x1x16xf32> to vector<8x7x16xf32>
    %123 = arith.mulf %122, %89 : vector<8x7x16xf32>
    %cst_123 = arith.constant dense<0.000000e+00> : vector<8x7xf32>
    %124 = vector.multi_reduction <add>, %123, %cst_123 [2] : vector<8x7x16xf32> to vector<8x7xf32>
    %c0_124 = arith.constant 0 : index
    %c133 = arith.constant 133 : index
    %125 = vector.load %arg6[%c0_124, %c133] : memref<8x196xf32, #tpu.memory_space<vmem>>, vector<8x7xf32>
    tpu.vector_store %arg6[%c0_124, %c133], %124 {strides = array<i32>} : memref<8x196xf32, #tpu.memory_space<vmem>>, vector<8x7xf32>,
    %c0_125 = arith.constant 0 : index
    %c2_126 = arith.constant 2 : index
    %c6_127 = arith.constant 6 : index
    %c0_128 = arith.constant 0 : index
    %126 = vector.load %arg1[%c0_125, %c2_126, %c6_127, %c0_128] : memref<8x4x7x16xf32, #tpu.memory_space<vmem>>, vector<8x1x1x16xf32>
    %127 = vector.shape_cast %126 : vector<8x1x1x16xf32> to vector<8x1x16xf32>
    %128 = vector.broadcast %127 : vector<8x1x16xf32> to vector<8x7x16xf32>
    %129 = arith.mulf %128, %89 : vector<8x7x16xf32>
    %cst_129 = arith.constant dense<0.000000e+00> : vector<8x7xf32>
    %130 = vector.multi_reduction <add>, %129, %cst_129 [2] : vector<8x7x16xf32> to vector<8x7xf32>
    %c0_130 = arith.constant 0 : index
    %c140 = arith.constant 140 : index
    %131 = vector.load %arg6[%c0_130, %c140] : memref<8x196xf32, #tpu.memory_space<vmem>>, vector<8x7xf32>
    tpu.vector_store %arg6[%c0_130, %c140], %130 {strides = array<i32>} : memref<8x196xf32, #tpu.memory_space<vmem>>, vector<8x7xf32>,
    %c0_131 = arith.constant 0 : index
    %c3_132 = arith.constant 3 : index
    %c0_133 = arith.constant 0 : index
    %c0_134 = arith.constant 0 : index
    %132 = vector.load %arg1[%c0_131, %c3_132, %c0_133, %c0_134] : memref<8x4x7x16xf32, #tpu.memory_space<vmem>>, vector<8x1x7x16xf32>
    %133 = vector.shape_cast %132 : vector<8x1x7x16xf32> to vector<8x7x16xf32>
    %c0_135 = arith.constant 0 : index
    %c3_136 = arith.constant 3 : index
    %c0_137 = arith.constant 0 : index
    %c0_138 = arith.constant 0 : index
    %134 = vector.load %arg1[%c0_135, %c3_136, %c0_137, %c0_138] : memref<8x4x7x16xf32, #tpu.memory_space<vmem>>, vector<8x1x1x16xf32>
    %135 = vector.shape_cast %134 : vector<8x1x1x16xf32> to vector<8x1x16xf32>
    %136 = vector.broadcast %135 : vector<8x1x16xf32> to vector<8x7x16xf32>
    %137 = arith.mulf %136, %133 : vector<8x7x16xf32>
    %cst_139 = arith.constant dense<0.000000e+00> : vector<8x7xf32>
    %138 = vector.multi_reduction <add>, %137, %cst_139 [2] : vector<8x7x16xf32> to vector<8x7xf32>
    %c0_140 = arith.constant 0 : index
    %c147 = arith.constant 147 : index
    %139 = vector.load %arg6[%c0_140, %c147] : memref<8x196xf32, #tpu.memory_space<vmem>>, vector<8x7xf32>
    tpu.vector_store %arg6[%c0_140, %c147], %138 {strides = array<i32>} : memref<8x196xf32, #tpu.memory_space<vmem>>, vector<8x7xf32>,
    %c0_141 = arith.constant 0 : index
    %c3_142 = arith.constant 3 : index
    %c1_143 = arith.constant 1 : index
    %c0_144 = arith.constant 0 : index
    %140 = vector.load %arg1[%c0_141, %c3_142, %c1_143, %c0_144] : memref<8x4x7x16xf32, #tpu.memory_space<vmem>>, vector<8x1x1x16xf32>
    %141 = vector.shape_cast %140 : vector<8x1x1x16xf32> to vector<8x1x16xf32>
    %142 = vector.broadcast %141 : vector<8x1x16xf32> to vector<8x7x16xf32>
    %143 = arith.mulf %142, %133 : vector<8x7x16xf32>
    %cst_145 = arith.constant dense<0.000000e+00> : vector<8x7xf32>
    %144 = vector.multi_reduction <add>, %143, %cst_145 [2] : vector<8x7x16xf32> to vector<8x7xf32>
    %c0_146 = arith.constant 0 : index
    %c154 = arith.constant 154 : index
    %145 = vector.load %arg6[%c0_146, %c154] : memref<8x196xf32, #tpu.memory_space<vmem>>, vector<8x7xf32>
    tpu.vector_store %arg6[%c0_146, %c154], %144 {strides = array<i32>} : memref<8x196xf32, #tpu.memory_space<vmem>>, vector<8x7xf32>,
    %c0_147 = arith.constant 0 : index
    %c3_148 = arith.constant 3 : index
    %c2_149 = arith.constant 2 : index
    %c0_150 = arith.constant 0 : index
    %146 = vector.load %arg1[%c0_147, %c3_148, %c2_149, %c0_150] : memref<8x4x7x16xf32, #tpu.memory_space<vmem>>, vector<8x1x1x16xf32>
    %147 = vector.shape_cast %146 : vector<8x1x1x16xf32> to vector<8x1x16xf32>
    %148 = vector.broadcast %147 : vector<8x1x16xf32> to vector<8x7x16xf32>
    %149 = arith.mulf %148, %133 : vector<8x7x16xf32>
    %cst_151 = arith.constant dense<0.000000e+00> : vector<8x7xf32>
    %150 = vector.multi_reduction <add>, %149, %cst_151 [2] : vector<8x7x16xf32> to vector<8x7xf32>
    %c0_152 = arith.constant 0 : index
    %c161 = arith.constant 161 : index
    %151 = vector.load %arg6[%c0_152, %c161] : memref<8x196xf32, #tpu.memory_space<vmem>>, vector<8x7xf32>
    tpu.vector_store %arg6[%c0_152, %c161], %150 {strides = array<i32>} : memref<8x196xf32, #tpu.memory_space<vmem>>, vector<8x7xf32>,
    %c0_153 = arith.constant 0 : index
    %c3_154 = arith.constant 3 : index
    %c3_155 = arith.constant 3 : index
    %c0_156 = arith.constant 0 : index
    %152 = vector.load %arg1[%c0_153, %c3_154, %c3_155, %c0_156] : memref<8x4x7x16xf32, #tpu.memory_space<vmem>>, vector<8x1x1x16xf32>
    %153 = vector.shape_cast %152 : vector<8x1x1x16xf32> to vector<8x1x16xf32>
    %154 = vector.broadcast %153 : vector<8x1x16xf32> to vector<8x7x16xf32>
    %155 = arith.mulf %154, %133 : vector<8x7x16xf32>
    %cst_157 = arith.constant dense<0.000000e+00> : vector<8x7xf32>
    %156 = vector.multi_reduction <add>, %155, %cst_157 [2] : vector<8x7x16xf32> to vector<8x7xf32>
    %c0_158 = arith.constant 0 : index
    %c168 = arith.constant 168 : index
    %157 = vector.load %arg6[%c0_158, %c168] : memref<8x196xf32, #tpu.memory_space<vmem>>, vector<8x7xf32>
    tpu.vector_store %arg6[%c0_158, %c168], %156 {strides = array<i32>} : memref<8x196xf32, #tpu.memory_space<vmem>>, vector<8x7xf32>,
    %c0_159 = arith.constant 0 : index
    %c3_160 = arith.constant 3 : index
    %c4_161 = arith.constant 4 : index
    %c0_162 = arith.constant 0 : index
    %158 = vector.load %arg1[%c0_159, %c3_160, %c4_161, %c0_162] : memref<8x4x7x16xf32, #tpu.memory_space<vmem>>, vector<8x1x1x16xf32>
    %159 = vector.shape_cast %158 : vector<8x1x1x16xf32> to vector<8x1x16xf32>
    %160 = vector.broadcast %159 : vector<8x1x16xf32> to vector<8x7x16xf32>
    %161 = arith.mulf %160, %133 : vector<8x7x16xf32>
    %cst_163 = arith.constant dense<0.000000e+00> : vector<8x7xf32>
    %162 = vector.multi_reduction <add>, %161, %cst_163 [2] : vector<8x7x16xf32> to vector<8x7xf32>
    %c0_164 = arith.constant 0 : index
    %c175 = arith.constant 175 : index
    %163 = vector.load %arg6[%c0_164, %c175] : memref<8x196xf32, #tpu.memory_space<vmem>>, vector<8x7xf32>
    tpu.vector_store %arg6[%c0_164, %c175], %162 {strides = array<i32>} : memref<8x196xf32, #tpu.memory_space<vmem>>, vector<8x7xf32>,
    %c0_165 = arith.constant 0 : index
    %c3_166 = arith.constant 3 : index
    %c5_167 = arith.constant 5 : index
    %c0_168 = arith.constant 0 : index
    %164 = vector.load %arg1[%c0_165, %c3_166, %c5_167, %c0_168] : memref<8x4x7x16xf32, #tpu.memory_space<vmem>>, vector<8x1x1x16xf32>
    %165 = vector.shape_cast %164 : vector<8x1x1x16xf32> to vector<8x1x16xf32>
    %166 = vector.broadcast %165 : vector<8x1x16xf32> to vector<8x7x16xf32>
    %167 = arith.mulf %166, %133 : vector<8x7x16xf32>
    %cst_169 = arith.constant dense<0.000000e+00> : vector<8x7xf32>
    %168 = vector.multi_reduction <add>, %167, %cst_169 [2] : vector<8x7x16xf32> to vector<8x7xf32>
    %c0_170 = arith.constant 0 : index
    %c182 = arith.constant 182 : index
    %169 = vector.load %arg6[%c0_170, %c182] : memref<8x196xf32, #tpu.memory_space<vmem>>, vector<8x7xf32>
    tpu.vector_store %arg6[%c0_170, %c182], %168 {strides = array<i32>} : memref<8x196xf32, #tpu.memory_space<vmem>>, vector<8x7xf32>,
    %c0_171 = arith.constant 0 : index
    %c3_172 = arith.constant 3 : index
    %c6_173 = arith.constant 6 : index
    %c0_174 = arith.constant 0 : index
    %170 = vector.load %arg1[%c0_171, %c3_172, %c6_173, %c0_174] : memref<8x4x7x16xf32, #tpu.memory_space<vmem>>, vector<8x1x1x16xf32>
    %171 = vector.shape_cast %170 : vector<8x1x1x16xf32> to vector<8x1x16xf32>
    %172 = vector.broadcast %171 : vector<8x1x16xf32> to vector<8x7x16xf32>
    %173 = arith.mulf %172, %133 : vector<8x7x16xf32>
    %cst_175 = arith.constant dense<0.000000e+00> : vector<8x7xf32>
    %174 = vector.multi_reduction <add>, %173, %cst_175 [2] : vector<8x7x16xf32> to vector<8x7xf32>
    %c0_176 = arith.constant 0 : index
    %c189 = arith.constant 189 : index
    %175 = vector.load %arg6[%c0_176, %c189] : memref<8x196xf32, #tpu.memory_space<vmem>>, vector<8x7xf32>
    tpu.vector_store %arg6[%c0_176, %c189], %174 {strides = array<i32>} : memref<8x196xf32, #tpu.memory_space<vmem>>, vector<8x7xf32>,
    %c0_177 = arith.constant 0 : index
    %c0_178 = arith.constant 0 : index
    %176 = vector.load %arg6[%c0_177, %c0_178] : memref<8x196xf32, #tpu.memory_space<vmem>>, vector<8x196xf32>
    %c0_179 = arith.constant 0 : index
    %c0_180 = arith.constant 0 : index
    %177 = vector.load %arg2[%c0_179, %c0_180] : memref<196x128xf32, #tpu.memory_space<vmem>>, vector<196x128xf32>
    %cst_181 = arith.constant dense<0.000000e+00> : vector<8x128xf32>
    %178 = tpu.matmul %176, %177, %cst_181 {dimension_numbers = #tpu.dot_dimension_numbers<[1], [0], [0], [1], [0, 0, 1, 1], [], []>} : vector<8x196xf32>, vector<196x128xf32>, vector<8x128xf32> -> vector<8x128xf32>
    %c0_182 = arith.constant 0 : index
    %c0_183 = arith.constant 0 : index
    %179 = vector.load %arg3[%c0_182, %c0_183] : memref<1x128xf32, #tpu.memory_space<vmem>>, vector<1x128xf32>
    %180 = vector.broadcast %179 : vector<1x128xf32> to vector<8x128xf32>
    %181 = arith.addf %178, %180 : vector<8x128xf32>
    %c0_184 = arith.constant 0 : index
    %c0_185 = arith.constant 0 : index
    %182 = memref.load %arg4[%c0_184, %c0_185] : memref<1x1xf32, #tpu.memory_space<smem>>
    %cst_186 = arith.constant 0.000000e+00 : f32
    %183 = vector.broadcast %cst_186 : f32 to vector<8x128xf32>
    %184 = arith.cmpf ogt, %181, %183 : vector<8x128xf32>
    %185 = vector.broadcast %182 : f32 to vector<8x128xf32>
    %186 = arith.mulf %185, %181 : vector<8x128xf32>
    %187 = arith.select %184, %181, %186 : vector<8x128xi1>, vector<8x128xf32>
    %c0_187 = arith.constant 0 : index
    %c0_188 = arith.constant 0 : index
    %188 = vector.load %arg5[%c0_187, %c0_188] : memref<8x128xf32, #tpu.memory_space<vmem>>, vector<8x128xf32>
    tpu.vector_store %arg5[%c0_187, %c0_188], %187 {strides = array<i32>} : memref<8x128xf32, #tpu.memory_space<vmem>>, vector<8x128xf32>,
    return
  }
  func.func @transform_0(%arg0: i32) -> (i32, i32, i32, i32) {
    %c0_i32 = arith.constant 0 : i32
    %c0_i32_0 = arith.constant 0 : i32
    %c0_i32_1 = arith.constant 0 : i32
    %c0_i32_2 = arith.constant 0 : i32
    return %arg0, %c0_i32, %c0_i32_0, %c0_i32_1 : i32, i32, i32, i32
  }
  func.func @transform_1(%arg0: i32) -> (i32, i32) {
    %c0_i32 = arith.constant 0 : i32
    %c0_i32_0 = arith.constant 0 : i32
    %c0_i32_1 = arith.constant 0 : i32
    return %c0_i32, %c0_i32_0 : i32, i32
  }
  func.func @transform_2(%arg0: i32) -> (i32, i32) {
    %c0_i32 = arith.constant 0 : i32
    %c0_i32_0 = arith.constant 0 : i32
    %c0_i32_1 = arith.constant 0 : i32
    return %c0_i32, %c0_i32_0 : i32, i32
  }
  func.func @transform_3(%arg0: i32) -> (i32, i32) {
    %c0_i32 = arith.constant 0 : i32
    %c0_i32_0 = arith.constant 0 : i32
    %c0_i32_1 = arith.constant 0 : i32
    return %c0_i32, %c0_i32_0 : i32, i32
  }
  func.func @transform_4(%arg0: i32) -> (i32, i32) {
    %c0_i32 = arith.constant 0 : i32
    %c0_i32_0 = arith.constant 0 : i32
    return %arg0, %c0_i32 : i32, i32
  }
}

</mosaic_0001>

<bundles_post_ra>
// kernel: tpu_custom_call.1
= control target key start
LH: loop header
LB: loop body
LE: loop exit
PB: predicated region body
PF: predicated region fallthrough
CT: control target
= control target key end

     0   :  { %vm75_vm0 = vcmask 129024   ;;  %s6510_s0 = inlined_call_operand.vmem [shape: f32[8,4,7,16], index: 0, kind: input, shape index: {}]   ;;  %s6511_s1 = inlined_call_operand.vmem [shape: f32[196,128], index: 1, kind: input, shape index: {}]   ;;  %s6512_s2 = inlined_call_operand.vmem [shape: f32[1,128], index: 2, kind: input, shape index: {}]   ;;  %s6513_s3 = inlined_call_operand.<no memory space> [shape: f32[1,1], index: 3, kind: input, shape index: {}]   ;;  %s6514_s4 = inlined_call_operand.hbm [shape: f32[8,128], index: 4, kind: output, shape index: {}]  }
   0x1   :  { %v4214_v0 = vld [vmem:[%s6510_s0 + $0x40] sm:$0x7f] }
   0x2   :  { %v3684_v1 = vld [vmem:[%s6510_s0 + $0x40] ss:$0 sm:$0xff]  ;;  %v3691_v30 = vld [vmem:[%s6510_s0 + $0x21] ss:$0 sm:$0xff]  ;;  %v3699_v54 = vld [vmem:[%s6510_s0 + $0x22] ss:$0 sm:$0xff] }
   0x3   :  { %v69_v2 = vmul.f32 %v3684_v1, %v4214_v0  ;;  %v4223_v3 = vld [vmem:[%s6510_s0] sm:$0x7f] }
   0x4   :  { %v3682_v4 = vld [vmem:[%s6510_s0] ss:$0 sm:$0xff]  ;;  %v3690_v31 = vld [vmem:[%s6510_s0 + $0x1] ss:$0 sm:$0xff]  ;;  %v3698_v55 = vld [vmem:[%s6510_s0 + $0x2] ss:$0 sm:$0xff] }
   0x5   :  { %v4231_v5 = vld [vmem:[%s6510_s0 + $0x60] sm:$0x7f]  ;;  %v67_v6 = vmul.f32 %v3682_v4, %v4223_v3  ;;  %v82_v10 = vsel %vm75_vm0, %v69_v2, 0.0  ;;  %v199_v35 = vmul.f32 %v3690_v31, %v4223_v3  ;;  %v322_v59 = vmul.f32 %v3698_v55, %v4223_v3 }
   0x6   :  { %v3685_v7 = vld [vmem:[%s6510_s0 + $0x60] ss:$0 sm:$0xff]  ;;  %83 = vadd.xlane.f32.xlu1 %v82_v10  ;;  %v3693_v36 = vld [vmem:[%s6510_s0 + $0x61] ss:$0 sm:$0xff]  ;;  %v3701_v60 = vld [vmem:[%s6510_s0 + $0x62] ss:$0 sm:$0xff] }
   0x7   :  { %v4240_v8 = vld [vmem:[%s6510_s0 + $0x20] sm:$0x7f]  ;;  %v70_v11 = vmul.f32 %v3685_v7, %v4231_v5  ;;  %v76_v15 = vsel %vm75_vm0, %v67_v6, 0.0  ;;  %v202_v39 = vmul.f32 %v3693_v36, %v4231_v5  ;;  %v207_v40 = vsel %vm75_vm0, %v199_v35, 0.0 }
   0x8   :  { %v3683_v9 = vld [vmem:[%s6510_s0 + $0x20] ss:$0 sm:$0xff]  ;;  %77 = vadd.xlane.f32.xlu0 %v76_v15  ;;  %v200_v33 = vmul.f32 %v3691_v30, %v4240_v8  ;;  %v3692_v37 = vld [vmem:[%s6510_s0 + $0x41] ss:$0 sm:$0xff]  ;;  %v323_v57 = vmul.f32 %v3699_v54, %v4240_v8  ;;  %v3700_v61 = vld [vmem:[%s6510_s0 + $0x42] ss:$0 sm:$0xff]  ;;  %v325_v63 = vmul.f32 %v3701_v60, %v4231_v5 }
   0x9   :  { %v68_v12 = vmul.f32 %v3683_v9, %v4240_v8  ;;  %v4251_v13 = vld [vmem:[%s6510_s0 + $0xa0] sm:$0x7f]  ;;  %v85_v18 = vsel %vm75_vm0, %v70_v11, 0.0  ;;  %v201_v41 = vmul.f32 %v3692_v37, %v4214_v0  ;;  %v216_v44 = vsel %vm75_vm0, %v202_v39, 0.0 }
   0xa   :  { %v3687_v14 = vld [vmem:[%s6510_s0 + $0xa0] ss:$0 sm:$0xff]  ;;  %86 = vadd.xlane.f32.xlu1 %v85_v18  ;;  %v210_v38 = vsel %vm75_vm0, %v200_v33, 0.0  ;;  %v3695_v42 = vld [vmem:[%s6510_s0 + $0xa1] ss:$0 sm:$0xff]  ;;  %v333_v62 = vsel %vm75_vm0, %v323_v57, 0.0  ;;  %v324_v2 = vmul.f32 %v3700_v61, %v4214_v0 }
   0xb   :  { %v4260_v16 = vld [vmem:[%s6510_s0 + $0x80] sm:$0x7f]  ;;  %v72_v19 = vmul.f32 %v3687_v14, %v4251_v13  ;;  %v79_v20 = vsel %vm75_vm0, %v68_v12, 0.0  ;;  %v204_v45 = vmul.f32 %v3695_v42, %v4251_v13  ;;  %v213_v46 = vsel %vm75_vm0, %v201_v41, 0.0 }
   0xc   :  { %v3686_v17 = vld [vmem:[%s6510_s0 + $0x80] ss:$0 sm:$0xff]  ;;  %80 = vadd.xlane.f32.xlu0 %v79_v20  ;;  %v3694_v43 = vld [vmem:[%s6510_s0 + $0x81] ss:$0 sm:$0xff]  ;;  %v330_v1 = vsel %vm75_vm0, %v322_v59, 0.0  ;;  %v339_v7 = vsel %vm75_vm0, %v325_v63, 0.0 }
   0xd   :  { %v71_v21 = vmul.f32 %v3686_v17, %v4260_v16  ;;  %v4272_v22 = vld [vmem:[%s6510_s0 + $0xe0] sm:$0x7f]  ;;  %v91_v26 = vsel %vm75_vm0, %v72_v19, 0.0  ;;  %v203_v47 = vmul.f32 %v3694_v43, %v4260_v16  ;;  %v222_v50 = vsel %vm75_vm0, %v204_v45, 0.0 }
   0xe   :  { %v3689_v23 = vld [vmem:[%s6510_s0 + $0xe0] ss:$0 sm:$0xff]  ;;  %92 = vadd.xlane.f32.xlu1 %v91_v26  ;;  %v3697_v48 = vld [vmem:[%s6510_s0 + $0xe1] ss:$0 sm:$0xff]  ;;  %v3703_v4 = vld [vmem:[%s6510_s0 + $0xa2] ss:$0 sm:$0xff] }
   0xf   :  { %v4280_v24 = vld [vmem:[%s6510_s0 + $0xc0] sm:$0x7f]  ;;  %v74_v27 = vmul.f32 %v3689_v23, %v4272_v22  ;;  %v88_v28 = vsel %vm75_vm0, %v71_v21, 0.0  ;;  %v206_v51 = vmul.f32 %v3697_v48, %v4272_v22  ;;  %v219_v52 = vsel %vm75_vm0, %v203_v47, 0.0 }
  0x10   :  { %v3688_v25 = vld [vmem:[%s6510_s0 + $0xc0] ss:$0 sm:$0xff]  ;;  %89 = vadd.xlane.f32.xlu0 %v88_v28  ;;  %v3696_v49 = vld [vmem:[%s6510_s0 + $0xc1] ss:$0 sm:$0xff]  ;;  %v3702_v6 = vld [vmem:[%s6510_s0 + $0x82] ss:$0 sm:$0xff]  ;;  %v327_v9 = vmul.f32 %v3703_v4, %v4251_v13 }
  0x11   :  { %v73_v29 = vmul.f32 %v3688_v25, %v4280_v24  ;;  %v97_v32 = vsel %vm75_vm0, %v74_v27, 0.0  ;;  %v205_v53 = vmul.f32 %v3696_v49, %v4280_v24  ;;  %v228_v56 = vsel %vm75_vm0, %v206_v51, 0.0  ;;  %v3705_v12 = vld [vmem:[%s6510_s0 + $0xe2] ss:$0 sm:$0xff]  ;;  %v3707_v20 = vld [vmem:[%s6510_s0 + $0x23] ss:$0 sm:$0xff] }
  0x12   :  { %98 = vadd.xlane.f32.xlu1 %v97_v32  ;;  %v336_v10 = vsel %vm75_vm0, %v324_v2, 0.0  ;;  %v326_v11 = vmul.f32 %v3702_v6, %v4260_v16  ;;  %v3704_v14 = vld [vmem:[%s6510_s0 + $0xc2] ss:$0 sm:$0xff]  ;;  %v345_v15 = vsel %vm75_vm0, %v327_v9, 0.0  ;;  %v329_v17 = vmul.f32 %v3705_v12, %v4272_v22  ;;  %v3706_v21 = vld [vmem:[%s6510_s0 + $0x3] ss:$0 sm:$0xff] }
  0x13   :  { %v94_v34 = vsel %vm75_vm0, %v73_v29, 0.0  ;;  %v225_v58 = vsel %vm75_vm0, %v205_v53, 0.0  ;;  %v328_v19 = vmul.f32 %v3704_v14, %v4280_v24  ;;  %v446_v25 = vmul.f32 %v3707_v20, %v4240_v8  ;;  %v3709_v28 = vld [vmem:[%s6510_s0 + $0x63] ss:$0 sm:$0xff] }
  0x14   :  { %95 = vadd.xlane.f32.xlu0 %v94_v34  ;;  %v342_v18 = vsel %vm75_vm0, %v326_v11, 0.0  ;;  %v351_v23 = vsel %vm75_vm0, %v329_v17, 0.0  ;;  %v445_v27 = vmul.f32 %v3706_v21, %v4223_v3  ;;  %v3708_v29 = vld [vmem:[%s6510_s0 + $0x43] ss:$0 sm:$0xff]  ;;  %v448_v31 = vmul.f32 %v3709_v28, %v4231_v5 }
  0x15   :  { %v348_v26 = vsel %vm75_vm0, %v328_v19, 0.0  ;;  %v456_v30 = vsel %vm75_vm0, %v446_v25, 0.0  ;;  %v447_v33 = vmul.f32 %v3708_v29, %v4214_v0  ;;  %v3711_v34 = vld [vmem:[%s6510_s0 + $0xa3] ss:$0 sm:$0xff] }
  0x16   :  { %211 = vadd.xlane.f32.xlu1 %v210_v38  ;;  %v453_v32 = vsel %vm75_vm0, %v445_v27, 0.0  ;;  %v3710_v35 = vld [vmem:[%s6510_s0 + $0x83] ss:$0 sm:$0xff]  ;;  %v462_v36 = vsel %vm75_vm0, %v448_v31, 0.0  ;;  %v450_v37 = vmul.f32 %v3711_v34, %v4251_v13 }
  0x17   :  { %v459_v38 = vsel %vm75_vm0, %v447_v33, 0.0  ;;  %v449_v39 = vmul.f32 %v3710_v35, %v4260_v16  ;;  %v3712_v41 = vld [vmem:[%s6510_s0 + $0xc3] ss:$0 sm:$0xff] }
  0x18   :  { %208 = vadd.xlane.f32.xlu0 %v207_v40  ;;  %v3713_v40 = vld [vmem:[%s6510_s0 + $0xe3] ss:$0 sm:$0xff]  ;;  %v468_v42 = vsel %vm75_vm0, %v450_v37, 0.0  ;;  %v451_v45 = vmul.f32 %v3712_v41, %v4280_v24 }
  0x19   :  { %v452_v43 = vmul.f32 %v3713_v40, %v4272_v22 }
  0x1a   :  { %217 = vadd.xlane.f32.xlu1 %v216_v44  ;;  %v465_v44 = vsel %vm75_vm0, %v449_v39, 0.0 }
  0x1c   :  { %214 = vadd.xlane.f32.xlu0 %v213_v46  ;;  %v3715_v46 = vld [vmem:[%s6510_s0 + $0x24] ss:$0 sm:$0xff] }
  0x1e   :  { %223 = vadd.xlane.f32.xlu1 %v222_v50 }
  0x20   :  { %220 = vadd.xlane.f32.xlu0 %v219_v52 }
  0x22   :  { %229 = vadd.xlane.f32.xlu1 %v228_v56 }
  0x24   :  { %226 = vadd.xlane.f32.xlu0 %v225_v58 }
  0x26   :  { %334 = vadd.xlane.f32.xlu1 %v333_v62 }
  0x28   :  { %331 = vadd.xlane.f32.xlu0 %v330_v1 }
  0x2a   :  { %340 = vadd.xlane.f32.xlu1 %v339_v7 }
  0x2c   :  { %337 = vadd.xlane.f32.xlu0 %v336_v10 }
  0x2e   :  { %346 = vadd.xlane.f32.xlu1 %v345_v15 }
  0x30   :  { %343 = vadd.xlane.f32.xlu0 %v342_v18 }
  0x32   :  { %352 = vadd.xlane.f32.xlu1 %v351_v23 }
  0x34   :  { %349 = vadd.xlane.f32.xlu0 %v348_v26 }
  0x36   :  { %457 = vadd.xlane.f32.xlu1 %v456_v30 }
  0x38   :  { %454 = vadd.xlane.f32.xlu0 %v453_v32 }
  0x3a   :  { %463 = vadd.xlane.f32.xlu1 %v462_v36 }
  0x3c   :  { %460 = vadd.xlane.f32.xlu0 %v459_v38 }
  0x3d   :  { %10 = vsyncpa [#allocation5], 0  ;;  %v3714_v47 = vld [vmem:[%s6510_s0 + $0x4] ss:$0 sm:$0xff]  ;;  %v474_v48 = vsel %vm75_vm0, %v452_v43, 0.0  ;;  %v569_v49 = vmul.f32 %v3715_v46, %v4240_v8  ;;  %v471_v50 = vsel %vm75_vm0, %v451_v45, 0.0 }
  0x3e   :  { %469 = vadd.xlane.f32.xlu1 %v468_v42  ;;  %v568_v51 = vmul.f32 %v3714_v47, %v4223_v3  ;;  %v3717_v52 = vld [vmem:[%s6510_s0 + $0x64] ss:$0 sm:$0xff]  ;;  %v3723_v10 = vld [vmem:[%s6510_s0 + $0x25] ss:$0 sm:$0xff]  ;;  %v3731_v38 = vld [vmem:[%s6510_s0 + $0x26] ss:$0 sm:$0xff] }
  0x3f   :  { %v3716_v53 = vld [vmem:[%s6510_s0 + $0x44] ss:$0 sm:$0xff]  ;;  %v579_v54 = vsel %vm75_vm0, %v569_v49, 0.0  ;;  %v571_v55 = vmul.f32 %v3717_v52, %v4231_v5  ;;  %v3722_v11 = vld [vmem:[%s6510_s0 + $0x5] ss:$0 sm:$0xff]  ;;  %v692_v14 = vmul.f32 %v3723_v10, %v4240_v8  ;;  %v815_v41 = vmul.f32 %v3731_v38, %v4240_v8  ;;  %s4185_s18 = smov [#allocation4]  }
  0x40   :  { %466 = vadd.xlane.f32.xlu0 %v465_v44  ;;  %v576_v56 = vsel %vm75_vm0, %v568_v51, 0.0  ;;  %v570_v57 = vmul.f32 %v3716_v53, %v4214_v0  ;;  %v3719_v58 = vld [vmem:[%s6510_s0 + $0xa4] ss:$0 sm:$0xff]  ;;  %v691_v17 = vmul.f32 %v3722_v11, %v4223_v3  ;;  %v3725_v18 = vld [vmem:[%s6510_s0 + $0x65] ss:$0 sm:$0xff]  ;;  %vm142_vm1 = vcmask 1041409  }
  0x41   :  { %v3718_v59 = vld [vmem:[%s6510_s0 + $0x84] ss:$0 sm:$0xff]  ;;  %v585_v60 = vsel %vm75_vm0, %v571_v55, 0.0  ;;  %v573_v61 = vmul.f32 %v3719_v58, %v4251_v13  ;;  %v3724_v19 = vld [vmem:[%s6510_s0 + $0x45] ss:$0 sm:$0xff]  ;;  %v702_v20 = vsel %vm75_vm0, %v692_v14, 0.0  ;;  %v694_v21 = vmul.f32 %v3725_v18, %v4231_v5 }
  0x42   :  { %475 = vadd.xlane.f32.xlu1 %v474_v48  ;;  %v582_v62 = vsel %vm75_vm0, %v570_v57, 0.0  ;;  %v572_v63 = vmul.f32 %v3718_v59, %v4260_v16  ;;  %v3721_v1 = vld [vmem:[%s6510_s0 + $0xe4] ss:$0 sm:$0xff]  ;;  %v699_v23 = vsel %vm75_vm0, %v691_v17, 0.0  ;;  %v693_v25 = vmul.f32 %v3724_v19, %v4214_v0  ;;  %v3727_v26 = vld [vmem:[%s6510_s0 + $0xa5] ss:$0 sm:$0xff] }
  0x43   :  { %v3720_v2 = vld [vmem:[%s6510_s0 + $0xc4] ss:$0 sm:$0xff]  ;;  %v591_v4 = vsel %vm75_vm0, %v573_v61, 0.0  ;;  %v575_v6 = vmul.f32 %v3721_v1, %v4272_v22  ;;  %v3726_v27 = vld [vmem:[%s6510_s0 + $0x85] ss:$0 sm:$0xff]  ;;  %v708_v28 = vsel %vm75_vm0, %v694_v21, 0.0  ;;  %v696_v29 = vmul.f32 %v3727_v26, %v4251_v13 }
  0x44   :  { %472 = vadd.xlane.f32.xlu0 %v471_v50  ;;  %v588_v7 = vsel %vm75_vm0, %v572_v63, 0.0  ;;  %v574_v9 = vmul.f32 %v3720_v2, %v4280_v24  ;;  %v705_v30 = vsel %vm75_vm0, %v693_v25, 0.0  ;;  %v695_v31 = vmul.f32 %v3726_v27, %v4260_v16  ;;  %v3729_v32 = vld [vmem:[%s6510_s0 + $0xe5] ss:$0 sm:$0xff]  ;;  %v3730_v39 = vld [vmem:[%s6510_s0 + $0x6] ss:$0 sm:$0xff] }
  0x45   :  { %v597_v12 = vsel %vm75_vm0, %v575_v6, 0.0  ;;  %v3728_v33 = vld [vmem:[%s6510_s0 + $0xc5] ss:$0 sm:$0xff]  ;;  %v714_v34 = vsel %vm75_vm0, %v696_v29, 0.0  ;;  %v698_v35 = vmul.f32 %v3729_v32, %v4272_v22  ;;  %v814_v43 = vmul.f32 %v3730_v39, %v4223_v3  ;;  %v3733_v44 = vld [vmem:[%s6510_s0 + $0x66] ss:$0 sm:$0xff] }
  0x46   :  { %580 = vadd.xlane.f32.xlu1 %v579_v54  ;;  %v594_v15 = vsel %vm75_vm0, %v574_v9, 0.0  ;;  %v711_v36 = vsel %vm75_vm0, %v695_v31, 0.0  ;;  %v697_v37 = vmul.f32 %v3728_v33, %v4280_v24  ;;  %v3732_v45 = vld [vmem:[%s6510_s0 + $0x46] ss:$0 sm:$0xff]  ;;  %v825_v46 = vsel %vm75_vm0, %v815_v41, 0.0  ;;  %s3674_s19 = sshll.u32 %s4185_s18, 4  ;;  %s3675_s19 = int_to_ptr.vmem [resolvable:$true] %s3674_s19 }
  0x47   :  { %v720_v40 = vsel %vm75_vm0, %v698_v35, 0.0  ;;  %v817_v47 = vmul.f32 %v3733_v44, %v4231_v5  ;;  %v822_v8 = vsel %vm75_vm0, %v814_v43, 0.0  ;;  %v816_v48 = vmul.f32 %v3732_v45, %v4214_v0  ;;  %v3735_v3 = vld [vmem:[%s6510_s0 + $0xa6] ss:$0 sm:$0xff]  ;;  %v3755_v57 = vld [vmem:[%s6510_s0 + $0x28] ss:$0 sm:$0xff]  ;;  %p4164_p1 = scmp.lt.s32.totalorder %s3675_s19, %s3675_s19 }
  0x48   :  { %577 = vadd.xlane.f32.xlu0 %v576_v56  ;;  %v717_v42 = vsel %vm75_vm0, %v697_v37, 0.0  ;;  %v3734_v49 = vld [vmem:[%s6510_s0 + $0x86] ss:$0 sm:$0xff]  ;;  %v819_v51 = vmul.f32 %v3735_v3, %v4251_v13  ;;  %v4540_v58 = vld [vmem:[%s6510_s0 + $0x8] sm:$0x7f]  ;;  %vm144_vm2 = vcmask 1042434  }
  0x49   :  { %v831_v50 = vsel %vm75_vm0, %v817_v47, 0.0  ;;  %v828_v5 = vsel %vm75_vm0, %v816_v48, 0.0  ;;  %v818_v52 = vmul.f32 %v3734_v49, %v4260_v16  ;;  %v3737_v0 = vld [vmem:[%s6510_s0 + $0xe6] ss:$0 sm:$0xff]  ;;  %v4532_v16 = vld [vmem:[%s6510_s0 + $0x28] sm:$0x7f] }
  0x4a   :  { %586 = vadd.xlane.f32.xlu1 %v585_v60  ;;  %v3736_v53 = vld [vmem:[%s6510_s0 + $0xc6] ss:$0 sm:$0xff]  ;;  %v837_v54 = vsel %vm75_vm0, %v819_v51, 0.0  ;;  %v821_v55 = vmul.f32 %v3737_v0, %v4272_v22  ;;  %v3754_v22 = vld [vmem:[%s6510_s0 + $0x8] ss:$0 sm:$0xff]  ;;  %v947_v59 = vmul.f32 %v3755_v57, %v4532_v16  ;;  %vm146_vm3 = vcmask 1043459  }
  0x4b   :  { %v834_v13 = vsel %vm75_vm0, %v818_v52, 0.0  ;;  %v820_v56 = vmul.f32 %v3736_v53, %v4280_v24  ;;  %v946_v61 = vmul.f32 %v3754_v22, %v4540_v58  ;;  %v3757_v63 = vld [vmem:[%s6510_s0 + $0x68] ss:$0 sm:$0xff]  ;;  %v3770_v31 = vld [vmem:[%s6510_s0 + $0x9] ss:$0 sm:$0xff]  ;;  %vm148_vm4 = vcmask 1044484  }
  0x4c   :  { %583 = vadd.xlane.f32.xlu0 %v582_v62  ;;  %v843_v24 = vsel %vm75_vm0, %v821_v55, 0.0  ;;  %v4552_v62 = vld [vmem:[%s6510_s0 + $0x68] sm:$0x7f]  ;;  %v1069_v35 = vmul.f32 %v3770_v31, %v4540_v58  ;;  %v3939_v37 = vld [vmem:[%s6510_s0 + $0x34] ss:$0 sm:$0xff]  ;;  %vm150_vm5 = vcmask 1045509  }
  0x4d   :  { %v840_v60 = vsel %vm75_vm0, %v820_v56, 0.0  ;;  %v4560_v1 = vld [vmem:[%s6510_s0 + $0x48] sm:$0x7f]  ;;  %v949_v6 = vmul.f32 %v3757_v63, %v4552_v62  ;;  %v4630_v38 = vld [vmem:[%s6510_s0 + $0x10] sm:$0x7f]  ;;  %vm152_vm6 = vcmask 1046534  }
  0x4e   :  { %592 = vadd.xlane.f32.xlu1 %v591_v4  ;;  %v3756_v2 = vld [vmem:[%s6510_s0 + $0x48] ss:$0 sm:$0xff]  ;;  %v957_v4 = vsel %vm75_vm0, %v947_v59, 0.0  ;;  %v3938_v39 = vld [vmem:[%s6510_s0 + $0x14] ss:$0 sm:$0xff]  ;;  %vm154_vm7 = vcmask 1047559  }
  0x4f   :  { %v948_v9 = vmul.f32 %v3756_v2, %v4560_v1  ;;  %v4572_v10 = vld [vmem:[%s6510_s0 + $0xa8] sm:$0x7f]  ;;  %v2308_v43 = vmul.f32 %v3938_v39, %v4630_v38  ;;  %v4652_v3 = vld [vmem:[%s6510_s0 + $0x50] sm:$0x7f]  ;;  %vm157_vm8 = vcmask 56320   ;;  %vm280_vm9 = vcmask 113720  }
  0x50   :  { %589 = vadd.xlane.f32.xlu0 %v588_v7  ;;  %v954_v7 = vsel %vm75_vm0, %v946_v61, 0.0  ;;  %v3759_v11 = vld [vmem:[%s6510_s0 + $0xa8] ss:$0 sm:$0xff]  ;;  %v3786_v44 = vld [vmem:[%s6510_s0 + $0xa] ss:$0 sm:$0xff]  ;;  %vm403_vm10 = vcmask 171120  }
  0x51   :  { %v3758_v14 = vld [vmem:[%s6510_s0 + $0x88] ss:$0 sm:$0xff]  ;;  %v951_v17 = vmul.f32 %v3759_v11, %v4572_v10  ;;  %v960_v18 = vsel %vm75_vm0, %v948_v9, 0.0  ;;  %v3772_v45 = vld [vmem:[%s6510_s0 + $0x49] ss:$0 sm:$0xff]  ;;  %v1192_v47 = vmul.f32 %v3786_v44, %v4540_v58  ;;  %vm526_vm11 = vcmask 228520  }
  0x52   :  { %598 = vadd.xlane.f32.xlu1 %v597_v12  ;;  %v4580_v12 = vld [vmem:[%s6510_s0 + $0x88] sm:$0x7f]  ;;  %v1071_v48 = vmul.f32 %v3772_v45, %v4560_v1  ;;  %v3940_v49 = vld [vmem:[%s6510_s0 + $0x54] ss:$0 sm:$0xff]  ;;  %v3955_v53 = vld [vmem:[%s6510_s0 + $0x35] ss:$0 sm:$0xff] }
  0x53   :  { %v950_v19 = vmul.f32 %v3758_v14, %v4580_v12  ;;  %v3761_v21 = vld [vmem:[%s6510_s0 + $0xe8] ss:$0 sm:$0xff]  ;;  %v969_v26 = vsel %vm75_vm0, %v951_v17, 0.0  ;;  %v1200_v51 = vsel %vm75_vm0, %v1192_v47, 0.0  ;;  %v3954_v55 = vld [vmem:[%s6510_s0 + $0x15] ss:$0 sm:$0xff] }
  0x54   :  { %595 = vadd.xlane.f32.xlu0 %v594_v15  ;;  %v963_v15 = vsel %vm75_vm0, %v949_v6, 0.0  ;;  %v3760_v25 = vld [vmem:[%s6510_s0 + $0xc8] ss:$0 sm:$0xff]  ;;  %v1083_v52 = vsel %vm75_vm0, %v1071_v48, 0.0  ;;  %v2474_v22 = vmul.f32 %v3954_v55, %v4630_v38  ;;  %v3773_v61 = vld [vmem:[%s6510_s0 + $0x69] ss:$0 sm:$0xff] }
  0x55   :  { %v1072_v9 = vmul.f32 %v3773_v61, %v4552_v62  ;;  %v3803_v11 = vld [vmem:[%s6510_s0 + $0x2b] ss:$0 sm:$0xff]  ;;  %v3941_v31 = vld [vmem:[%s6510_s0 + $0x74] ss:$0 sm:$0xff]  ;;  %v3971_v44 = vld [vmem:[%s6510_s0 + $0x36] ss:$0 sm:$0xff] }
  0x56   :  { %703 = vadd.xlane.f32.xlu1 %v702_v20  ;;  %v4592_v20 = vld [vmem:[%s6510_s0 + $0xe8] sm:$0x7f]  ;;  %v3970_v47 = vld [vmem:[%s6510_s0 + $0x16] ss:$0 sm:$0xff]  ;;  %vm649_vm12 = vcmask 285920   ;;  %vm772_vm13 = vcmask 343320  }
  0x57   :  { %v953_v27 = vmul.f32 %v3761_v21, %v4592_v20  ;;  %v3789_v55 = vld [vmem:[%s6510_s0 + $0x6a] ss:$0 sm:$0xff]  ;;  %vm895_vm14 = vcmask 400720   ;;  %vm1027_vm15 = vcmask 458120   ;;  %s4159_s20 = scalar_lea.vmem %s3675_s19, 128 }
  0x58   :  { %700 = vadd.xlane.f32.xlu0 %v699_v23  ;;  %v4600_v23 = vld [vmem:[%s6510_s0 + $0xc8] sm:$0x7f]  ;;  %p4160_p0 = scmp.ne.s32.totalorder %s3675_s19, %s4159_s20  ;;  %p4165_p2 = scmp.lt.s32.totalorder %s4159_s20, %s4159_s20 }
  0x59   :  { %v952_v29 = vmul.f32 %v3760_v25, %v4600_v23  ;;  %v975_v32 = vsel %vm75_vm0, %v953_v27, 0.0  ;;  %v1086_v25 = vsel %vm75_vm0, %v1072_v9, 0.0  ;;  %v3956_v27 = vld [vmem:[%s6510_s0 + $0x55] ss:$0 sm:$0xff] }
  0x5a   :  { %709 = vadd.xlane.f32.xlu1 %v708_v28  ;;  %v966_v28 = vsel %vm75_vm0, %v950_v19, 0.0  ;;  %v1316_v19 = vmul.f32 %v3803_v11, %v4532_v16  ;;  %v2476_v39 = vmul.f32 %v3956_v27, %v4652_v3  ;;  %v3818_v11 = vld [vmem:[%s6510_s0 + $0xc] ss:$0 sm:$0xff]  ;;  %p4166_p3 = por %p4165_p2, %p4164_p1 }
  0x5c   :  { %706 = vadd.xlane.f32.xlu0 %v705_v30  ;;  %v3771_v30 = vld [vmem:[%s6510_s0 + $0x29] ss:$0 sm:$0xff]  ;;  %p4167_p4 = pnand %p4166_p3, %p4160_p0 }
  0x5d   :  { %v1070_v33 = vmul.f32 %v3771_v30, %v4532_v16  ;;  %v4710_v30 = vld [vmem:[%s6510_s0 + $0x70] sm:$0x7f] }
  0x5e   :  { %715 = vadd.xlane.f32.xlu1 %v714_v34  ;;  %v972_v34 = vsel %vm75_vm0, %v952_v29, 0.0 }
  0x60   :  { %712 = vadd.xlane.f32.xlu0 %v711_v36  ;;  %v4622_v36 = vld [vmem:[%s6510_s0 + $0x30] sm:$0x7f] }
  0x61   :  { %v2309_v41 = vmul.f32 %v3939_v37, %v4622_v36  ;;  %v2475_v56 = vmul.f32 %v3955_v53, %v4622_v36  ;;  %v1326_v37 = vsel %vm75_vm0, %v1316_v19, 0.0 }
  0x62   :  { %721 = vadd.xlane.f32.xlu1 %v720_v40  ;;  %v1080_v40 = vsel %vm75_vm0, %v1070_v33, 0.0 }
  0x63   :  { %v2485_v2 = vsel %vm75_vm0, %v2475_v56, 0.0  ;;  %v3774_v56 = vld [vmem:[%s6510_s0 + $0x89] ss:$0 sm:$0xff] }
  0x64   :  { %718 = vadd.xlane.f32.xlu0 %v717_v42  ;;  %v1077_v42 = vsel %vm75_vm0, %v1069_v35, 0.0  ;;  %v1073_v9 = vmul.f32 %v3774_v56, %v4580_v12 }
  0x66   :  { %826 = vadd.xlane.f32.xlu1 %v825_v46  ;;  %v2319_v46 = vsel %vm75_vm0, %v2309_v41, 0.0 }
  0x68   :  { %823 = vadd.xlane.f32.xlu0 %v822_v8  ;;  %v2316_v8 = vsel %vm75_vm0, %v2308_v43, 0.0  ;;  %v2311_v43 = vmul.f32 %v3941_v31, %v4710_v30 }
  0x6a   :  { %832 = vadd.xlane.f32.xlu1 %v831_v50  ;;  %v3787_v50 = vld [vmem:[%s6510_s0 + $0x2a] ss:$0 sm:$0xff]  ;;  %v2325_v53 = vsel %vm75_vm0, %v2311_v43, 0.0 }
  0x6b   :  { %v1193_v0 = vmul.f32 %v3787_v50, %v4532_v16 }
  0x6c   :  { %829 = vadd.xlane.f32.xlu0 %v828_v5  ;;  %v2310_v5 = vmul.f32 %v3940_v49, %v4652_v3 }
  0x6d   :  { %v1203_v57 = vsel %vm75_vm0, %v1193_v0, 0.0 }
  0x6e   :  { %838 = vadd.xlane.f32.xlu1 %v837_v54  ;;  %v108_v54 = vlaneseq }
  0x70   :  { %835 = vadd.xlane.f32.xlu0 %v834_v13  ;;  %v2322_v13 = vsel %vm75_vm0, %v2310_v5, 0.0  ;;  %v4677_v59 = vand.u32 127, %v108_v54  ;;  %v2598_v5 = vmul.f32 %v3971_v44, %v4622_v36  ;;  %v3972_v44 = vld [vmem:[%s6510_s0 + $0x56] ss:$0 sm:$0xff] }
  0x72   :  { %844 = vadd.xlane.f32.xlu1 %v843_v24  ;;  %v3788_v24 = vld [vmem:[%s6510_s0 + $0x4a] ss:$0 sm:$0xff]  ;;  %v239_v48 = vadd.s32 4294967289, %v4677_v59 }
  0x74   :  { %841 = vadd.xlane.f32.xlu0 %v840_v60  ;;  %v4679_v60 = vshrl.u32 %v108_v54, 7  ;;  %v2597_v54 = vmul.f32 %v3970_v47, %v4630_v38 }
  0x76   :  { %958 = vadd.xlane.f32.xlu1 %v957_v4  ;;  %v1194_v4 = vmul.f32 %v3788_v24, %v4560_v1  ;;  %v4693_v14 = vsub.s32 %v4677_v59, %v4679_v60 }
  0x78   :  { %955 = vadd.xlane.f32.xlu0 %v954_v7  ;;  %v2482_v7 = vsel %vm75_vm0, %v2474_v22, 0.0  ;;  %v4748_v22 = vsub.s32 %v239_v48, %v4679_v60  ;;  %v362_v48 = vadd.s32 4294967282, %v4677_v59 }
  0x7a   :  { %964 = vadd.xlane.f32.xlu1 %v963_v15  ;;  %v3802_v15 = vld [vmem:[%s6510_s0 + $0xb] ss:$0 sm:$0xff] }
  0x7c   :  { %961 = vadd.xlane.f32.xlu0 %v960_v18  ;;  %v1206_v18 = vsel %vm75_vm0, %v1194_v4, 0.0 }
  0x7e   :  { %970 = vadd.xlane.f32.xlu1 %v969_v26  ;;  %v1315_v26 = vmul.f32 %v3802_v15, %v4540_v58 }
  0x80   :  { %967 = vadd.xlane.f32.xlu0 %v966_v28 }
  0x82   :  { %976 = vadd.xlane.f32.xlu1 %v975_v32 }
  0x84   :  { %973 = vadd.xlane.f32.xlu0 %v972_v34 }
  0x86   :  { %1081 = vadd.xlane.f32.xlu1 %v1080_v40 }
  0x88   :  { %1078 = vadd.xlane.f32.xlu0 %v1077_v42  ;;  %v1323_v42 = vsel %vm75_vm0, %v1315_v26, 0.0  ;;  %v1089_v26 = vsel %vm75_vm0, %v1073_v9, 0.0 }
  0x8a   :  { %2320 = vadd.xlane.f32.xlu1 %v2319_v46 }
  0x8c   :  { %2317 = vadd.xlane.f32.xlu0 %v2316_v8 }
  0x8e   :  { %1201 = vadd.xlane.f32.xlu1 %v1200_v51  ;;  %v2488_v51 = vsel %vm75_vm0, %v2476_v39, 0.0 }
  0x90   :  { %1084 = vadd.xlane.f32.xlu0 %v1083_v52 }
  0x92   :  { %2323 = vadd.xlane.f32.xlu1 %v2322_v13 }
  0x93   :  { %v84_v63 = vpop.xlane.xlu1 %83 }
  0x94   :  { %1204 = vadd.xlane.f32.xlu0 %v1203_v57  ;;  %v121_v32 = vrot.slane %v84_v63, %v4693_v14  ;;  %v2608_v63 = vsel %vm75_vm0, %v2598_v5, 0.0  ;;  %v2599_v5 = vmul.f32 %v3972_v44, %v4652_v3  ;;  %v4815_v3 = vld [vmem:[%s6510_s0 + $0x18] sm:$0x7f] }
  0x95   :  { %v78_v6 = vpop.xlane.xlu0 %77 }
  0x96   :  { %2486 = vadd.xlane.f32.xlu1 %v2485_v2  ;;  %v113_v28 = vrot.slane %v78_v6, %v4693_v14  ;;  %v1195_v2 = vmul.f32 %v3789_v55, %v4552_v62  ;;  %v4806_v55 = vld [vmem:[%s6510_s0 + $0x38] sm:$0x7f] }
  0x97   :  { %v87_v17 = vpop.xlane.xlu1 %86 }
  0x98   :  { %2483 = vadd.xlane.f32.xlu0 %v2482_v7  ;;  %v125_v33 = vrot.slane %v87_v17, %v4693_v14  ;;  %v2605_v7 = vsel %vm75_vm0, %v2597_v54, 0.0  ;;  %v1209_v19 = vsel %vm75_vm0, %v1195_v2, 0.0  ;;  %v2611_v2 = vsel %vm75_vm0, %v2599_v5, 0.0 }
  0x99   :  { %v81_v21 = vpop.xlane.xlu0 %80 }
  0x9a   :  { %v117_v29 = vrot.slane %v81_v21, %v4693_v14  ;;  %1207 = vadd.xlane.f32.xlu1 %v1206_v18  ;;  %v1438_v21 = vmul.f32 %v3818_v11, %v4540_v58 }
  0x9b   :  { %v93_v35 = vpop.xlane.xlu1 %92 }
  0x9c   :  { %v143_v34 = vsel %vm142_vm1, %v117_v29, %v113_v28  ;;  %1087 = vadd.xlane.f32.xlu0 %v1086_v25  ;;  %v133_v8 = vrot.slane %v93_v35, %v4693_v14  ;;  %v4771_v28 = vld [vmem:[%s6510_s0 + $0x90] sm:$0x7f]  ;;  %v1446_v39 = vsel %vm75_vm0, %v1438_v21, 0.0 }
  0x9d   :  { %v145_v40 = vsel %vm144_vm2, %v121_v32, %v143_v34  ;;  %v90_v41 = vpop.xlane.xlu0 %89  ;;  %v3942_v29 = vld [vmem:[%s6510_s0 + $0x94] ss:$0 sm:$0xff]  ;;  %v3819_v32 = vld [vmem:[%s6510_s0 + $0x2c] ss:$0 sm:$0xff] }
  0x9e   :  { %v147_v45 = vsel %vm146_vm3, %v125_v33, %v145_v40  ;;  %v129_v46 = vrot.slane %v90_v41, %v4693_v14  ;;  %1327 = vadd.xlane.f32.xlu1 %v1326_v37  ;;  %v2312_v40 = vmul.f32 %v3942_v29, %v4771_v28  ;;  %v1439_v43 = vmul.f32 %v3819_v32, %v4532_v16 }
  0x9f   :  { %v99_v50 = vpop.xlane.xlu1 %98 }
  0xa0   :  { %v149_v49 = vsel %vm148_vm4, %v129_v46, %v147_v45  ;;  %1324 = vadd.xlane.f32.xlu0 %v1323_v42  ;;  %v141_v52 = vrot.slane %v99_v50, %v4693_v14  ;;  %v3957_v46 = vld [vmem:[%s6510_s0 + $0x75] ss:$0 sm:$0xff] }
  0xa1   :  { %v96_v0 = vpop.xlane.xlu0 %95  ;;  %v151_v57 = vsel %vm150_vm5, %v133_v8, %v149_v49  ;;  %v2477_v54 = vmul.f32 %v3957_v46, %v4710_v30 }
  0xa2   :  { %v137_v13 = vrot.slane %v96_v0, %v4693_v14  ;;  %2489 = vadd.xlane.f32.xlu1 %v2488_v51  ;;  %v3804_v14 = vld [vmem:[%s6510_s0 + $0x4b] ss:$0 sm:$0xff]  ;;  %v2328_v51 = vsel %vm75_vm0, %v2312_v40, 0.0 }
  0xa3   :  { %v212_v61 = vpop.xlane.xlu1 %211  ;;  %v1317_v27 = vmul.f32 %v3804_v14, %v4560_v1  ;;  %v2491_v9 = vsel %vm75_vm0, %v2477_v54, 0.0  ;;  %v3790_v14 = vld [vmem:[%s6510_s0 + $0x8a] ss:$0 sm:$0xff] }
  0xa4   :  { %v153_v24 = vsel %vm152_vm6, %v137_v13, %v151_v57  ;;  %2326 = vadd.xlane.f32.xlu0 %v2325_v53  ;;  %v247_v15 = vrot.slane %v212_v61, %v4748_v22  ;;  %v1449_v53 = vsel %vm75_vm0, %v1439_v43, 0.0  ;;  %v3995_v13 = vld [vmem:[%s6510_s0 + $0x38] ss:$0 sm:$0xff]  ;;  %v4822_v61 = vsub.s32 %v362_v48, %v4679_v60 }
  0xa5   :  { %v155_v4 = vsel %vm154_vm7, %v141_v52, %v153_v24  ;;  %v209_v6 = vpop.xlane.xlu0 %208  ;;  %v1329_v42 = vsel %vm75_vm0, %v1317_v27, 0.0  ;;  %v3994_v57 = vld [vmem:[%s6510_s0 + $0x18] ss:$0 sm:$0xff] }
  0xa6   :  { %158 = vst.msk [vmem:[#allocation2] sm:$0xff] %vm157_vm8, %v155_v4  ;;  %v243_v17 = vrot.slane %v209_v6, %v4748_v22  ;;  %2609 = vadd.xlane.f32.xlu1 %v2608_v63  ;;  %v2730_v4 = vmul.f32 %v3995_v13, %v4806_v55  ;;  %v2729_v11 = vmul.f32 %v3994_v57, %v4815_v3  ;;  %vm1150_vm8 = vcmask 515520  }
  0xa7   :  { %v218_v18 = vpop.xlane.xlu1 %217 }
  0xa8   :  { %2606 = vadd.xlane.f32.xlu0 %v2605_v7  ;;  %v272_v33 = vsel %vm142_vm1, %v247_v15, %v243_v17  ;;  %v255_v34 = vrot.slane %v218_v18, %v4748_v22  ;;  %v3775_v15 = vld [vmem:[%s6510_s0 + $0xa9] ss:$0 sm:$0xff]  ;;  %v2740_v21 = vsel %vm75_vm0, %v2730_v4, 0.0  ;;  %v2737_v27 = vsel %vm75_vm0, %v2729_v11, 0.0 }
  0xa9   :  { %v215_v25 = vpop.xlane.xlu0 %214  ;;  %v1074_v29 = vmul.f32 %v3775_v15, %v4572_v10 }
  0xaa   :  { %v251_v31 = vrot.slane %v215_v25, %v4748_v22  ;;  %1210 = vadd.xlane.f32.xlu1 %v1209_v19  ;;  %v1196_v25 = vmul.f32 %v3790_v14, %v4580_v12 }
  0xab   :  { %v224_v37 = vpop.xlane.xlu1 %223  ;;  %v1092_v43 = vsel %vm75_vm0, %v1074_v29, 0.0 }
  0xac   :  { %v273_v35 = vsel %vm144_vm2, %v251_v31, %v272_v33  ;;  %1090 = vadd.xlane.f32.xlu0 %v1089_v26  ;;  %v263_v47 = vrot.slane %v224_v37, %v4748_v22  ;;  %v3820_v31 = vld [vmem:[%s6510_s0 + $0x4c] ss:$0 sm:$0xff]  ;;  %v3805_v33 = vld [vmem:[%s6510_s0 + $0x6b] ss:$0 sm:$0xff]  ;;  %v1212_v40 = vsel %vm75_vm0, %v1196_v25, 0.0 }
  0xad   :  { %v221_v41 = vpop.xlane.xlu0 %220  ;;  %v274_v8 = vsel %vm146_vm3, %v255_v34, %v273_v35  ;;  %v1318_v44 = vmul.f32 %v3805_v33, %v4552_v62 }
  0xae   :  { %v259_v45 = vrot.slane %v221_v41, %v4748_v22  ;;  %1447 = vadd.xlane.f32.xlu1 %v1446_v39  ;;  %v1440_v41 = vmul.f32 %v3820_v31, %v4560_v1 }
  0xaf   :  { %v230_v50 = vpop.xlane.xlu1 %229  ;;  %v1332_v54 = vsel %vm75_vm0, %v1318_v44, 0.0 }
  0xb0   :  { %v275_v49 = vsel %vm148_vm4, %v259_v45, %v274_v8  ;;  %1330 = vadd.xlane.f32.xlu0 %v1329_v42  ;;  %v271_v52 = vrot.slane %v230_v50, %v4748_v22  ;;  %v3835_v45 = vld [vmem:[%s6510_s0 + $0x2d] ss:$0 sm:$0xff]  ;;  %v1452_v5 = vsel %vm75_vm0, %v1440_v41, 0.0 }
  0xb1   :  { %v227_v0 = vpop.xlane.xlu0 %226  ;;  %v276_v24 = vsel %vm150_vm5, %v263_v47, %v275_v49  ;;  %v3834_v47 = vld [vmem:[%s6510_s0 + $0xd] ss:$0 sm:$0xff]  ;;  %v485_v49 = vadd.s32 4294967275, %v4677_v59 }
  0xb2   :  { %v267_v56 = vrot.slane %v227_v0, %v4748_v22  ;;  %2329 = vadd.xlane.f32.xlu1 %v2328_v51  ;;  %v1561_v13 = vmul.f32 %v3834_v47, %v4540_v58  ;;  %v3791_v47 = vld [vmem:[%s6510_s0 + $0xaa] ss:$0 sm:$0xff] }
  0xb3   :  { %v335_v22 = vpop.xlane.xlu1 %334 }
  0xb4   :  { %v277_v63 = vsel %vm152_vm6, %v267_v56, %v276_v24  ;;  %1450 = vadd.xlane.f32.xlu0 %v1449_v53  ;;  %v370_v17 = vrot.slane %v335_v22, %v4822_v61  ;;  %v3958_v56 = vld [vmem:[%s6510_s0 + $0x95] ss:$0 sm:$0xff]  ;;  %v1569_v14 = vsel %vm75_vm0, %v1561_v13, 0.0 }
  0xb5   :  { %v278_v6 = vsel %vm154_vm7, %v271_v52, %v277_v63  ;;  %v332_v7 = vpop.xlane.xlu0 %331  ;;  %v1562_v52 = vmul.f32 %v3835_v45, %v4532_v16  ;;  %v4879_v24 = vld [vmem:[%s6510_s0 + $0xb0] sm:$0x7f] }
  0xb6   :  { %281 = vst.msk [vmem:[#allocation2] sm:$0xff] %vm280_vm9, %v278_v6  ;;  %v366_v18 = vrot.slane %v332_v7, %v4822_v61  ;;  %2612 = vadd.xlane.f32.xlu1 %v2611_v2  ;;  %v3943_v63 = vld [vmem:[%s6510_s0 + $0xb4] ss:$0 sm:$0xff]  ;;  %v4886_v2 = vsub.s32 %v485_v49, %v4679_v60  ;;  %v2478_v7 = vmul.f32 %v3958_v56, %v4771_v28  ;;  %vm2432_vm9 = vcmask 39936  }
  0xb7   :  { %v341_v19 = vpop.xlane.xlu1 %340  ;;  %v1572_v6 = vsel %vm75_vm0, %v1562_v52, 0.0  ;;  %v2313_v15 = vmul.f32 %v3943_v63, %v4879_v24  ;;  %v3821_v63 = vld [vmem:[%s6510_s0 + $0x6c] ss:$0 sm:$0xff] }
  0xb8   :  { %2492 = vadd.xlane.f32.xlu0 %v2491_v9  ;;  %v395_v34 = vsel %vm142_vm1, %v370_v17, %v366_v18  ;;  %v378_v35 = vrot.slane %v341_v19, %v4822_v61  ;;  %v4897_v17 = vld [vmem:[%s6510_s0 + $0x58] sm:$0x7f]  ;;  %v3973_v19 = vld [vmem:[%s6510_s0 + $0x76] ss:$0 sm:$0xff] }
  0xb9   :  { %v338_v26 = vpop.xlane.xlu0 %337  ;;  %v3996_v18 = vld [vmem:[%s6510_s0 + $0x58] ss:$0 sm:$0xff]  ;;  %v2600_v33 = vmul.f32 %v3973_v19, %v4710_v30 }
  0xba   :  { %v374_v32 = vrot.slane %v338_v26, %v4822_v61  ;;  %2741 = vadd.xlane.f32.xlu1 %v2740_v21  ;;  %v2731_v29 = vmul.f32 %v3996_v18, %v4897_v17 }
  0xbb   :  { %v347_v39 = vpop.xlane.xlu1 %346  ;;  %v2614_v45 = vsel %vm75_vm0, %v2600_v33, 0.0 }
  0xbc   :  { %v396_v37 = vsel %vm144_vm2, %v374_v32, %v395_v34  ;;  %2738 = vadd.xlane.f32.xlu0 %v2737_v27  ;;  %v386_v8 = vrot.slane %v347_v39, %v4822_v61  ;;  %v2494_v27 = vsel %vm75_vm0, %v2478_v7, 0.0  ;;  %v2331_v32 = vsel %vm75_vm0, %v2313_v15, 0.0  ;;  %v4011_v34 = vld [vmem:[%s6510_s0 + $0x39] ss:$0 sm:$0xff] }
  0xbd   :  { %v344_v42 = vpop.xlane.xlu0 %343  ;;  %v397_v48 = vsel %vm146_vm3, %v378_v35, %v396_v37  ;;  %v4010_v37 = vld [vmem:[%s6510_s0 + $0x19] ss:$0 sm:$0xff]  ;;  %v2743_v30 = vsel %vm75_vm0, %v2731_v29, 0.0 }
  0xbe   :  { %v382_v46 = vrot.slane %v344_v42, %v4822_v61  ;;  %1213 = vadd.xlane.f32.xlu1 %v1212_v40 }
  0xbf   :  { %v353_v51 = vpop.xlane.xlu1 %352 }
  0xc0   :  { %v398_v50 = vsel %vm148_vm4, %v382_v46, %v397_v48  ;;  %1093 = vadd.xlane.f32.xlu0 %v1092_v43  ;;  %v394_v0 = vrot.slane %v353_v51, %v4822_v61  ;;  %v2853_v43 = vmul.f32 %v4011_v34, %v4806_v55  ;;  %v2852_v46 = vmul.f32 %v4010_v37, %v4815_v3  ;;  %v3776_v48 = vld [vmem:[%s6510_s0 + $0xc9] ss:$0 sm:$0xff]  ;;  %v4973_v37 = vld [vmem:[%s6510_s0 + $0xd0] sm:$0x7f] }
  0xc1   :  { %v350_v53 = vpop.xlane.xlu0 %349  ;;  %v399_v22 = vsel %vm150_vm5, %v386_v8, %v398_v50  ;;  %v608_v51 = vadd.s32 4294967268, %v4677_v59 }
  0xc2   :  { %v390_v57 = vrot.slane %v350_v53, %v4822_v61  ;;  %1453 = vadd.xlane.f32.xlu1 %v1452_v5  ;;  %v1197_v53 = vmul.f32 %v3791_v47, %v4572_v10  ;;  %v2860_v56 = vsel %vm75_vm0, %v2852_v46, 0.0 }
  0xc3   :  { %v458_v61 = vpop.xlane.xlu1 %457 }
  0xc4   :  { %v400_v4 = vsel %vm152_vm6, %v390_v57, %v399_v22  ;;  %1333 = vadd.xlane.f32.xlu0 %v1332_v54  ;;  %v493_v21 = vrot.slane %v458_v61, %v4886_v2  ;;  %v1075_v57 = vmul.f32 %v3776_v48, %v4600_v23  ;;  %v3974_v48 = vld [vmem:[%s6510_s0 + $0x96] ss:$0 sm:$0xff] }
  0xc5   :  { %v401_v9 = vsel %vm154_vm7, %v394_v0, %v400_v4  ;;  %v455_v11 = vpop.xlane.xlu0 %454  ;;  %v2863_v0 = vsel %vm75_vm0, %v2853_v43, 0.0  ;;  %v3806_v4 = vld [vmem:[%s6510_s0 + $0x8b] ss:$0 sm:$0xff] }
  0xc6   :  { %404 = vst.msk [vmem:[#allocation2] sm:$0xff] %vm403_vm10, %v401_v9  ;;  %v489_v25 = vrot.slane %v455_v11, %v4886_v2  ;;  %1573 = vadd.xlane.f32.xlu1 %v1572_v6  ;;  %v4950_v6 = vsub.s32 %v608_v51, %v4679_v60  ;;  %v1215_v11 = vsel %vm75_vm0, %v1197_v53, 0.0  ;;  %v1095_v18 = vsel %vm75_vm0, %v1075_v57, 0.0 }
  0xc7   :  { %v464_v26 = vpop.xlane.xlu1 %463  ;;  %v1319_v19 = vmul.f32 %v3806_v4, %v4580_v12  ;;  %vm1273_vm10 = vcmask 572920  }
  0xc8   :  { %1570 = vadd.xlane.f32.xlu0 %v1569_v14  ;;  %v518_v39 = vsel %vm142_vm1, %v493_v21, %v489_v25  ;;  %v501_v40 = vrot.slane %v464_v26, %v4886_v2  ;;  %v1441_v14 = vmul.f32 %v3821_v63, %v4552_v62  ;;  %v3850_v21 = vld [vmem:[%s6510_s0 + $0xe] ss:$0 sm:$0xff]  ;;  %v3836_v25 = vld [vmem:[%s6510_s0 + $0x4d] ss:$0 sm:$0xff] }
  0xc9   :  { %v461_v31 = vpop.xlane.xlu0 %460  ;;  %v1335_v34 = vsel %vm75_vm0, %v1319_v19, 0.0 }
  0xca   :  { %v497_v35 = vrot.slane %v461_v31, %v4886_v2  ;;  %2495 = vadd.xlane.f32.xlu1 %v2494_v27  ;;  %v1455_v31 = vsel %vm75_vm0, %v1441_v14, 0.0 }
  0xcb   :  { %v470_v42 = vpop.xlane.xlu1 %469 }
  0xcc   :  { %v519_v41 = vsel %vm144_vm2, %v497_v35, %v518_v39  ;;  %2332 = vadd.xlane.f32.xlu0 %v2331_v32  ;;  %v509_v49 = vrot.slane %v470_v42, %v4886_v2  ;;  %v1684_v32 = vmul.f32 %v3850_v21, %v4540_v58  ;;  %v1563_v35 = vmul.f32 %v3836_v25, %v4560_v1  ;;  %v3944_v39 = vld [vmem:[%s6510_s0 + $0xd4] ss:$0 sm:$0xff]  ;;  %v3851_v58 = vld [vmem:[%s6510_s0 + $0x2e] ss:$0 sm:$0xff]  ;;  %v4027_v25 = vld [vmem:[%s6510_s0 + $0x3a] ss:$0 sm:$0xff] }
  0xcd   :  { %v467_v44 = vpop.xlane.xlu0 %466  ;;  %v520_v50 = vsel %vm146_vm3, %v501_v40, %v519_v41 }
  0xce   :  { %v505_v8 = vrot.slane %v467_v44, %v4886_v2  ;;  %2744 = vadd.xlane.f32.xlu1 %v2743_v30  ;;  %v1692_v44 = vsel %vm75_vm0, %v1684_v32, 0.0  ;;  %v1575_v47 = vsel %vm75_vm0, %v1563_v35, 0.0 }
  0xcf   :  { %v476_v52 = vpop.xlane.xlu1 %475 }
  0xd0   :  { %v521_v5 = vsel %vm148_vm4, %v505_v8, %v520_v50  ;;  %2615 = vadd.xlane.f32.xlu0 %v2614_v45  ;;  %v517_v54 = vrot.slane %v476_v52, %v4886_v2  ;;  %v2314_v45 = vmul.f32 %v3944_v39, %v4973_v37  ;;  %v1685_v8 = vmul.f32 %v3851_v58, %v4532_v16  ;;  %v3959_v50 = vld [vmem:[%s6510_s0 + $0xb5] ss:$0 sm:$0xff] }
  0xd1   :  { %v473_v13 = vpop.xlane.xlu0 %472  ;;  %v522_v61 = vsel %vm150_vm5, %v509_v49, %v521_v5  ;;  %v731_v52 = vadd.s32 4294967261, %v4677_v59  ;;  %v2479_v63 = vmul.f32 %v3959_v50, %v4879_v24 }
  0xd2   :  { %v513_v22 = vrot.slane %v473_v13, %v4886_v2  ;;  %2864 = vadd.xlane.f32.xlu1 %v2863_v0  ;;  %v2334_v53 = vsel %vm75_vm0, %v2314_v45, 0.0  ;;  %v1695_v57 = vsel %vm75_vm0, %v1685_v8, 0.0 }
  0xd3   :  { %v581_v9 = vpop.xlane.xlu1 %580  ;;  %v2497_v19 = vsel %vm75_vm0, %v2479_v63, 0.0  ;;  %v3852_v63 = vld [vmem:[%s6510_s0 + $0x4e] ss:$0 sm:$0xff] }
  0xd4   :  { %v523_v7 = vsel %vm152_vm6, %v513_v22, %v522_v61  ;;  %2861 = vadd.xlane.f32.xlu0 %v2860_v56  ;;  %v616_v26 = vrot.slane %v581_v9, %v4950_v6  ;;  %v4012_v22 = vld [vmem:[%s6510_s0 + $0x59] ss:$0 sm:$0xff]  ;;  %v5019_v9 = vsub.s32 %v731_v52, %v4679_v60 }
  0xd5   :  { %v524_v2 = vsel %vm154_vm7, %v517_v54, %v523_v7  ;;  %v578_v15 = vpop.xlane.xlu0 %577  ;;  %v2601_v54 = vmul.f32 %v3974_v48, %v4771_v28  ;;  %v5012_v61 = vld [vmem:[%s6510_s0 + $0x78] sm:$0x7f] }
  0xd6   :  { %527 = vst.msk [vmem:[#allocation2] sm:$0xff] %vm526_vm11, %v524_v2  ;;  %v612_v27 = vrot.slane %v578_v15, %v4950_v6  ;;  %1216 = vadd.xlane.f32.xlu1 %v1215_v11  ;;  %v3997_v28 = vld [vmem:[%s6510_s0 + $0x78] ss:$0 sm:$0xff]  ;;  %v2854_v2 = vmul.f32 %v4012_v22, %v4897_v17  ;;  %vm2555_vm11 = vcmask 97320  }
  0xd7   :  { %v587_v29 = vpop.xlane.xlu1 %586  ;;  %v2617_v14 = vsel %vm75_vm0, %v2601_v54, 0.0  ;;  %v2732_v21 = vmul.f32 %v3997_v28, %v5012_v61 }
  0xd8   :  { %1096 = vadd.xlane.f32.xlu0 %v1095_v18  ;;  %v641_v41 = vsel %vm142_vm1, %v616_v26, %v612_v27  ;;  %v624_v42 = vrot.slane %v587_v29, %v4950_v6  ;;  %v4026_v26 = vld [vmem:[%s6510_s0 + $0x1a] ss:$0 sm:$0xff]  ;;  %v2866_v32 = vsel %vm75_vm0, %v2854_v2, 0.0 }
  0xd9   :  { %v584_v33 = vpop.xlane.xlu0 %583  ;;  %v2746_v35 = vsel %vm75_vm0, %v2732_v21, 0.0  ;;  %v2975_v39 = vmul.f32 %v4026_v26, %v4815_v3 }
  0xda   :  { %v620_v40 = vrot.slane %v584_v33, %v4950_v6  ;;  %1456 = vadd.xlane.f32.xlu1 %v1455_v31  ;;  %v2976_v33 = vmul.f32 %v4027_v25, %v4806_v55 }
  0xdb   :  { %v593_v43 = vpop.xlane.xlu1 %592  ;;  %v2983_v8 = vsel %vm75_vm0, %v2975_v39, 0.0 }
  0xdc   :  { %v642_v30 = vsel %vm144_vm2, %v620_v40, %v641_v41  ;;  %1336 = vadd.xlane.f32.xlu0 %v1335_v34  ;;  %v632_v51 = vrot.slane %v593_v43, %v4950_v6  ;;  %v3792_v40 = vld [vmem:[%s6510_s0 + $0xca] ss:$0 sm:$0xff]  ;;  %v3777_v41 = vld [vmem:[%s6510_s0 + $0xe9] ss:$0 sm:$0xff]  ;;  %v2986_v45 = vsel %vm75_vm0, %v2976_v33, 0.0 }
  0xdd   :  { %v590_v46 = vpop.xlane.xlu0 %589  ;;  %v643_v5 = vsel %vm146_vm3, %v624_v42, %v642_v30  ;;  %v1076_v48 = vmul.f32 %v3777_v41, %v4592_v20 }
  0xde   :  { %v628_v49 = vrot.slane %v590_v46, %v4950_v6  ;;  %1693 = vadd.xlane.f32.xlu1 %v1692_v44  ;;  %v1198_v46 = vmul.f32 %v3792_v40, %v4600_v23  ;;  %v854_v23 = vadd.s32 4294967254, %v4677_v59 }
  0xdf   :  { %v599_v16 = vpop.xlane.xlu1 %598 }
  0xe0   :  { %v644_v0 = vsel %vm148_vm4, %v628_v49, %v643_v5  ;;  %1576 = vadd.xlane.f32.xlu0 %v1575_v47  ;;  %v640_v13 = vrot.slane %v599_v16, %v4950_v6  ;;  %v3822_v49 = vld [vmem:[%s6510_s0 + $0x8c] ss:$0 sm:$0xff]  ;;  %v1218_v16 = vsel %vm75_vm0, %v1198_v46, 0.0 }
  0xe1   :  { %v596_v56 = vpop.xlane.xlu0 %595  ;;  %v645_v7 = vsel %vm150_vm5, %v632_v51, %v644_v0  ;;  %v3807_v51 = vld [vmem:[%s6510_s0 + $0xab] ss:$0 sm:$0xff] }
  0xe2   :  { %v636_v4 = vrot.slane %v596_v56, %v4950_v6  ;;  %2335 = vadd.xlane.f32.xlu1 %v2334_v53  ;;  %v1442_v53 = vmul.f32 %v3822_v49, %v4580_v12  ;;  %v1098_v56 = vsel %vm75_vm0, %v1076_v48, 0.0  ;;  %v5078_v12 = vsub.s32 %v854_v23, %v4679_v60 }
  0xe3   :  { %v704_v6 = vpop.xlane.xlu1 %703  ;;  %v986_v49 = vadd.s32 4294967247, %v4677_v59 }
  0xe4   :  { %v646_v11 = vsel %vm152_vm6, %v636_v4, %v645_v7  ;;  %1696 = vadd.xlane.f32.xlu0 %v1695_v57  ;;  %v739_v27 = vrot.slane %v704_v6, %v5019_v9  ;;  %v1320_v57 = vmul.f32 %v3807_v51, %v4572_v10  ;;  %v3837_v4 = vld [vmem:[%s6510_s0 + $0x6d] ss:$0 sm:$0xff]  ;;  %v1686_v6 = vmul.f32 %v3852_v63, %v4560_v1 }
  0xe5   :  { %v647_v15 = vsel %vm154_vm7, %v640_v13, %v646_v11  ;;  %v701_v18 = vpop.xlane.xlu0 %700  ;;  %v1458_v11 = vsel %vm75_vm0, %v1442_v53, 0.0  ;;  %v4028_v53 = vld [vmem:[%s6510_s0 + $0x5a] ss:$0 sm:$0xff] }
  0xe6   :  { %650 = vst.msk [vmem:[#allocation2] sm:$0xff] %vm649_vm12, %v647_v15  ;;  %v735_v29 = vrot.slane %v701_v18, %v5019_v9  ;;  %2618 = vadd.xlane.f32.xlu1 %v2617_v14  ;;  %v1338_v2 = vsel %vm75_vm0, %v1320_v57, 0.0  ;;  %v1564_v15 = vmul.f32 %v3837_v4, %v4552_v62  ;;  %v3875_v18 = vld [vmem:[%s6510_s0 + $0x30] ss:$0 sm:$0xff]  ;;  %v1698_v26 = vsel %vm75_vm0, %v1686_v6, 0.0 }
  0xe7   :  { %v710_v31 = vpop.xlane.xlu1 %709  ;;  %v1817_v62 = vmul.f32 %v3875_v18, %v4622_v36  ;;  %v3945_v36 = vld [vmem:[%s6510_s0 + $0xf4] ss:$0 sm:$0xff]  ;;  %v5147_v57 = vsub.s32 %v986_v49, %v4679_v60  ;;  %v2977_v4 = vmul.f32 %v4028_v53, %v4897_v17  ;;  %v4042_v6 = vld [vmem:[%s6510_s0 + $0x1b] ss:$0 sm:$0xff]  ;;  %v2353_v53 = vadd.s32 2, %v4677_v59 }
  0xe8   :  { %2498 = vadd.xlane.f32.xlu0 %v2497_v19  ;;  %v764_v42 = vsel %vm142_vm1, %v739_v27, %v735_v29  ;;  %v747_v30 = vrot.slane %v710_v31, %v5019_v9  ;;  %v3874_v19 = vld [vmem:[%s6510_s0 + $0x10] ss:$0 sm:$0xff]  ;;  %v1578_v29 = vsel %vm75_vm0, %v1564_v15, 0.0  ;;  %vm1396_vm12 = vcmask 630320  }
  0xe9   :  { %v707_v34 = vpop.xlane.xlu0 %706  ;;  %v1816_v31 = vmul.f32 %v3874_v19, %v4630_v38  ;;  %v2989_v15 = vsel %vm75_vm0, %v2977_v4, 0.0 }
  0xea   :  { %v743_v58 = vrot.slane %v707_v34, %v5019_v9  ;;  %2867 = vadd.xlane.f32.xlu1 %v2866_v32  ;;  %v3960_v32 = vld [vmem:[%s6510_s0 + $0xd5] ss:$0 sm:$0xff] }
  0xeb   :  { %v716_v44 = vpop.xlane.xlu1 %715  ;;  %v5105_v34 = vld [vmem:[%s6510_s0 + $0xf0] sm:$0x7f]  ;;  %v2480_v41 = vmul.f32 %v3960_v32, %v4973_v37 }
  0xec   :  { %v765_v43 = vsel %vm144_vm2, %v743_v58, %v764_v42  ;;  %2747 = vadd.xlane.f32.xlu0 %v2746_v35  ;;  %v755_v5 = vrot.slane %v716_v44, %v5019_v9  ;;  %v1827_v58 = vsel %vm75_vm0, %v1817_v62, 0.0  ;;  %v5120_v44 = vld [vmem:[%s6510_s0 + $0x98] sm:$0x7f]  ;;  %v3793_v62 = vld [vmem:[%s6510_s0 + $0xea] ss:$0 sm:$0xff] }
  0xed   :  { %v713_v47 = vpop.xlane.xlu0 %712  ;;  %v766_v52 = vsel %vm146_vm3, %v747_v30, %v765_v43  ;;  %v1824_v30 = vsel %vm75_vm0, %v1816_v31, 0.0  ;;  %v2315_v43 = vmul.f32 %v3945_v36, %v5105_v34  ;;  %v5181_v36 = vld [vmem:[%s6510_s0 + $0xc8] sm:$0x7f] }
  0xee   :  { %v751_v50 = vrot.slane %v713_v47, %v5019_v9  ;;  %2987 = vadd.xlane.f32.xlu1 %v2986_v45  ;;  %v3998_v45 = vld [vmem:[%s6510_s0 + $0x98] ss:$0 sm:$0xff]  ;;  %v3975_v47 = vld [vmem:[%s6510_s0 + $0xb6] ss:$0 sm:$0xff] }
  0xef   :  { %v722_v20 = vpop.xlane.xlu1 %721 }
  0xf0   :  { %v767_v0 = vsel %vm148_vm4, %v751_v50, %v766_v52  ;;  %2984 = vadd.xlane.f32.xlu0 %v2983_v8  ;;  %v763_v54 = vrot.slane %v722_v20, %v5019_v9  ;;  %v2733_v52 = vmul.f32 %v3998_v45, %v5120_v44  ;;  %v2337_v20 = vsel %vm75_vm0, %v2315_v43, 0.0 }
  0xf1   :  { %v719_v13 = vpop.xlane.xlu0 %718  ;;  %v768_v28 = vsel %vm150_vm5, %v755_v5, %v767_v0  ;;  %v2500_v5 = vsel %vm75_vm0, %v2480_v41, 0.0 }
  0xf2   :  { %v759_v22 = vrot.slane %v719_v13, %v5019_v9  ;;  %1219 = vadd.xlane.f32.xlu1 %v1218_v16  ;;  %v2602_v16 = vmul.f32 %v3975_v47, %v4879_v24  ;;  %v4013_v13 = vld [vmem:[%s6510_s0 + $0x79] ss:$0 sm:$0xff]  ;;  %v5204_v47 = vld [vmem:[%s6510_s0 + $0x88] sm:$0x7f] }
  0xf3   :  { %v827_v10 = vpop.xlane.xlu1 %826 }
  0xf4   :  { %v769_v7 = vsel %vm152_vm6, %v759_v22, %v768_v28  ;;  %1099 = vadd.xlane.f32.xlu0 %v1098_v56  ;;  %v862_v21 = vrot.slane %v827_v10, %v5078_v12  ;;  %v2749_v22 = vsel %vm75_vm0, %v2733_v52, 0.0  ;;  %v2855_v10 = vmul.f32 %v4013_v13, %v5012_v61 }
  0xf5   :  { %v770_v9 = vsel %vm154_vm7, %v763_v54, %v769_v7  ;;  %v824_v14 = vpop.xlane.xlu0 %823  ;;  %v2620_v7 = vsel %vm75_vm0, %v2602_v16, 0.0  ;;  %v2348_v52 = vadd.s32 4294967170, %v4677_v59 }
  0xf6   :  { %773 = vst.msk [vmem:[#allocation2] sm:$0xff] %vm772_vm13, %v770_v9  ;;  %v858_v1 = vrot.slane %v824_v14, %v5078_v12  ;;  %1459 = vadd.xlane.f32.xlu1 %v1458_v11  ;;  %v4043_v11 = vld [vmem:[%s6510_s0 + $0x3b] ss:$0 sm:$0xff]  ;;  %vm3588_vm13 = vcmask 1043456  }
  0xf7   :  { %v833_v25 = vpop.xlane.xlu1 %832  ;;  %v3099_v18 = vmul.f32 %v4043_v11, %v4806_v55 }
  0xf8   :  { %1339 = vadd.xlane.f32.xlu0 %v1338_v2  ;;  %v887_v35 = vsel %vm142_vm1, %v862_v21, %v858_v1  ;;  %v870_v39 = vrot.slane %v833_v25, %v5078_v12  ;;  %v2869_v21 = vsel %vm75_vm0, %v2855_v10, 0.0  ;;  %v3098_v1 = vmul.f32 %v4042_v6, %v4815_v3  ;;  %v3808_v25 = vld [vmem:[%s6510_s0 + $0xcb] ss:$0 sm:$0xff]  ;;  %v3891_v10 = vld [vmem:[%s6510_s0 + $0x31] ss:$0 sm:$0xff] }
  0xf9   :  { %v830_v27 = vpop.xlane.xlu0 %829 }
  0xfa   :  { %v866_v33 = vrot.slane %v830_v27, %v5078_v12  ;;  %1699 = vadd.xlane.f32.xlu1 %v1698_v26 }
  0xfb   :  { %v839_v40 = vpop.xlane.xlu1 %838 }
  0xfc   :  { %v888_v38 = vsel %vm144_vm2, %v866_v33, %v887_v35  ;;  %1579 = vadd.xlane.f32.xlu0 %v1578_v29  ;;  %v878_v8 = vrot.slane %v839_v40, %v5078_v12  ;;  %v3109_v33 = vsel %vm75_vm0, %v3099_v18, 0.0  ;;  %v1321_v35 = vmul.f32 %v5181_v36, %v3808_v25 }
  0xfd   :  { %v836_v42 = vpop.xlane.xlu0 %835  ;;  %v889_v48 = vsel %vm146_vm3, %v870_v39, %v888_v38  ;;  %v3838_v39 = vld [vmem:[%s6510_s0 + $0x8d] ss:$0 sm:$0xff]  ;;  %v3106_v40 = vsel %vm75_vm0, %v3098_v1, 0.0 }
  0xfe   :  { %v874_v46 = vrot.slane %v836_v42, %v5078_v12  ;;  %1828 = vadd.xlane.f32.xlu1 %v1827_v58  ;;  %v5191_v58 = vld [vmem:[%s6510_s0 + $0xe8] sm:$0x7f]  ;;  %v1109_v42 = vadd.s32 4294967240, %v4677_v59 }
  0xff   :  { %v845_v51 = vpop.xlane.xlu1 %844  ;;  %v1199_v41 = vmul.f32 %v5191_v58, %v3793_v62 }
 0x100   :  { %v890_v50 = vsel %vm148_vm4, %v874_v46, %v889_v48  ;;  %1825 = vadd.xlane.f32.xlu0 %v1824_v30  ;;  %v886_v23 = vrot.slane %v845_v51, %v5078_v12  ;;  %v3823_v30 = vld [vmem:[%s6510_s0 + $0xac] ss:$0 sm:$0xff]  ;;  %v5219_v16 = vsub.s32 %v1109_v42, %v4679_v60  ;;  %v1232_v42 = vadd.s32 4294967233, %v4677_v59 }
 0x101   :  { %v842_v0 = vpop.xlane.xlu0 %841  ;;  %v891_v56 = vsel %vm150_vm5, %v878_v8, %v890_v50  ;;  %v1565_v8 = vmul.f32 %v5204_v47, %v3838_v39  ;;  %v1341_v50 = vsel %vm75_vm0, %v1321_v35, 0.0  ;;  %v5212_v51 = vld [vmem:[%s6510_s0 + $0xa8] sm:$0x7f]  ;;  %v3976_v39 = vld [vmem:[%s6510_s0 + $0xd6] ss:$0 sm:$0xff] }
 0x102   :  { %v882_v54 = vrot.slane %v842_v0, %v5078_v12  ;;  %2501 = vadd.xlane.f32.xlu1 %v2500_v5  ;;  %v1443_v5 = vmul.f32 %v5212_v51, %v3823_v30 }
 0x103   :  { %v959_v24 = vpop.xlane.xlu1 %958 }
 0x104   :  { %v892_v63 = vsel %vm152_vm6, %v882_v54, %v891_v56  ;;  %2338 = vadd.xlane.f32.xlu0 %v2337_v20  ;;  %v994_v9 = vrot.slane %v959_v24, %v5147_v57  ;;  %v1221_v20 = vsel %vm75_vm0, %v1199_v41, 0.0  ;;  %v3876_v54 = vld [vmem:[%s6510_s0 + $0x50] ss:$0 sm:$0xff]  ;;  %v3853_v56 = vld [vmem:[%s6510_s0 + $0x6e] ss:$0 sm:$0xff]  ;;  %v1581_v24 = vsel %vm75_vm0, %v1565_v8, 0.0 }
 0x105   :  { %v893_v28 = vsel %vm154_vm7, %v886_v23, %v892_v63  ;;  %v956_v12 = vpop.xlane.xlu0 %955  ;;  %v2603_v8 = vmul.f32 %v3976_v39, %v4973_v37  ;;  %v5301_v37 = vld [vmem:[%s6510_s0 + $0xb8] sm:$0x7f] }
 0x106   :  { %896 = vst.msk [vmem:[#allocation2] sm:$0xff] %vm895_vm14, %v893_v28  ;;  %v990_v14 = vrot.slane %v956_v12, %v5147_v57  ;;  %2750 = vadd.xlane.f32.xlu1 %v2749_v22  ;;  %v1461_v28 = vsel %vm75_vm0, %v1443_v5, 0.0  ;;  %v5234_v12 = vsub.s32 %v2348_v52, %v4679_v60  ;;  %v2514_v5 = vadd.s32 4294967291, %v4677_v59  ;;  %v4014_v52 = vld [vmem:[%s6510_s0 + $0x99] ss:$0 sm:$0xff] }
 0x107   :  { %v965_v2 = vpop.xlane.xlu1 %964  ;;  %v4058_v39 = vld [vmem:[%s6510_s0 + $0x1c] ss:$0 sm:$0xff]  ;;  %vm1519_vm14 = vcmask 687720  }
 0x108   :  { %2621 = vadd.xlane.f32.xlu0 %v2620_v7  ;;  %v1019_v27 = vsel %vm142_vm1, %v994_v9, %v990_v14  ;;  %v1002_v29 = vrot.slane %v965_v2, %v5147_v57  ;;  %v5248_v14 = vsub.s32 %v2353_v53, %v4679_v60  ;;  %v4145_v2 = vld [vmem:[%s6510_s0 + $0x68] sm:$0x7f] }
 0x109   :  { %v962_v19 = vpop.xlane.xlu0 %961 }
 0x10a   :  { %v998_v26 = vrot.slane %v962_v19, %v5147_v57  ;;  %2990 = vadd.xlane.f32.xlu1 %v2989_v15  ;;  %v1687_v15 = vmul.f32 %v4145_v2, %v3853_v56  ;;  %v3890_v19 = vld [vmem:[%s6510_s0 + $0x11] ss:$0 sm:$0xff] }
 0x10b   :  { %v971_v32 = vpop.xlane.xlu1 %970 }
 0x10c   :  { %v1020_v31 = vsel %vm144_vm2, %v998_v26, %v1019_v27  ;;  %2870 = vadd.xlane.f32.xlu0 %v2869_v21  ;;  %v1010_v45 = vrot.slane %v971_v32, %v5147_v57  ;;  %v5261_v21 = vld [vmem:[%s6510_s0 + $0x30] sm:$0x7f]  ;;  %v1701_v32 = vsel %vm75_vm0, %v1687_v15, 0.0 }
 0x10d   :  { %v968_v38 = vpop.xlane.xlu0 %967  ;;  %v1021_v46 = vsel %vm146_vm3, %v1002_v29, %v1020_v31  ;;  %v1940_v1 = vmul.f32 %v5261_v21, %v3891_v10  ;;  %v4044_v10 = vld [vmem:[%s6510_s0 + $0x5b] ss:$0 sm:$0xff] }
 0x10e   :  { %v1006_v43 = vrot.slane %v968_v38, %v5147_v57  ;;  %3110 = vadd.xlane.f32.xlu1 %v3109_v33  ;;  %v5272_v33 = vld [vmem:[%s6510_s0 + $0x10] sm:$0x7f] }
 0x10f   :  { %v977_v49 = vpop.xlane.xlu1 %976  ;;  %v1939_v35 = vmul.f32 %v5272_v33, %v3890_v19  ;;  %v3961_v38 = vld [vmem:[%s6510_s0 + $0xf5] ss:$0 sm:$0xff]  ;;  %v1950_v30 = vsel %vm75_vm0, %v1940_v1, 0.0 }
 0x110   :  { %v1022_v48 = vsel %vm148_vm4, %v1006_v43, %v1021_v46  ;;  %3107 = vadd.xlane.f32.xlu0 %v3106_v40  ;;  %v1018_v23 = vrot.slane %v977_v49, %v5147_v57 }
 0x111   :  { %v974_v0 = vpop.xlane.xlu0 %973  ;;  %v1023_v63 = vsel %vm150_vm5, %v1010_v45, %v1022_v48  ;;  %v2481_v48 = vmul.f32 %v3961_v38, %v5105_v34 }
 0x112   :  { %v1014_v13 = vrot.slane %v974_v0, %v5147_v57  ;;  %1342 = vadd.xlane.f32.xlu1 %v1341_v50  ;;  %v5239_v57 = vld [vmem:[%s6510_s0 + $0x50] sm:$0x7f]  ;;  %v1947_v50 = vsel %vm75_vm0, %v1939_v35, 0.0 }
 0x113   :  { %v1082_v4 = vpop.xlane.xlu1 %1081  ;;  %v1818_v7 = vmul.f32 %v5239_v57, %v3876_v54  ;;  %v2503_v56 = vsel %vm75_vm0, %v2481_v48, 0.0  ;;  %v3824_v48 = vld [vmem:[%s6510_s0 + $0xcc] ss:$0 sm:$0xff] }
 0x114   :  { %v1024_v22 = vsel %vm152_vm6, %v1014_v13, %v1023_v63  ;;  %1222 = vadd.xlane.f32.xlu0 %v1221_v20  ;;  %v1117_v6 = vrot.slane %v1082_v4, %v5219_v16  ;;  %v3999_v20 = vld [vmem:[%s6510_s0 + $0xb8] ss:$0 sm:$0xff]  ;;  %v2623_v13 = vsel %vm75_vm0, %v2603_v8, 0.0  ;;  %v2856_v63 = vmul.f32 %v4014_v52, %v5120_v44 }
 0x115   :  { %v1025_v11 = vsel %vm154_vm7, %v1018_v23, %v1024_v22  ;;  %v1079_v9 = vpop.xlane.xlu0 %1078  ;;  %v1830_v62 = vsel %vm75_vm0, %v1818_v7, 0.0  ;;  %v5295_v23 = vsub.s32 %v1232_v42, %v4679_v60  ;;  %v2734_v7 = vmul.f32 %v3999_v20, %v5301_v37  ;;  %v3854_v20 = vld [vmem:[%s6510_s0 + $0x8e] ss:$0 sm:$0xff] }
 0x116   :  { %v1113_v18 = vrot.slane %v1079_v9, %v5219_v16  ;;  %1028 = vst.msk [vmem:[#allocation2] sm:$0xff] %vm1027_vm15, %v1025_v11  ;;  %1582 = vadd.xlane.f32.xlu1 %v1581_v24  ;;  %v4029_v9 = vld [vmem:[%s6510_s0 + $0x7a] ss:$0 sm:$0xff]  ;;  %v2872_v1 = vsel %vm75_vm0, %v2856_v63, 0.0  ;;  %v3221_v8 = vmul.f32 %v4058_v39, %v4815_v3  ;;  %v1444_v3 = vmul.f32 %v5181_v36, %v3824_v48 }
 0x117   :  { %v2321_v26 = vpop.xlane.xlu1 %2320  ;;  %vm2810_vm15 = vcmask 212120  }
 0x118   :  { %v1142_v25 = vsel %vm142_vm1, %v1117_v6, %v1113_v18  ;;  %1462 = vadd.xlane.f32.xlu0 %v1461_v28  ;;  %v2361_v27 = vrot.slane %v2321_v26, %v5234_v12  ;;  %v2365_v29 = vrot.slane %v2321_v26, %v5248_v14  ;;  %v5313_v28 = vsub.s32 %v2514_v5, %v4679_v60 }
 0x119   :  { %v2318_v31 = vpop.xlane.xlu0 %2317 }
 0x11a   :  { %v2352_v40 = vrot.slane %v2318_v31, %v5234_v12  ;;  %v2357_v41 = vrot.slane %v2318_v31, %v5248_v14  ;;  %1831 = vadd.xlane.f32.xlu1 %v1830_v62  ;;  %v1355_v31 = vadd.s32 4294967226, %v4677_v59 }
 0x11b   :  { %v1202_v46 = vpop.xlane.xlu1 %1201 }
 0x11c   :  { %v2414_v43 = vsel %vm142_vm1, %v2361_v27, %v2352_v40  ;;  %v2421_v45 = vsel %vm142_vm1, %v2365_v29, %v2357_v41  ;;  %1702 = vadd.xlane.f32.xlu0 %v1701_v32  ;;  %v1236_v11 = vrot.slane %v1202_v46, %v5295_v23  ;;  %v2752_v27 = vsel %vm75_vm0, %v2734_v7, 0.0  ;;  %v4059_v32 = vld [vmem:[%s6510_s0 + $0x3c] ss:$0 sm:$0xff] }
 0x11d   :  { %v1085_v49 = vpop.xlane.xlu0 %1084  ;;  %v2978_v29 = vmul.f32 %v4029_v9, %v5012_v61  ;;  %v3222_v42 = vmul.f32 %v4059_v32, %v4806_v55  ;;  %v5350_v46 = vsub.s32 %v1355_v31, %v4679_v60  ;;  %v3809_v55 = vld [vmem:[%s6510_s0 + $0xeb] ss:$0 sm:$0xff] }
 0x11e   :  { %v1121_v0 = vrot.slane %v1085_v49, %v5219_v16  ;;  %1951 = vadd.xlane.f32.xlu1 %v1950_v30  ;;  %v1322_v63 = vmul.f32 %v5191_v58, %v3809_v55 }
 0x11f   :  { %v2324_v54 = vpop.xlane.xlu1 %2323 }
 0x120   :  { %v1143_v53 = vsel %vm144_vm2, %v1121_v0, %v1142_v25  ;;  %1948 = vadd.xlane.f32.xlu0 %v1947_v50  ;;  %v2369_v24 = vrot.slane %v2324_v54, %v5234_v12  ;;  %v2373_v22 = vrot.slane %v2324_v54, %v5248_v14  ;;  %v3100_v25 = vmul.f32 %v4044_v10, %v4897_v17 }
 0x121   :  { %v1205_v4 = vpop.xlane.xlu0 %1204  ;;  %v3232_v0 = vsel %vm75_vm0, %v3222_v42, 0.0 }
 0x122   :  { %v1240_v6 = vrot.slane %v1205_v4, %v5295_v23  ;;  %v5325_v2 = vsel %vm144_vm2, %v2369_v24, %v2414_v43  ;;  %v5328_v15 = vsel %vm144_vm2, %v2373_v22, %v2421_v45  ;;  %2624 = vadd.xlane.f32.xlu1 %v2623_v13  ;;  %v3112_v41 = vsel %vm75_vm0, %v3100_v25, 0.0  ;;  %v3839_v22 = vld [vmem:[%s6510_s0 + $0xad] ss:$0 sm:$0xff]  ;;  %v3877_v25 = vld [vmem:[%s6510_s0 + $0x70] ss:$0 sm:$0xff] }
 0x123   :  { %v2487_v19 = vpop.xlane.xlu1 %2486  ;;  %v2992_v45 = vsel %vm75_vm0, %v2978_v29, 0.0  ;;  %v2637_v24 = vadd.s32 4294967284, %v4677_v59  ;;  %v1688_v4 = vmul.f32 %v5204_v47, %v3854_v20  ;;  %v3892_v47 = vld [vmem:[%s6510_s0 + $0x51] ss:$0 sm:$0xff]  ;;  %v5425_v20 = vld [vmem:[%s6510_s0 + $0xd8] sm:$0x7f] }
 0x124   :  { %v1265_v18 = vsel %vm142_vm1, %v1240_v6, %v1236_v11  ;;  %2504 = vadd.xlane.f32.xlu0 %v2503_v56  ;;  %v2522_v26 = vrot.slane %v2487_v19, %v5313_v28  ;;  %v3229_v56 = vsel %vm75_vm0, %v3221_v8, 0.0  ;;  %v1464_v11 = vsel %vm75_vm0, %v1444_v3, 0.0 }
 0x125   :  { %v2484_v62 = vpop.xlane.xlu0 %2483  ;;  %v5381_v19 = vsub.s32 %v2637_v24, %v4679_v60  ;;  %v1704_v29 = vsel %vm75_vm0, %v1688_v4, 0.0  ;;  %v1941_v39 = vmul.f32 %v5239_v57, %v3892_v47 }
 0x126   :  { %v2518_v35 = vrot.slane %v2484_v62, %v5313_v28  ;;  %2873 = vadd.xlane.f32.xlu1 %v2872_v1  ;;  %v1566_v1 = vmul.f32 %v5212_v51, %v3839_v22 }
 0x127   :  { %v1208_v40 = vpop.xlane.xlu1 %1207  ;;  %v1953_v48 = vsel %vm75_vm0, %v1941_v39, 0.0 }
 0x128   :  { %v2547_v38 = vsel %vm142_vm1, %v2522_v26, %v2518_v35  ;;  %2753 = vadd.xlane.f32.xlu0 %v2752_v27  ;;  %v1244_v30 = vrot.slane %v1208_v40, %v5295_v23  ;;  %v5404_v40 = vld [vmem:[%s6510_s0 + $0x70] sm:$0x7f] }
 0x129   :  { %v1088_v43 = vpop.xlane.xlu0 %1087 }
 0x12a   :  { %v1125_v49 = vrot.slane %v1088_v43, %v5219_v16  ;;  %v1266_v50 = vsel %vm144_vm2, %v1244_v30, %v1265_v18  ;;  %3113 = vadd.xlane.f32.xlu1 %v3112_v41  ;;  %v1344_v18 = vsel %vm75_vm0, %v1322_v63, 0.0  ;;  %v1584_v30 = vsel %vm75_vm0, %v1566_v1, 0.0  ;;  %v3906_v43 = vld [vmem:[%s6510_s0 + $0x12] ss:$0 sm:$0xff]  ;;  %v4015_v1 = vld [vmem:[%s6510_s0 + $0xb9] ss:$0 sm:$0xff] }
 0x12b   :  { %v1328_v52 = vpop.xlane.xlu1 %1327  ;;  %v2062_v3 = vmul.f32 %v5272_v33, %v3906_v43  ;;  %v1478_v63 = vadd.s32 4294967219, %v4677_v59 }
 0x12c   :  { %v1144_v5 = vsel %vm146_vm3, %v1125_v49, %v1143_v53  ;;  %2993 = vadd.xlane.f32.xlu0 %v2992_v45  ;;  %v1363_v54 = vrot.slane %v1328_v52, %v5350_v46 }
 0x12d   :  { %v1325_v13 = vpop.xlane.xlu0 %1324 }
 0x12e   :  { %v1359_v53 = vrot.slane %v1325_v13, %v5350_v46  ;;  %3233 = vadd.xlane.f32.xlu1 %v3232_v0  ;;  %v3977_v13 = vld [vmem:[%s6510_s0 + $0xf6] ss:$0 sm:$0xff] }
 0x12f   :  { %v2490_v10 = vpop.xlane.xlu1 %2489 }
 0x130   :  { %v1388_v7 = vsel %vm142_vm1, %v1363_v54, %v1359_v53  ;;  %3230 = vadd.xlane.f32.xlu0 %v3229_v56  ;;  %v2526_v6 = vrot.slane %v2490_v10, %v5313_v28  ;;  %v4000_v54 = vld [vmem:[%s6510_s0 + $0xd8] ss:$0 sm:$0xff] }
 0x131   :  { %v2327_v9 = vpop.xlane.xlu0 %2326  ;;  %v2735_v10 = vmul.f32 %v4000_v54, %v5425_v20  ;;  %v4075_v54 = vld [vmem:[%s6510_s0 + $0x3d] ss:$0 sm:$0xff] }
 0x132   :  { %v2377_v26 = vrot.slane %v2327_v9, %v5234_v12  ;;  %v2381_v62 = vrot.slane %v2327_v9, %v5248_v14  ;;  %v5393_v27 = vsel %vm144_vm2, %v2526_v6, %v2547_v38  ;;  %1465 = vadd.xlane.f32.xlu1 %v1464_v11  ;;  %v1819_v38 = vmul.f32 %v5404_v40, %v3877_v25 }
 0x133   :  { %v2610_v35 = vpop.xlane.xlu1 %2609  ;;  %v2604_v11 = vmul.f32 %v3977_v13, %v5105_v34  ;;  %v2070_v9 = vsel %vm75_vm0, %v2062_v3, 0.0  ;;  %v2755_v25 = vsel %vm75_vm0, %v2735_v10, 0.0  ;;  %v5506_v10 = vld [vmem:[%s6510_s0 + $0x38] sm:$0x7f] }
 0x134   :  { %v2416_v31 = vsel %vm146_vm3, %v2377_v26, %v5325_v2  ;;  %v2423_v32 = vsel %vm146_vm3, %v2381_v62, %v5328_v15  ;;  %1345 = vadd.xlane.f32.xlu0 %v1344_v18  ;;  %v2645_v41 = vrot.slane %v2610_v35, %v5381_v19  ;;  %v3907_v2 = vld [vmem:[%s6510_s0 + $0x32] ss:$0 sm:$0xff]  ;;  %v1833_v49 = vsel %vm75_vm0, %v1819_v38, 0.0 }
 0x135   :  { %v2607_v42 = vpop.xlane.xlu0 %2606  ;;  %v2063_v55 = vmul.f32 %v5261_v21, %v3907_v2  ;;  %v5449_v18 = vsub.s32 %v1478_v63, %v4679_v60  ;;  %v2626_v26 = vsel %vm75_vm0, %v2604_v11, 0.0  ;;  %v2857_v38 = vmul.f32 %v4015_v1, %v5301_v37  ;;  %v4045_v2 = vld [vmem:[%s6510_s0 + $0x7b] ss:$0 sm:$0xff] }
 0x136   :  { %v2641_v15 = vrot.slane %v2607_v42, %v5381_v19  ;;  %1705 = vadd.xlane.f32.xlu1 %v1704_v29  ;;  %v3345_v11 = vmul.f32 %v5506_v10, %v4075_v54 }
 0x137   :  { %v1211_v8 = vpop.xlane.xlu1 %1210  ;;  %v2073_v4 = vsel %vm75_vm0, %v2063_v55, 0.0  ;;  %v2875_v3 = vsel %vm75_vm0, %v2857_v38, 0.0 }
 0x138   :  { %v2670_v45 = vsel %vm142_vm1, %v2645_v41, %v2641_v15  ;;  %1585 = vadd.xlane.f32.xlu0 %v1584_v30  ;;  %v1248_v52 = vrot.slane %v1211_v8, %v5295_v23  ;;  %v2769_v41 = vadd.s32 4294967277, %v4677_v59 }
 0x139   :  { %v1091_v0 = vpop.xlane.xlu0 %1090 }
 0x13a   :  { %v1129_v56 = vrot.slane %v1091_v0, %v5219_v16  ;;  %v5436_v24 = vsel %vm146_vm3, %v1248_v52, %v1266_v50  ;;  %1954 = vadd.xlane.f32.xlu1 %v1953_v48  ;;  %v4030_v50 = vld [vmem:[%s6510_s0 + $0x9a] ss:$0 sm:$0xff] }
 0x13b   :  { %v1448_v22 = vpop.xlane.xlu1 %1447  ;;  %v2979_v62 = vmul.f32 %v4030_v50, %v5120_v44 }
 0x13c   :  { %v5439_v53 = vsel %vm148_vm4, %v1129_v56, %v1144_v5  ;;  %1834 = vadd.xlane.f32.xlu0 %v1833_v49  ;;  %v1482_v42 = vrot.slane %v1448_v22, %v5449_v18 }
 0x13d   :  { %v1331_v6 = vpop.xlane.xlu0 %1330  ;;  %v2995_v49 = vsel %vm75_vm0, %v2979_v62, 0.0  ;;  %v3355_v62 = vsel %vm75_vm0, %v3345_v11, 0.0 }
 0x13e   :  { %v1367_v5 = vrot.slane %v1331_v6, %v5350_v46  ;;  %2074 = vadd.xlane.f32.xlu1 %v2073_v4 }
 0x13f   :  { %v2330_v34 = vpop.xlane.xlu1 %2329 }
 0x140   :  { %v5456_v47 = vsel %vm144_vm2, %v1367_v5, %v1388_v7  ;;  %2071 = vadd.xlane.f32.xlu0 %v2070_v9  ;;  %v2385_v29 = vrot.slane %v2330_v34, %v5234_v12  ;;  %v2389_v35 = vrot.slane %v2330_v34, %v5248_v14  ;;  %v4060_v7 = vld [vmem:[%s6510_s0 + $0x5c] ss:$0 sm:$0xff]  ;;  %v3840_v5 = vld [vmem:[%s6510_s0 + $0xcd] ss:$0 sm:$0xff]  ;;  %v3825_v34 = vld [vmem:[%s6510_s0 + $0xec] ss:$0 sm:$0xff] }
 0x141   :  { %v1451_v39 = vpop.xlane.xlu0 %1450  ;;  %v3223_v55 = vmul.f32 %v4060_v7, %v4897_v17  ;;  %v4074_v17 = vld [vmem:[%s6510_s0 + $0x1d] ss:$0 sm:$0xff]  ;;  %v1601_v7 = vadd.s32 4294967212, %v4677_v59 }
 0x142   :  { %v1486_v30 = vrot.slane %v1451_v39, %v5449_v18  ;;  %v5474_v15 = vsel %vm148_vm4, %v2385_v29, %v2416_v31  ;;  %v5477_v43 = vsel %vm148_vm4, %v2389_v35, %v2423_v32  ;;  %2756 = vadd.xlane.f32.xlu1 %v2755_v25  ;;  %v5485_v31 = vsub.s32 %v2769_v41, %v4679_v60 }
 0x143   :  { %v2613_v48 = vpop.xlane.xlu1 %2612  ;;  %v3101_v32 = vmul.f32 %v4045_v2, %v5012_v61  ;;  %v3235_v4 = vsel %vm75_vm0, %v3223_v55, 0.0  ;;  %v1567_v29 = vmul.f32 %v5181_v36, %v3840_v5  ;;  %v1445_v41 = vmul.f32 %v5191_v58, %v3825_v34  ;;  %v5549_v55 = vld [vmem:[%s6510_s0 + $0x90] sm:$0x7f] }
 0x144   :  { %v1511_v8 = vsel %vm142_vm1, %v1486_v30, %v1482_v42  ;;  %2627 = vadd.xlane.f32.xlu0 %v2626_v26  ;;  %v2649_v52 = vrot.slane %v2613_v48, %v5381_v19  ;;  %v3878_v42 = vld [vmem:[%s6510_s0 + $0x90] ss:$0 sm:$0xff]  ;;  %v3855_v30 = vld [vmem:[%s6510_s0 + $0xae] ss:$0 sm:$0xff]  ;;  %v3922_v34 = vld [vmem:[%s6510_s0 + $0x13] ss:$0 sm:$0xff] }
 0x145   :  { %v2493_v0 = vpop.xlane.xlu0 %2492  ;;  %v3115_v9 = vsel %vm75_vm0, %v3101_v32, 0.0  ;;  %v1467_v32 = vsel %vm75_vm0, %v1445_v41, 0.0  ;;  %v1689_v54 = vmul.f32 %v5212_v51, %v3855_v30  ;;  %v2892_v30 = vadd.s32 4294967270, %v4677_v59 }
 0x146   :  { %v2530_v13 = vrot.slane %v2493_v0, %v5313_v28  ;;  %v5496_v56 = vsel %vm144_vm2, %v2649_v52, %v2670_v45  ;;  %2996 = vadd.xlane.f32.xlu1 %v2995_v49  ;;  %v1587_v49 = vsel %vm75_vm0, %v1567_v29, 0.0  ;;  %v1820_v52 = vmul.f32 %v5549_v55, %v3878_v42 }
 0x147   :  { %v2742_v22 = vpop.xlane.xlu1 %2741  ;;  %v1707_v5 = vsel %vm75_vm0, %v1689_v54, 0.0  ;;  %v2185_v42 = vmul.f32 %v5272_v33, %v3922_v34 }
 0x148   :  { %v5500_v63 = vsel %vm146_vm3, %v2530_v13, %v5393_v27  ;;  %2876 = vadd.xlane.f32.xlu0 %v2875_v3  ;;  %v2777_v6 = vrot.slane %v2742_v22, %v5485_v31  ;;  %v5514_v27 = vld [vmem:[%s6510_s0 + $0x18] sm:$0x7f]  ;;  %v3908_v13 = vld [vmem:[%s6510_s0 + $0x52] ss:$0 sm:$0xff]  ;;  %v3893_v22 = vld [vmem:[%s6510_s0 + $0x71] ss:$0 sm:$0xff] }
 0x149   :  { %v2739_v45 = vpop.xlane.xlu0 %2738  ;;  %v3344_v50 = vmul.f32 %v5514_v27, %v4074_v17 }
 0x14a   :  { %v2773_v1 = vrot.slane %v2739_v45, %v5485_v31  ;;  %3236 = vadd.xlane.f32.xlu1 %v3235_v4  ;;  %v2064_v45 = vmul.f32 %v5239_v57, %v3908_v13 }
 0x14b   :  { %v1214_v26 = vpop.xlane.xlu1 %1213  ;;  %v3352_v38 = vsel %vm75_vm0, %v3344_v50, 0.0 }
 0x14c   :  { %v5525_v25 = vsel %vm142_vm1, %v2777_v6, %v2773_v1  ;;  %3116 = vadd.xlane.f32.xlu0 %v3115_v9  ;;  %v1252_v35 = vrot.slane %v1214_v26, %v5295_v23  ;;  %v1836_v6 = vsel %vm75_vm0, %v1820_v52, 0.0  ;;  %v1942_v1 = vmul.f32 %v5404_v40, %v3893_v22  ;;  %v4001_v52 = vld [vmem:[%s6510_s0 + $0xf8] ss:$0 sm:$0xff] }
 0x14d   :  { %v5530_v39 = vpop.xlane.xlu0 %1093  ;;  %v2076_v29 = vsel %vm75_vm0, %v2064_v45, 0.0  ;;  %v2193_v22 = vsel %vm75_vm0, %v2185_v42, 0.0  ;;  %v4031_v45 = vld [vmem:[%s6510_s0 + $0xba] ss:$0 sm:$0xff] }
 0x14e   :  { %v5543_v2 = vsel %vm148_vm4, %v1252_v35, %v5436_v24  ;;  %3356 = vadd.xlane.f32.xlu1 %v3355_v62  ;;  %v5555_v24 = vsub.s32 %v1601_v7, %v4679_v60  ;;  %v1956_v7 = vsel %vm75_vm0, %v1942_v1, 0.0 }
 0x14f   :  { %v1454_v48 = vpop.xlane.xlu1 %1453 }
 0x150   :  { %3353 = vadd.xlane.f32.xlu0 %v3352_v38  ;;  %v1490_v0 = vrot.slane %v1454_v48, %v5449_v18  ;;  %v4016_v48 = vld [vmem:[%s6510_s0 + $0xd9] ss:$0 sm:$0xff] }
 0x151   :  { %v1334_v3 = vpop.xlane.xlu0 %1333  ;;  %v2858_v54 = vmul.f32 %v4016_v48, %v5425_v20 }
 0x152   :  { %v1371_v17 = vrot.slane %v1334_v3, %v5350_v46  ;;  %v5566_v4 = vsel %vm144_vm2, %v1490_v0, %v1511_v8  ;;  %1588 = vadd.xlane.f32.xlu1 %v1587_v49  ;;  %v3923_v8 = vld [vmem:[%s6510_s0 + $0x33] ss:$0 sm:$0xff] }
 0x153   :  { %v1574_v51 = vpop.xlane.xlu1 %1573  ;;  %v2186_v35 = vmul.f32 %v5261_v21, %v3923_v8  ;;  %v5603_v21 = vld [vmem:[%s6510_s0 + $0xf8] sm:$0x7f]  ;;  %v2878_v1 = vsel %vm75_vm0, %v2858_v54, 0.0 }
 0x154   :  { %v5570_v11 = vsel %vm146_vm3, %v1371_v17, %v5456_v47  ;;  %1468 = vadd.xlane.f32.xlu0 %v1467_v32  ;;  %v1609_v9 = vrot.slane %v1574_v51, %v5555_v24  ;;  %v5621_v51 = vsub.s32 %v2892_v30, %v4679_v60  ;;  %v5660_v30 = vld [vmem:[%s6510_s0 + $0x58] sm:$0x7f] }
 0x155   :  { %v1571_v50 = vpop.xlane.xlu0 %1570  ;;  %v2196_v32 = vsel %vm75_vm0, %v2186_v35, 0.0  ;;  %v4061_v35 = vld [vmem:[%s6510_s0 + $0x7c] ss:$0 sm:$0xff]  ;;  %v4090_v54 = vld [vmem:[%s6510_s0 + $0x1e] ss:$0 sm:$0xff] }
 0x156   :  { %v1605_v47 = vrot.slane %v1571_v50, %v5555_v24  ;;  %1837 = vadd.xlane.f32.xlu1 %v1836_v6 }
 0x157   :  { %v2496_v62 = vpop.xlane.xlu1 %2495 }
 0x158   :  { %v5585_v26 = vsel %vm142_vm1, %v1609_v9, %v1605_v47  ;;  %1708 = vadd.xlane.f32.xlu0 %v1707_v5  ;;  %v2534_v38 = vrot.slane %v2496_v62, %v5313_v28 }
 0x159   :  { %v5590_v41 = vpop.xlane.xlu0 %2332 }
 0x15a   :  { %v2393_v49 = vrot.slane %v5590_v41, %v5234_v12  ;;  %v5610_v33 = vsel %vm148_vm4, %v2534_v38, %v5500_v63  ;;  %2077 = vadd.xlane.f32.xlu1 %v2076_v29  ;;  %v2736_v63 = vmul.f32 %v4001_v52, %v5603_v21  ;;  %v2980_v29 = vmul.f32 %v4031_v45, %v5301_v37  ;;  %v3856_v45 = vld [vmem:[%s6510_s0 + $0xce] ss:$0 sm:$0xff] }
 0x15b   :  { %v2745_v3 = vpop.xlane.xlu1 %2744 }
 0x15c   :  { %v5614_v0 = vsel %vm150_vm5, %v2393_v49, %v5474_v15  ;;  %1957 = vadd.xlane.f32.xlu0 %v1956_v7  ;;  %v2781_v13 = vrot.slane %v2745_v3, %v5485_v31  ;;  %v4046_v15 = vld [vmem:[%s6510_s0 + $0x9b] ss:$0 sm:$0xff]  ;;  %v2758_v62 = vsel %vm75_vm0, %v2736_v63, 0.0  ;;  %v2998_v52 = vsel %vm75_vm0, %v2980_v29, 0.0 }
 0x15d   :  { %v2616_v17 = vpop.xlane.xlu0 %2615  ;;  %v3102_v8 = vmul.f32 %v4046_v15, %v5120_v44  ;;  %v3224_v3 = vmul.f32 %v4061_v35, %v5012_v61 }
 0x15e   :  { %v2653_v6 = vrot.slane %v2616_v17, %v5381_v19  ;;  %v5633_v9 = vsel %vm144_vm2, %v2781_v13, %v5525_v25  ;;  %2197 = vadd.xlane.f32.xlu1 %v2196_v32  ;;  %v4076_v25 = vld [vmem:[%s6510_s0 + $0x5d] ss:$0 sm:$0xff]  ;;  %v4091_v32 = vld [vmem:[%s6510_s0 + $0x3e] ss:$0 sm:$0xff] }
 0x15f   :  { %v2865_v5 = vpop.xlane.xlu1 %2864  ;;  %v3118_v42 = vsel %vm75_vm0, %v3102_v8, 0.0  ;;  %v3346_v48 = vmul.f32 %v5660_v30, %v4076_v25  ;;  %v3238_v61 = vsel %vm75_vm0, %v3224_v3, 0.0  ;;  %v3841_v8 = vld [vmem:[%s6510_s0 + $0xed] ss:$0 sm:$0xff] }
 0x160   :  { %v5637_v50 = vsel %vm146_vm3, %v2653_v6, %v5496_v56  ;;  %2194 = vadd.xlane.f32.xlu0 %v2193_v22  ;;  %v2900_v47 = vrot.slane %v2865_v5, %v5621_v51  ;;  %v3468_v22 = vmul.f32 %v5506_v10, %v4091_v32  ;;  %v3467_v6 = vmul.f32 %v5514_v27, %v4090_v54 }
 0x161   :  { %v2862_v34 = vpop.xlane.xlu0 %2861  ;;  %v3358_v17 = vsel %vm75_vm0, %v3346_v48, 0.0 }
 0x162   :  { %v2896_v56 = vrot.slane %v2862_v34, %v5621_v51  ;;  %2879 = vadd.xlane.f32.xlu1 %v2878_v1  ;;  %v1724_v1 = vadd.s32 4294967205, %v4677_v59  ;;  %v3478_v34 = vsel %vm75_vm0, %v3468_v22, 0.0  ;;  %v3475_v25 = vsel %vm75_vm0, %v3467_v6, 0.0  ;;  %v3924_v22 = vld [vmem:[%s6510_s0 + $0x53] ss:$0 sm:$0xff] }
 0x163   :  { %v5654_v7 = vpop.xlane.xlu1 %1216 }
 0x164   :  { %v5652_v38 = vsel %vm142_vm1, %v2900_v47, %v2896_v56  ;;  %2759 = vadd.xlane.f32.xlu0 %v2758_v62  ;;  %v1690_v62 = vmul.f32 %v5181_v36, %v3856_v45  ;;  %v1568_v56 = vmul.f32 %v5191_v58, %v3841_v8  ;;  %v5702_v35 = vsub.s32 %v1724_v1, %v4679_v60 }
 0x165   :  { %v5663_v49 = vpop.xlane.xlu0 %1096  ;;  %v2187_v8 = vmul.f32 %v5239_v57, %v3924_v22  ;;  %v4047_v22 = vld [vmem:[%s6510_s0 + $0xbb] ss:$0 sm:$0xff] }
 0x166   :  { %3119 = vadd.xlane.f32.xlu1 %v3118_v42  ;;  %v3879_v42 = vld [vmem:[%s6510_s0 + $0xb0] ss:$0 sm:$0xff] }
 0x167   :  { %v1457_v13 = vpop.xlane.xlu1 %1456 }
 0x168   :  { %2999 = vadd.xlane.f32.xlu0 %v2998_v52  ;;  %v1494_v63 = vrot.slane %v1457_v13, %v5449_v18  ;;  %v1710_v52 = vsel %vm75_vm0, %v1690_v62, 0.0  ;;  %v1590_v13 = vsel %vm75_vm0, %v1568_v56, 0.0  ;;  %v4017_v56 = vld [vmem:[%s6510_s0 + $0xf9] ss:$0 sm:$0xff] }
 0x169   :  { %v1337_v15 = vpop.xlane.xlu0 %1336 }
 0x16a   :  { %v1375_v5 = vrot.slane %v1337_v15, %v5350_v46  ;;  %v5688_v10 = vsel %vm146_vm3, %v1494_v63, %v5566_v4  ;;  %3359 = vadd.xlane.f32.xlu1 %v3358_v17  ;;  %v3894_v4 = vld [vmem:[%s6510_s0 + $0x91] ss:$0 sm:$0xff] }
 0x16b   :  { %v1694_v47 = vpop.xlane.xlu1 %1693  ;;  %v1943_v3 = vmul.f32 %v5549_v55, %v3894_v4  ;;  %v5722_v17 = vld [vmem:[%s6510_s0 + $0xb0] sm:$0x7f] }
 0x16c   :  { %v5692_v27 = vsel %vm148_vm4, %v1375_v5, %v5570_v11  ;;  %3239 = vadd.xlane.f32.xlu0 %v3238_v61  ;;  %v1728_v63 = vrot.slane %v1694_v47, %v5702_v35  ;;  %v3909_v61 = vld [vmem:[%s6510_s0 + $0x72] ss:$0 sm:$0xff] }
 0x16d   :  { %v1577_v29 = vpop.xlane.xlu0 %1576  ;;  %v1959_v1 = vsel %vm75_vm0, %v1943_v3, 0.0 }
 0x16e   :  { %v1613_v11 = vrot.slane %v1577_v29, %v5555_v24  ;;  %3479 = vadd.xlane.f32.xlu1 %v3478_v34  ;;  %v2065_v29 = vmul.f32 %v5404_v40, %v3909_v61 }
 0x16f   :  { %v5712_v48 = vpop.xlane.xlu1 %2335 }
 0x170   :  { %v5710_v36 = vsel %vm144_vm2, %v1613_v11, %v5585_v26  ;;  %3476 = vadd.xlane.f32.xlu0 %v3475_v25  ;;  %v2401_v32 = vrot.slane %v5712_v48, %v5234_v12  ;;  %v1821_v26 = vmul.f32 %v5722_v17, %v3879_v42  ;;  %v4032_v25 = vld [vmem:[%s6510_s0 + $0xda] ss:$0 sm:$0xff]  ;;  %v2199_v11 = vsel %vm75_vm0, %v2187_v8, 0.0 }
 0x171   :  { %v1697_v54 = vpop.xlane.xlu0 %1696  ;;  %v2981_v42 = vmul.f32 %v4032_v25, %v5425_v20  ;;  %v1137_v25 = vrot.slane %v5663_v49, %v5219_v16 }
 0x172   :  { %v1732_v15 = vrot.slane %v1697_v54, %v5702_v35  ;;  %v5735_v6 = vsel %vm152_vm6, %v2401_v32, %v5614_v0  ;;  %1711 = vadd.xlane.f32.xlu1 %v1710_v52  ;;  %v1839_v62 = vsel %vm75_vm0, %v1821_v26, 0.0  ;;  %v3015_v0 = vadd.s32 4294967263, %v4677_v59 }
 0x173   :  { %v2619_v5 = vpop.xlane.xlu1 %2618  ;;  %v2079_v32 = vsel %vm75_vm0, %v2065_v29, 0.0  ;;  %v3103_v29 = vmul.f32 %v4047_v22, %v5301_v37 }
 0x174   :  { %v5738_v45 = vsel %vm142_vm1, %v1732_v15, %v1728_v63  ;;  %1591 = vadd.xlane.f32.xlu0 %v1590_v13  ;;  %v2657_v47 = vrot.slane %v2619_v5, %v5381_v19  ;;  %v5763_v54 = vsub.s32 %v3015_v0, %v4679_v60  ;;  %v2859_v13 = vmul.f32 %v4017_v56, %v5603_v21 }
 0x175   :  { %v5743_v34 = vpop.xlane.xlu0 %2498  ;;  %v3001_v5 = vsel %vm75_vm0, %v2981_v42, 0.0 }
 0x176   :  { %v5756_v57 = vsel %vm148_vm4, %v2657_v47, %v5637_v50  ;;  %1960 = vadd.xlane.f32.xlu1 %v1959_v1  ;;  %v4062_v50 = vld [vmem:[%s6510_s0 + $0x9c] ss:$0 sm:$0xff] }
 0x177   :  { %v2868_v4 = vpop.xlane.xlu1 %2867  ;;  %v3225_v1 = vmul.f32 %v4062_v50, %v5120_v44  ;;  %v4077_v44 = vld [vmem:[%s6510_s0 + $0x7d] ss:$0 sm:$0xff]  ;;  %v3857_v50 = vld [vmem:[%s6510_s0 + $0xee] ss:$0 sm:$0xff] }
 0x178   :  { %1840 = vadd.xlane.f32.xlu0 %v1839_v62  ;;  %v2904_v52 = vrot.slane %v2868_v4, %v5621_v51  ;;  %v2881_v62 = vsel %vm75_vm0, %v2859_v13, 0.0 }
 0x179   :  { %v2748_v3 = vpop.xlane.xlu0 %2747 }
 0x17a   :  { %v2785_v26 = vrot.slane %v2748_v3, %v5485_v31  ;;  %v5775_v63 = vsel %vm144_vm2, %v2904_v52, %v5652_v38  ;;  %2200 = vadd.xlane.f32.xlu1 %v2199_v11  ;;  %v4092_v38 = vld [vmem:[%s6510_s0 + $0x5e] ss:$0 sm:$0xff]  ;;  %v3241_v11 = vsel %vm75_vm0, %v3225_v1, 0.0  ;;  %v3121_v52 = vsel %vm75_vm0, %v3103_v29, 0.0 }
 0x17b   :  { %v2988_v61 = vpop.xlane.xlu1 %2987  ;;  %v5808_v3 = vld [vmem:[%s6510_s0 + $0x78] sm:$0x7f]  ;;  %v1856_v29 = vadd.s32 4294967198, %v4677_v59 }
 0x17c   :  { %v5779_v15 = vsel %vm146_vm3, %v2785_v26, %v5633_v9  ;;  %2080 = vadd.xlane.f32.xlu0 %v2079_v32  ;;  %v3023_v8 = vrot.slane %v2988_v61, %v5763_v54  ;;  %v1133_v9 = vrot.slane %v5530_v39, %v5219_v16  ;;  %v3469_v39 = vmul.f32 %v5660_v30, %v4092_v38  ;;  %v3880_v32 = vld [vmem:[%s6510_s0 + $0xd0] ss:$0 sm:$0xff]  ;;  %v3910_v38 = vld [vmem:[%s6510_s0 + $0x92] ss:$0 sm:$0xff] }
 0x17d   :  { %v2985_v47 = vpop.xlane.xlu0 %2984  ;;  %v3347_v49 = vmul.f32 %v5808_v3, %v4077_v44 }
 0x17e   :  { %v3019_v0 = vrot.slane %v2985_v47, %v5763_v54  ;;  %3002 = vadd.xlane.f32.xlu1 %v3001_v5  ;;  %v1146_v13 = vsel %vm150_vm5, %v1133_v9, %v5439_v53  ;;  %v3481_v5 = vsel %vm75_vm0, %v3469_v39, 0.0  ;;  %v5826_v53 = vld [vmem:[%s6510_s0 + $0xd0] sm:$0x7f] }
 0x17f   :  { %v5800_v4 = vpop.xlane.xlu1 %1219  ;;  %v1147_v26 = vsel %vm152_vm6, %v1137_v25, %v1146_v13  ;;  %v3361_v47 = vsel %vm75_vm0, %v3347_v49, 0.0  ;;  %v3895_v9 = vld [vmem:[%s6510_s0 + $0xb1] ss:$0 sm:$0xff]  ;;  %v3925_v13 = vld [vmem:[%s6510_s0 + $0x73] ss:$0 sm:$0xff] }
 0x180   :  { %v5798_v56 = vsel %vm142_vm1, %v3023_v8, %v3019_v0  ;;  %2882 = vadd.xlane.f32.xlu0 %v2881_v62  ;;  %v1691_v62 = vmul.f32 %v5191_v58, %v3857_v50  ;;  %v2066_v58 = vmul.f32 %v5549_v55, %v3910_v38  ;;  %v1944_v49 = vmul.f32 %v5722_v17, %v3895_v9 }
 0x181   :  { %v1100_v42 = vpop.xlane.xlu0 %1099  ;;  %v2405_v38 = vrot.slane %v5712_v48, %v5248_v14  ;;  %v4093_v48 = vld [vmem:[%s6510_s0 + $0x7e] ss:$0 sm:$0xff] }
 0x182   :  { %v1141_v30 = vrot.slane %v1100_v42, %v5219_v16  ;;  %3242 = vadd.xlane.f32.xlu1 %v3241_v11  ;;  %v1822_v16 = vmul.f32 %v5826_v53, %v3880_v32  ;;  %v1713_v42 = vsel %vm75_vm0, %v1691_v62, 0.0 }
 0x183   :  { %v1460_v61 = vpop.xlane.xlu1 %1459 }
 0x184   :  { %v1148_v22 = vsel %vm154_vm7, %v1141_v30, %v1147_v26  ;;  %3122 = vadd.xlane.f32.xlu0 %v3121_v52  ;;  %v1498_v1 = vrot.slane %v1460_v61, %v5449_v18  ;;  %v1842_v25 = vsel %vm75_vm0, %v1822_v16, 0.0  ;;  %v5850_v52 = vsub.s32 %v1856_v29, %v4679_v60  ;;  %v4048_v29 = vld [vmem:[%s6510_s0 + $0xdb] ss:$0 sm:$0xff] }
 0x185   :  { %1151 = vst.msk [vmem:[#allocation2] sm:$0xff] %vm1150_vm8, %v1148_v22  ;;  %v5830_v8 = vpop.xlane.xlu0 %1339  ;;  %v2082_v22 = vsel %vm75_vm0, %v2066_v58, 0.0  ;;  %vm1642_vm8 = vcmask 745120  }
 0x186   :  { %v5843_v0 = vsel %vm148_vm4, %v1498_v1, %v5688_v10  ;;  %3482 = vadd.xlane.f32.xlu1 %v3481_v5  ;;  %v4033_v10 = vld [vmem:[%s6510_s0 + $0xfa] ss:$0 sm:$0xff]  ;;  %v1962_v1 = vsel %vm75_vm0, %v1944_v49, 0.0 }
 0x187   :  { %v1700_v44 = vpop.xlane.xlu1 %1699  ;;  %v2982_v61 = vmul.f32 %v4033_v10, %v5603_v21  ;;  %v4078_v10 = vld [vmem:[%s6510_s0 + $0x9d] ss:$0 sm:$0xff] }
 0x188   :  { %3362 = vadd.xlane.f32.xlu0 %v3361_v47  ;;  %v1736_v11 = vrot.slane %v1700_v44, %v5702_v35  ;;  %v2188_v47 = vmul.f32 %v5404_v40, %v3925_v13 }
 0x189   :  { %v1580_v39 = vpop.xlane.xlu0 %1579  ;;  %v3004_v44 = vsel %vm75_vm0, %v2982_v61, 0.0 }
 0x18a   :  { %v1617_v32 = vrot.slane %v1580_v39, %v5555_v24  ;;  %v5862_v30 = vsel %vm144_vm2, %v1736_v11, %v5738_v45  ;;  %1843 = vadd.xlane.f32.xlu1 %v1842_v25  ;;  %v4063_v45 = vld [vmem:[%s6510_s0 + $0xbc] ss:$0 sm:$0xff]  ;;  %v2202_v58 = vsel %vm75_vm0, %v2188_v47, 0.0  ;;  %v3104_v11 = vmul.f32 %v4048_v29, %v5425_v20  ;;  %v3896_v47 = vld [vmem:[%s6510_s0 + $0xd1] ss:$0 sm:$0xff] }
 0x18b   :  { %v1829_v26 = vpop.xlane.xlu1 %1828  ;;  %v1945_v29 = vmul.f32 %v5826_v53, %v3896_v47 }
 0x18c   :  { %v5866_v50 = vsel %vm146_vm3, %v1617_v32, %v5710_v36  ;;  %1714 = vadd.xlane.f32.xlu0 %v1713_v42  ;;  %v1864_v5 = vrot.slane %v1829_v26, %v5850_v52  ;;  %v2397_v36 = vrot.slane %v5590_v41, %v5248_v14  ;;  %v3226_v41 = vmul.f32 %v4063_v45, %v5301_v37 }
 0x18d   :  { %v1826_v16 = vpop.xlane.xlu0 %1825 }
 0x18e   :  { %v1860_v62 = vrot.slane %v1826_v16, %v5850_v52  ;;  %2083 = vadd.xlane.f32.xlu1 %v2082_v22  ;;  %v2425_v39 = vsel %vm150_vm5, %v2397_v36, %v5477_v43  ;;  %v3244_v22 = vsel %vm75_vm0, %v3226_v41, 0.0 }
 0x18f   :  { %v5887_v40 = vpop.xlane.xlu1 %2501  ;;  %v2426_v32 = vsel %vm152_vm6, %v2405_v38, %v2425_v39  ;;  %v3911_v39 = vld [vmem:[%s6510_s0 + $0xb2] ss:$0 sm:$0xff] }
 0x190   :  { %v5885_v9 = vsel %vm142_vm1, %v1864_v5, %v1860_v62  ;;  %1963 = vadd.xlane.f32.xlu0 %v1962_v1  ;;  %v3124_v5 = vsel %vm75_vm0, %v3104_v11, 0.0  ;;  %v3138_v1 = vadd.s32 4294967256, %v4677_v59  ;;  %v3926_v11 = vld [vmem:[%s6510_s0 + $0x93] ss:$0 sm:$0xff] }
 0x191   :  { %v2339_v25 = vpop.xlane.xlu0 %2338 }
 0x192   :  { %v2409_v42 = vrot.slane %v2339_v25, %v5234_v12  ;;  %v2413_v49 = vrot.slane %v2339_v25, %v5248_v14  ;;  %3005 = vadd.xlane.f32.xlu1 %v3004_v44  ;;  %v3470_v12 = vmul.f32 %v5808_v3, %v4093_v48  ;;  %v3881_v3 = vld [vmem:[%s6510_s0 + $0xf0] ss:$0 sm:$0xff]  ;;  %v5934_v25 = vsub.s32 %v3138_v1, %v4679_v60 }
 0x193   :  { %v2751_v43 = vpop.xlane.xlu1 %2750 }
 0x194   :  { %v5906_v13 = vsel %vm154_vm7, %v2409_v42, %v5735_v6  ;;  %v2427_v26 = vsel %vm154_vm7, %v2413_v49, %v2426_v32  ;;  %2203 = vadd.xlane.f32.xlu0 %v2202_v58  ;;  %v2789_v14 = vrot.slane %v2751_v43, %v5485_v31  ;;  %v4156_v6 = vld [vmem:[%s6510_s0 + $0x98] sm:$0x7f]  ;;  %v3484_v62 = vsel %vm75_vm0, %v3470_v12, 0.0 }
 0x195   :  { %2433 = vst.msk [vmem:[#allocation2 + $0x8] sm:$0xff] %vm2432_vm9, %v2427_v26  ;;  %v5912_v61 = vpop.xlane.xlu0 %2621  ;;  %v3348_v16 = vmul.f32 %v4156_v6, %v4078_v10  ;;  %v1965_v32 = vsel %vm75_vm0, %v1945_v29, 0.0  ;;  %v2189_v26 = vmul.f32 %v5549_v55, %v3926_v11  ;;  %v4049_v55 = vld [vmem:[%s6510_s0 + $0xfb] ss:$0 sm:$0xff]  ;;  %vm1765_vm9 = vcmask 802520  }
 0x196   :  { %v5927_v45 = vsel %vm148_vm4, %v2789_v14, %v5779_v15  ;;  %3245 = vadd.xlane.f32.xlu1 %v3244_v22  ;;  %v5939_v15 = vld [vmem:[%s6510_s0 + $0xf0] sm:$0x7f]  ;;  %v2067_v14 = vmul.f32 %v5722_v17, %v3911_v39  ;;  %v3105_v29 = vmul.f32 %v4049_v55, %v5603_v21 }
 0x197   :  { %v2991_v36 = vpop.xlane.xlu1 %2990  ;;  %v3364_v41 = vsel %vm75_vm0, %v3348_v16, 0.0  ;;  %v1823_v58 = vmul.f32 %v5939_v15, %v3881_v3  ;;  %v1260_v16 = vrot.slane %v5800_v4, %v5295_v23  ;;  %v2205_v3 = vsel %vm75_vm0, %v2189_v26, 0.0  ;;  %v4094_v4 = vld [vmem:[%s6510_s0 + $0x9e] ss:$0 sm:$0xff] }
 0x198   :  { %3125 = vadd.xlane.f32.xlu0 %v3124_v5  ;;  %v3027_v38 = vrot.slane %v2991_v36, %v5763_v54 }
 0x199   :  { %v2871_v44 = vpop.xlane.xlu0 %2870  ;;  %v1845_v12 = vsel %vm75_vm0, %v1823_v58, 0.0 }
 0x19a   :  { %v2908_v48 = vrot.slane %v2871_v44, %v5621_v51  ;;  %v5951_v42 = vsel %vm144_vm2, %v3027_v38, %v5798_v56  ;;  %3485 = vadd.xlane.f32.xlu1 %v3484_v62  ;;  %v4064_v56 = vld [vmem:[%s6510_s0 + $0xdc] ss:$0 sm:$0xff]  ;;  %v2085_v62 = vsel %vm75_vm0, %v2067_v14, 0.0 }
 0x19b   :  { %v3111_v10 = vpop.xlane.xlu1 %3110 }
 0x19c   :  { %v5955_v49 = vsel %vm146_vm3, %v2908_v48, %v5775_v63  ;;  %3365 = vadd.xlane.f32.xlu0 %v3364_v41  ;;  %v3146_v43 = vrot.slane %v3111_v10, %v5934_v25  ;;  %v1256_v63 = vrot.slane %v5654_v7, %v5295_v23  ;;  %v3227_v7 = vmul.f32 %v4064_v56, %v5425_v20  ;;  %v4079_v41 = vld [vmem:[%s6510_s0 + $0xbd] ss:$0 sm:$0xff] }
 0x19d   :  { %v3108_v22 = vpop.xlane.xlu0 %3107  ;;  %v3471_v10 = vmul.f32 %v4156_v6, %v4094_v4  ;;  %v3349_v26 = vmul.f32 %v4079_v41, %v5301_v37 }
 0x19e   :  { %v3142_v5 = vrot.slane %v3108_v22, %v5934_v25  ;;  %1966 = vadd.xlane.f32.xlu1 %v1965_v32  ;;  %v1269_v38 = vsel %vm150_vm5, %v1256_v63, %v5543_v2  ;;  %v3247_v39 = vsel %vm75_vm0, %v3227_v7, 0.0  ;;  %v3912_v22 = vld [vmem:[%s6510_s0 + $0xd2] ss:$0 sm:$0xff] }
 0x19f   :  { %v5976_v47 = vpop.xlane.xlu1 %1342  ;;  %v1270_v58 = vsel %vm152_vm6, %v1260_v16, %v1269_v38  ;;  %v3487_v56 = vsel %vm75_vm0, %v3471_v10, 0.0  ;;  %v2068_v37 = vmul.f32 %v5826_v53, %v3912_v22  ;;  %v3367_v55 = vsel %vm75_vm0, %v3349_v26, 0.0  ;;  %v3555_v22 = vld [vmem:[%s6511_s1 + $0x18] sm:$0xff] }
 0x1a0   :  { %v5974_v1 = vsel %vm142_vm1, %v3146_v43, %v3142_v5  ;;  %1846 = vadd.xlane.f32.xlu0 %v1845_v12  ;;  %v1979_v43 = vadd.s32 4294967191, %v4677_v59  ;;  %v3897_v12 = vld [vmem:[%s6510_s0 + $0xf1] ss:$0 sm:$0xff] }
 0x1a1   :  { %v1223_v36 = vpop.xlane.xlu0 %1222 }
 0x1a2   :  { %v1264_v44 = vrot.slane %v1223_v36, %v5295_v23  ;;  %2206 = vadd.xlane.f32.xlu1 %v2205_v3  ;;  %v3127_v23 = vsel %vm75_vm0, %v3105_v29, 0.0  ;;  %v6015_v16 = vsub.s32 %v1979_v43, %v4679_v60  ;;  %v1946_v3 = vmul.f32 %v5939_v15, %v3897_v12  ;;  %v3927_v36 = vld [vmem:[%s6510_s0 + $0xb3] ss:$0 sm:$0xff]  ;;  %v3553_v29 = vld [vmem:[%s6511_s1 + $0x8] sm:$0xff]  ;;  %v4080_v43 = vld [vmem:[%s6510_s0 + $0xdd] ss:$0 sm:$0xff] }
 0x1a3   :  { %v1583_v48 = vpop.xlane.xlu1 %1582  ;;  %v2542_v12 = vrot.slane %v5887_v40, %v5313_v28  ;;  %v3350_v40 = vmul.f32 %v4080_v43, %v5425_v20  ;;  %v3558_v43 = vld [vmem:[%s6511_s1 + $0x30] sm:$0xff] }
 0x1a4   :  { %v1271_v11 = vsel %vm154_vm7, %v1264_v44, %v1270_v58  ;;  %2086 = vadd.xlane.f32.xlu0 %v2085_v62  ;;  %v1621_v2 = vrot.slane %v1583_v48, %v5555_v24  ;;  %v3552_v62 = vld [vmem:[%s6511_s1] sm:$0xff]  ;;  %v2088_v58 = vsel %vm75_vm0, %v2068_v37, 0.0  ;;  %v4183_v48 = vmov 0.0|0.0  }
 0x1a5   :  { %1274 = vst.msk [vmem:[#allocation2] sm:$0xff] %vm1273_vm10, %v1271_v11  ;;  %v5995_v32 = vpop.xlane.xlu0 %1462  ;;  %v4102_v38 = vpack.c.bf16 %v3553_v29, %v3552_v62  ;;  %4101 = vmatprep.subr.bf16.mxu0 %v4183_v48  ;;  %v3913_v62 = vld [vmem:[%s6510_s0 + $0xf2] ss:$0 sm:$0xff]  ;;  %v3556_v29 = vld [vmem:[%s6511_s1 + $0x20] sm:$0xff]  ;;  %vm3056_vm10 = vcmask 326920  }
 0x1a6   :  { %v6008_v6 = vsel %vm148_vm4, %v1621_v2, %v5866_v50  ;;  %3248 = vadd.xlane.f32.xlu1 %v3247_v39  ;;  %v4065_v50 = vld [vmem:[%s6510_s0 + $0xfc] ss:$0 sm:$0xff]  ;;  %v2190_v2 = vmul.f32 %v5722_v17, %v3927_v36  ;;  %v3554_v17 = vld [vmem:[%s6511_s1 + $0x10] sm:$0xff] }
 0x1a7   :  { %v1832_v14 = vpop.xlane.xlu1 %1831  ;;  %v3228_v11 = vmul.f32 %v4065_v50, %v5603_v21  ;;  %4103 = vmatpush1.bf16.msra.mxu0 %v4102_v38  ;;  %v3928_v50 = vld [vmem:[%s6510_s0 + $0xd3] ss:$0 sm:$0xff]  ;;  %v3557_v38 = vld [vmem:[%s6511_s1 + $0x28] sm:$0xff] }
 0x1a8   :  { %3128 = vadd.xlane.f32.xlu0 %v3127_v23  ;;  %v1868_v63 = vrot.slane %v1832_v14, %v5850_v52  ;;  %v2538_v23 = vrot.slane %v5743_v34, %v5313_v28  ;;  %4104 = vmatprep.subr.bf16.mxu0 %v4183_v48  ;;  %v4105_v34 = vpack.c.bf16 %v3555_v22, %v3554_v17  ;;  %v3559_v17 = vld [vmem:[%s6511_s1 + $0x38] sm:$0xff] }
 0x1a9   :  { %v1703_v5 = vpop.xlane.xlu0 %1702  ;;  %v3250_v37 = vsel %vm75_vm0, %v3228_v11, 0.0 }
 0x1aa   :  { %v1740_v7 = vrot.slane %v1703_v5, %v5702_v35  ;;  %v6033_v4 = vsel %vm144_vm2, %v1868_v63, %v5885_v9  ;;  %3488 = vadd.xlane.f32.xlu1 %v3487_v56  ;;  %v1968_v9 = vsel %vm75_vm0, %v1946_v3, 0.0  ;;  %v4158_v63 = vld [vmem:[%s6510_s0 + $0xb8] sm:$0x7f]  ;;  %v2208_v3 = vsel %vm75_vm0, %v2190_v2, 0.0 }
 0x1ab   :  { %v1952_v41 = vpop.xlane.xlu1 %1951  ;;  %4106 = vmatpush1.bf16.msra.mxu0 %v4105_v34  ;;  %v3370_v2 = vsel %vm75_vm0, %v3350_v40, 0.0 }
 0x1ac   :  { %v6037_v44 = vsel %vm146_vm3, %v1740_v7, %v5862_v30  ;;  %3368 = vadd.xlane.f32.xlu0 %v3367_v55  ;;  %v1987_v39 = vrot.slane %v1952_v41, %v6015_v16  ;;  %v4095_v30 = vld [vmem:[%s6510_s0 + $0xbe] ss:$0 sm:$0xff]  ;;  %v2551_v7 = vsel %vm150_vm5, %v2538_v23, %v5610_v33  ;;  %4107 = vmatprep.subr.bf16.mxu0 %v4183_v48  ;;  %v3261_v23 = vadd.s32 4294967249, %v4677_v59 }
 0x1ad   :  { %v1949_v10 = vpop.xlane.xlu0 %1948  ;;  %v3472_v5 = vmul.f32 %v4158_v63, %v4095_v30  ;;  %v2552_v41 = vsel %vm152_vm6, %v2542_v12, %v2551_v7  ;;  %v4108_v33 = vpack.c.bf16 %v3557_v38, %v3556_v29  ;;  %v2069_v30 = vmul.f32 %v5939_v15, %v3913_v62  ;;  %v3561_v62 = vld [vmem:[%s6511_s1 + $0x48] sm:$0xff] }
 0x1ae   :  { %v1983_v26 = vrot.slane %v1949_v10, %v6015_v16  ;;  %2089 = vadd.xlane.f32.xlu1 %v2088_v58  ;;  %v4111_v12 = vpack.c.bf16 %v3559_v17, %v3558_v43  ;;  %v6122_v40 = vsub.s32 %v3261_v23, %v4679_v60  ;;  %v1383_v23 = vrot.slane %v5976_v47, %v5350_v46 }
 0x1af   :  { %v6066_v56 = vpop.xlane.xlu1 %2624  ;;  %v3490_v11 = vsel %vm75_vm0, %v3472_v5, 0.0  ;;  %4109 = vmatpush1.bf16.msra.mxu0 %v4108_v33 }
 0x1b0   :  { %v6064_v14 = vsel %vm142_vm1, %v1987_v39, %v1983_v26  ;;  %1969 = vadd.xlane.f32.xlu0 %v1968_v9  ;;  %v2191_v39 = vmul.f32 %v5826_v53, %v3928_v50  ;;  %v4096_v26 = vld [vmem:[%s6510_s0 + $0xde] ss:$0 sm:$0xff]  ;;  %v4081_v53 = vld [vmem:[%s6510_s0 + $0xfd] ss:$0 sm:$0xff]  ;;  %4110 = vmatprep.subr.bf16.mxu0 %v4183_v48 }
 0x1b1   :  { %v2505_v55 = vpop.xlane.xlu0 %2504  ;;  %v3473_v63 = vmul.f32 %v4096_v26, %v5425_v20  ;;  %v3351_v50 = vmul.f32 %v4081_v53, %v5603_v21  ;;  %v3929_v20 = vld [vmem:[%s6510_s0 + $0xf3] ss:$0 sm:$0xff] }
 0x1b2   :  { %v2546_v36 = vrot.slane %v2505_v55, %v5313_v28  ;;  %3251 = vadd.xlane.f32.xlu1 %v3250_v37  ;;  %v2211_v37 = vsel %vm75_vm0, %v2191_v39, 0.0 }
 0x1b3   :  { %v2874_v58 = vpop.xlane.xlu1 %2873  ;;  %4112 = vmatpush1.bf16.msra.mxu0 %v4111_v12 }
 0x1b4   :  { %v2553_v28 = vsel %vm154_vm7, %v2546_v36, %v2552_v41  ;;  %2209 = vadd.xlane.f32.xlu0 %v2208_v3  ;;  %v2912_v10 = vrot.slane %v2874_v58, %v5621_v51  ;;  %v2091_v3 = vsel %vm75_vm0, %v2069_v30, 0.0  ;;  %4113 = vmatprep.subr.bf16.mxu0 %v4183_v48  ;;  %v3560_v36 = vld [vmem:[%s6511_s1 + $0x40] sm:$0xff]  ;;  %v3562_v30 = vld [vmem:[%s6511_s1 + $0x50] sm:$0xff] }
 0x1b5   :  { %2556 = vst.msk [vmem:[#allocation2 + $0x8] sm:$0xff] %vm2555_vm11, %v2553_v28  ;;  %v6095_v9 = vpop.xlane.xlu0 %2753  ;;  %v4114_v38 = vpack.c.bf16 %v3561_v62, %v3560_v36  ;;  %v3493_v28 = vsel %vm75_vm0, %v3473_v63, 0.0  ;;  %vm1897_vm11 = vcmask 859920  }
 0x1b6   :  { %v6115_v22 = vsel %vm148_vm4, %v2912_v10, %v5955_v49  ;;  %3491 = vadd.xlane.f32.xlu1 %v3490_v11  ;;  %v4097_v49 = vld [vmem:[%s6510_s0 + $0xfe] ss:$0 sm:$0xff]  ;;  %v3373_v10 = vsel %vm75_vm0, %v3351_v50, 0.0  ;;  %v2102_v50 = vadd.s32 4294967184, %v4677_v59 }
 0x1b7   :  { %v3114_v34 = vpop.xlane.xlu1 %3113  ;;  %v3474_v58 = vmul.f32 %v4097_v49, %v5603_v21  ;;  %4115 = vmatpush1.bf16.msra.mxu0 %v4114_v38  ;;  %v3563_v21 = vld [vmem:[%s6511_s1 + $0x58] sm:$0xff]  ;;  %v3566_v49 = vld [vmem:[%s6511_s1 + $0x70] sm:$0xff] }
 0x1b8   :  { %3371 = vadd.xlane.f32.xlu0 %v3370_v2  ;;  %v3150_v5 = vrot.slane %v3114_v34, %v5934_v25  ;;  %v1379_v2 = vrot.slane %v5830_v8, %v5350_v46  ;;  %4116 = vmatprep.subr.bf16.mxu0 %v4183_v48  ;;  %v3564_v34 = vld [vmem:[%s6511_s1 + $0x60] sm:$0xff] }
 0x1b9   :  { %v2994_v55 = vpop.xlane.xlu0 %2993  ;;  %v3496_v53 = vsel %vm75_vm0, %v3474_v58, 0.0 }
 0x1ba   :  { %v3031_v7 = vrot.slane %v2994_v55, %v5763_v54  ;;  %v6141_v29 = vsel %vm144_vm2, %v3150_v5, %v5974_v1  ;;  %2212 = vadd.xlane.f32.xlu1 %v2211_v37  ;;  %v2192_v1 = vmul.f32 %v5939_v15, %v3929_v20  ;;  %v4117_v15 = vpack.c.bf16 %v3563_v21, %v3562_v30  ;;  %v3565_v37 = vld [vmem:[%s6511_s1 + $0x68] sm:$0xff] }
 0x1bb   :  { %v3234_v33 = vpop.xlane.xlu1 %3233  ;;  %v1392_v12 = vsel %vm150_vm5, %v1379_v2, %v5692_v27  ;;  %v4120_v5 = vpack.c.bf16 %v3565_v37, %v3564_v34  ;;  %v2661_v21 = vrot.slane %v5912_v61, %v5381_v19  ;;  %v3573_v34 = vld [vmem:[%s6511_s1 + $0xa8] sm:$0xff] }
 0x1bc   :  { %v6145_v41 = vsel %vm146_vm3, %v3031_v7, %v5951_v42  ;;  %2092 = vadd.xlane.f32.xlu0 %v2091_v3  ;;  %v3269_v11 = vrot.slane %v3234_v33, %v6122_v40  ;;  %v2214_v17 = vsel %vm75_vm0, %v2192_v1, 0.0  ;;  %4118 = vmatpush1.bf16.msra.mxu0 %v4117_v15  ;;  %v1393_v63 = vsel %vm152_vm6, %v1383_v23, %v1392_v12  ;;  %v3567_v7 = vld [vmem:[%s6511_s1 + $0x78] sm:$0xff] }
 0x1bd   :  { %v3231_v39 = vpop.xlane.xlu0 %3230  ;;  %4119 = vmatprep.subr.bf16.mxu0 %v4183_v48  ;;  %v4123_v36 = vpack.c.bf16 %v3567_v7, %v3566_v49  ;;  %v2665_v15 = vrot.slane %v6066_v56, %v5381_v19  ;;  %v2674_v12 = vsel %vm150_vm5, %v2661_v21, %v5756_v57  ;;  %vm2678_vm0 = vcmask 154720   ;;  %v3572_v56 = vld [vmem:[%s6511_s1 + $0xa0] sm:$0xff] }
 0x1be   :  { %v3265_v42 = vrot.slane %v3231_v39, %v6122_v40  ;;  %3494 = vadd.xlane.f32.xlu1 %v3493_v28  ;;  %v6200_v28 = vsub.s32 %v2102_v50, %v4679_v60  ;;  %v3575_v50 = vld [vmem:[%s6511_s1 + $0xb8] sm:$0xff] }
 0x1bf   :  { %v6167_v8 = vpop.xlane.xlu1 %1465  ;;  %v2675_v37 = vsel %vm152_vm6, %v2665_v15, %v2674_v12 }
 0x1c0   :  { %v6165_v26 = vsel %vm142_vm1, %v3269_v11, %v3265_v42  ;;  %3374 = vadd.xlane.f32.xlu0 %v3373_v10  ;;  %4121 = vmatpush1.bf16.msra.mxu0 %v4120_v5  ;;  %v3568_v11 = vld [vmem:[%s6511_s1 + $0x80] sm:$0xff] }
 0x1c1   :  { %v1346_v43 = vpop.xlane.xlu0 %1345  ;;  %4122 = vmatprep.subr.bf16.mxu0 %v4183_v48 }
 0x1c2   :  { %v1387_v47 = vrot.slane %v1346_v43, %v5350_v46  ;;  %3497 = vadd.xlane.f32.xlu1 %v3496_v53 }
 0x1c3   :  { %v1706_v27 = vpop.xlane.xlu1 %1705 }
 0x1c4   :  { %v1394_v55 = vsel %vm154_vm7, %v1387_v47, %v1393_v63  ;;  %2215 = vadd.xlane.f32.xlu0 %v2214_v17  ;;  %v1744_v46 = vrot.slane %v1706_v27, %v5702_v35  ;;  %4124 = vmatpush1.bf16.msra.mxu0 %v4123_v36  ;;  %v4132_v63 = vpack.c.bf16 %v3573_v34, %v3572_v56  ;;  %v3384_v27 = vadd.s32 4294967242, %v4677_v59 }
 0x1c5   :  { %1397 = vst.msk [vmem:[#allocation2] sm:$0xff] %vm1396_vm12, %v1394_v55  ;;  %v6184_v3 = vpop.xlane.xlu0 %1585  ;;  %4125 = vmatprep.subr.bf16.mxu0 %v4183_v48  ;;  %vm3179_vm12 = vcmask 384320  }
 0x1c6   :  { %v6196_v20 = vsel %vm148_vm4, %v1744_v46, %v6037_v44  ;;  %v3569_v44 = vld [vmem:[%s6511_s1 + $0x88] sm:$0xff]  ;;  %v3574_v46 = vld [vmem:[%s6511_s1 + $0xb0] sm:$0xff] }
 0x1c7   :  { %v1955_v62 = vpop.xlane.xlu1 %1954  ;;  %v4126_v10 = vpack.c.bf16 %v3569_v44, %v3568_v11  ;;  %v4135_v7 = vpack.c.bf16 %v3575_v50, %v3574_v46  ;;  %v3576_v11 = vld [vmem:[%s6511_s1 + $0xc0] sm:$0xf]  ;;  %v2793_v46 = vrot.slane %v6095_v9, %v5485_v31 }
 0x1c8   :  { %v1991_v38 = vrot.slane %v1955_v62, %v6015_v16 }
 0x1c9   :  { %v1835_v33 = vpop.xlane.xlu0 %1834  ;;  %4127 = vmatpush1.bf16.msra.mxu0 %v4126_v10 }
 0x1ca   :  { %v1872_v58 = vrot.slane %v1835_v33, %v5850_v52  ;;  %v6212_v39 = vsel %vm144_vm2, %v1991_v38, %v6064_v14  ;;  %4128 = vmatprep.subr.bf16.mxu0 %v4183_v48  ;;  %v3570_v14 = vld [vmem:[%s6511_s1 + $0x90] sm:$0xff]  ;;  %v6265_v33 = vsub.s32 %v3384_v27, %v4679_v60 }
 0x1cb   :  { %v2075_v2 = vpop.xlane.xlu1 %2074 }
 0x1cc   :  { %v6216_v1 = vsel %vm146_vm3, %v1872_v58, %v6033_v4  ;;  %v2110_v42 = vrot.slane %v2075_v2, %v6200_v28  ;;  %v3571_v4 = vld [vmem:[%s6511_s1 + $0x98] sm:$0xff]  ;;  %v4184_v58 = vmov 0.0  }
 0x1cd   :  { %v2072_v30 = vpop.xlane.xlu0 %2071  ;;  %v4129_v53 = vpack.c.bf16 %v3571_v4, %v3570_v14 }
 0x1ce   :  { %v2106_v23 = vrot.slane %v2072_v30, %v6200_v28  ;;  %v1502_v30 = vrot.slane %v5995_v32, %v5449_v18 }
 0x1cf   :  { %v6234_v61 = vpop.xlane.xlu1 %2756  ;;  %4130 = vmatpush1.bf16.msra.mxu0 %v4129_v53 }
 0x1d0   :  { %v6232_v43 = vsel %vm142_vm1, %v2110_v42, %v2106_v23  ;;  %4131 = vmatprep.subr.bf16.mxu0 %v4183_v48  ;;  %v1506_v23 = vrot.slane %v6167_v8, %v5449_v18  ;;  %v2225_v8 = vadd.s32 4294967177, %v4677_v59 }
 0x1d1   :  { %v2628_v17 = vpop.xlane.xlu0 %2627 }
 0x1d2   :  { %v2669_v47 = vrot.slane %v2628_v17, %v5381_v19 }
 0x1d3   :  { %v2997_v55 = vpop.xlane.xlu1 %2996  ;;  %4133 = vmatpush1.bf16.msra.mxu0 %v4132_v63 }
 0x1d4   :  { %v2676_v5 = vsel %vm154_vm7, %v2669_v47, %v2675_v37  ;;  %v3035_v57 = vrot.slane %v2997_v55, %v5763_v54  ;;  %4134 = vmatprep.subr.bf16.mxu0 %v4183_v48  ;;  %v6299_v37 = vsub.s32 %v2225_v8, %v4679_v60 }
 0x1d5   :  { %2679 = vst.msk [vmem:[#allocation2 + $0x8] sm:$0xff] %vm2678_vm0, %v2676_v5  ;;  %v6249_v19 = vpop.xlane.xlu0 %2876  ;;  %vm2020_vm0 = vcmask 917320  }
 0x1d6   :  { %v6261_v49 = vsel %vm148_vm4, %v3035_v57, %v6145_v41 }
 0x1d7   :  { %v3237_v36 = vpop.xlane.xlu1 %3236  ;;  %4136 = vmatpush1.bf16.msra.mxu0 %v4135_v7  ;;  %v2797_v7 = vrot.slane %v6234_v61, %v5485_v31  ;;  %v3507_v61 = vadd.s32 4294967235, %v4677_v59  ;;  %v1625_v59 = vrot.slane %v6184_v3, %v5555_v24 }
 0x1d8   :  { %v3273_v62 = vrot.slane %v3237_v36, %v6122_v40  ;;  %3640 = vmatprep.subr.mxu0 %v4184_v58 }
 0x1d9   :  { %v3117_v38 = vpop.xlane.xlu0 %3116 }
 0x1da   :  { %v3154_v48 = vrot.slane %v3117_v38, %v5934_v25  ;;  %v3295_v41 = vsel %vm144_vm2, %v3273_v62, %v6165_v26 }
 0x1db   :  { %v3357_v10 = vpop.xlane.xlu1 %3356  ;;  %4099 = vmatpush1.msk.msra.mxu0 %vm3588_vm13, %v3576_v11  ;;  %vm3302_vm13 = vcmask 441720  }
 0x1dc   :  { %v6275_v44 = vsel %vm146_vm3, %v3154_v48, %v6141_v29  ;;  %v3392_v2 = vrot.slane %v3357_v10, %v6265_v33  ;;  %v1515_v29 = vsel %vm150_vm5, %v1502_v30, %v5843_v0  ;;  %v6327_v30 = vsub.s32 %v3507_v61, %v4679_v60 }
 0x1dd   :  { %v3354_v42 = vpop.xlane.xlu0 %3353  ;;  %v1516_v53 = vsel %vm152_vm6, %v1506_v23, %v1515_v29 }
 0x1de   :  { %v3388_v21 = vrot.slane %v3354_v42, %v6265_v33 }
 0x1df   :  { %v1589_v26 = vpop.xlane.xlu1 %1588 }
 0x1e0   :  { %v3417_v14 = vsel %vm142_vm1, %v3392_v2, %v3388_v21  ;;  %v1629_v60 = vrot.slane %v1589_v26, %v5555_v24 }
 0x1e1   :  { %v1469_v4 = vpop.xlane.xlu0 %1468 }
 0x1e2   :  { %v1510_v15 = vrot.slane %v1469_v4, %v5449_v18 }
 0x1e3   :  { %v1838_v32 = vpop.xlane.xlu1 %1837 }
 0x1e4   :  { %v1517_v17 = vsel %vm154_vm7, %v1510_v15, %v1516_v53  ;;  %v1876_v12 = vrot.slane %v1838_v32, %v5850_v52 }
 0x1e5   :  { %1520 = vst.msk [vmem:[#allocation2] sm:$0xff] %vm1519_vm14, %v1517_v17  ;;  %v6290_v47 = vpop.xlane.xlu0 %1708  ;;  %vm2143_vm14 = vcmask 974720  }
 0x1e6   :  { %v6295_v56 = vsel %vm148_vm4, %v1876_v12, %v6216_v1 }
 0x1e7   :  { %v2078_v0 = vpop.xlane.xlu1 %2077 }
 0x1e8   :  { %v2114_v34 = vrot.slane %v2078_v0, %v6200_v28 }
 0x1e9   :  { %v1958_v18 = vpop.xlane.xlu0 %1957 }
 0x1ea   :  { %v1995_v63 = vrot.slane %v1958_v18, %v6015_v16  ;;  %v6304_v5 = vsel %vm144_vm2, %v2114_v34, %v6232_v43 }
 0x1eb   :  { %v2198_v57 = vpop.xlane.xlu1 %2197 }
 0x1ec   :  { %v6308_v55 = vsel %vm146_vm3, %v1995_v63, %v6212_v39  ;;  %v2233_v1 = vrot.slane %v2198_v57, %v6299_v37  ;;  %v2806_v39 = vsel %vm150_vm5, %v2793_v46, %v5927_v45  ;;  %v2916_v63 = vrot.slane %v6249_v19, %v5621_v51 }
 0x1ed   :  { %v2195_v27 = vpop.xlane.xlu0 %2194  ;;  %v2807_v48 = vsel %vm152_vm6, %v2797_v7, %v2806_v39  ;;  %v1748_v39 = vrot.slane %v6290_v47, %v5702_v35 }
 0x1ee   :  { %v2229_v50 = vrot.slane %v2195_v27, %v6299_v37  ;;  %v2929_v27 = vsel %vm150_vm5, %v2916_v63, %v6115_v22 }
 0x1ef   :  { %v2880_v43 = vpop.xlane.xlu1 %2879 }
 0x1f0   :  { %v2258_v36 = vsel %vm142_vm1, %v2233_v1, %v2229_v50 }
 0x1f1   :  { %v2760_v62 = vpop.xlane.xlu0 %2759 }
 0x1f2   :  { %v2801_v38 = vrot.slane %v2760_v62, %v5485_v31 }
 0x1f3   :  { %v6322_v9 = vpop.xlane.xlu1 %3119 }
 0x1f4   :  { %v2808_v58 = vsel %vm154_vm7, %v2801_v38, %v2807_v48  ;;  %v3158_v63 = vrot.slane %v6322_v9, %v5934_v25 }
 0x1f5   :  { %2811 = vst.msk [vmem:[#allocation2 + $0x8] sm:$0xff] %vm2810_vm15, %v2808_v58  ;;  %v3000_v11 = vpop.xlane.xlu0 %2999  ;;  %vm3425_vm15 = vcmask 499120  }
 0x1f7   :  { %v3360_v10 = vpop.xlane.xlu1 %3359 }
 0x1f8   :  { %v3396_v2 = vrot.slane %v3360_v10, %v6265_v33 }
 0x1f9   :  { %v3240_v42 = vpop.xlane.xlu0 %3239 }
 0x1fa   :  { %v3277_v45 = vrot.slane %v3240_v42, %v6122_v40  ;;  %v6331_v31 = vsel %vm144_vm2, %v3396_v2, %v3417_v14  ;;  %v3039_v42 = vrot.slane %v3000_v11, %v5763_v54 }
 0x1fb   :  { %v3480_v23 = vpop.xlane.xlu1 %3479 }
 0x1fc   :  { %v6334_v21 = vsel %vm146_vm3, %v3277_v45, %v3295_v41  ;;  %v3515_v4 = vrot.slane %v3480_v23, %v6327_v30  ;;  %v1638_v41 = vsel %vm150_vm5, %v1625_v59, %v6008_v6  ;;  %v2920_v6 = vrot.slane %v2880_v43, %v5621_v51 }
 0x1fd   :  { %v3477_v29 = vpop.xlane.xlu0 %3476  ;;  %v1639_v12 = vsel %vm152_vm6, %v1629_v60, %v1638_v41 }
 0x1fe   :  { %v3511_v15 = vrot.slane %v3477_v29, %v6327_v30  ;;  %v2930_v50 = vsel %vm152_vm6, %v2920_v6, %v2929_v27 }
 0x1ff   :  { %v1712_v17 = vpop.xlane.xlu1 %1711 }
 0x200   :  { %v6342_v53 = vsel %vm142_vm1, %v3515_v4, %v3511_v15  ;;  %vm2933_vm1 = vcmask 269520   ;;  %v1752_v22 = vrot.slane %v1712_v17, %v5702_v35  ;;  %v3052_v4 = vsel %vm150_vm5, %v3039_v42, %v6261_v49 }
 0x201   :  { %v1592_v14 = vpop.xlane.xlu0 %1591 }
 0x202   :  { %v1633_v32 = vrot.slane %v1592_v14, %v5555_v24 }
 0x203   :  { %v6349_v3 = vpop.xlane.xlu1 %1960 }
 0x204   :  { %v1640_v8 = vsel %vm154_vm7, %v1633_v32, %v1639_v12 }
 0x205   :  { %1643 = vst.msk [vmem:[#allocation2] sm:$0xff] %vm1642_vm8, %v1640_v8  ;;  %v1841_v0 = vpop.xlane.xlu0 %1840  ;;  %vm3584_vm8 = vcmask 556032  }
 0x206   :  { %v1880_v14 = vrot.slane %v1841_v0, %v5850_v52 }
 0x207   :  { %v2201_v26 = vpop.xlane.xlu1 %2200 }
 0x208   :  { %v2237_v34 = vrot.slane %v2201_v26, %v6299_v37 }
 0x209   :  { %v6352_v18 = vpop.xlane.xlu0 %2080 }
 0x20a   :  { %v6358_v24 = vsel %vm144_vm2, %v2237_v34, %v2258_v36 }
 0x20b   :  { %v3003_v57 = vpop.xlane.xlu1 %3002 }
 0x20c   :  { %v3043_v45 = vrot.slane %v3003_v57, %v5763_v54 }
 0x20d   :  { %v2883_v1 = vpop.xlane.xlu0 %2882 }
 0x20e   :  { %v2924_v46 = vrot.slane %v2883_v1, %v5621_v51  ;;  %v1761_v51 = vsel %vm150_vm5, %v1748_v39, %v6196_v20  ;;  %v3053_v29 = vsel %vm152_vm6, %v3043_v45, %v3052_v4 }
 0x20f   :  { %v6365_v62 = vpop.xlane.xlu1 %3242  ;;  %v1762_v61 = vsel %vm152_vm6, %v1752_v22, %v1761_v51 }
 0x210   :  { %v2931_v7 = vsel %vm154_vm7, %v2924_v46, %v2930_v50 }
 0x211   :  { %2934 = vst.msk [vmem:[#allocation2 + $0x8] sm:$0xff] %vm2933_vm1, %v2931_v7  ;;  %v3123_v19 = vpop.xlane.xlu0 %3122 }
 0x212   :  { %v3162_v6 = vrot.slane %v3123_v19, %v5934_v25  ;;  %v1999_v19 = vrot.slane %v6349_v3, %v6015_v16 }
 0x213   :  { %v6367_v43 = vpop.xlane.xlu1 %3482 }
 0x215   :  { %v6369_v36 = vpop.xlane.xlu0 %3362 }
 0x217   :  { %v1844_v38 = vpop.xlane.xlu1 %1843 }
 0x218   :  { %v1884_v49 = vrot.slane %v1844_v38, %v5850_v52  ;;  %v3281_v38 = vrot.slane %v6365_v62, %v6122_v40 }
 0x219   :  { %v1715_v48 = vpop.xlane.xlu0 %1714 }
 0x21a   :  { %v1756_v58 = vrot.slane %v1715_v48, %v5702_v35 }
 0x21b   :  { %v6379_v2 = vpop.xlane.xlu1 %2083 }
 0x21c   :  { %v1763_v10 = vsel %vm154_vm7, %v1756_v58, %v1762_v61 }
 0x21d   :  { %1766 = vst.msk [vmem:[#allocation2] sm:$0xff] %vm1765_vm9, %v1763_v10  ;;  %v1964_v47 = vpop.xlane.xlu0 %1963 }
 0x21e   :  { %v2003_v22 = vrot.slane %v1964_v47, %v6015_v16  ;;  %v3297_v47 = vsel %vm148_vm4, %v3281_v38, %v6334_v21  ;;  %v2122_v21 = vrot.slane %v6379_v2, %v6200_v28 }
 0x21f   :  { %v3006_v23 = vpop.xlane.xlu1 %3005 }
 0x220   :  { %v3047_v20 = vrot.slane %v3006_v23, %v5763_v54  ;;  %v1893_v54 = vsel %vm150_vm5, %v1880_v14, %v6295_v56  ;;  %v3174_v56 = vsel %vm148_vm4, %v3158_v63, %v6275_v44 }
 0x221   :  { %v6386_v35 = vpop.xlane.xlu0 %2203  ;;  %v1894_v8 = vsel %vm152_vm6, %v1884_v49, %v1893_v54  ;;  %v3175_v27 = vsel %vm150_vm5, %v3162_v6, %v3174_v56  ;;  %v3400_v49 = vrot.slane %v6369_v36, %v6265_v33 }
 0x222   :  { %v3054_v59 = vsel %vm154_vm7, %v3047_v20, %v3053_v29 }
 0x223   :  { %3057 = vst.msk [vmem:[#allocation2 + $0x8] sm:$0xff] %vm3056_vm10, %v3054_v59  ;;  %v3246_v15 = vpop.xlane.xlu1 %3245  ;;  %v3419_v63 = vsel %vm146_vm3, %v3400_v49, %v6331_v31 }
 0x224   :  { %v3285_v51 = vrot.slane %v3246_v15, %v6122_v40 }
 0x225   :  { %v3126_v11 = vpop.xlane.xlu0 %3125 }
 0x226   :  { %v3166_v57 = vrot.slane %v3126_v11, %v5934_v25 }
 0x227   :  { %v6390_v60 = vpop.xlane.xlu1 %3485 }
 0x228   :  { %v3176_v50 = vsel %vm152_vm6, %v3166_v57, %v3175_v27  ;;  %v3523_v36 = vrot.slane %v6390_v60, %v6327_v30 }
 0x229   :  { %v6392_v17 = vpop.xlane.xlu0 %3365 }
 0x22a   :  { %v3404_v2 = vrot.slane %v6392_v17, %v6265_v33  ;;  %v2241_v17 = vrot.slane %v6386_v35, %v6299_v37 }
 0x22b   :  { %v1967_v41 = vpop.xlane.xlu1 %1966 }
 0x22c   :  { %v2007_v44 = vrot.slane %v1967_v41, %v6015_v16  ;;  %v3420_v57 = vsel %vm148_vm4, %v3404_v2, %v3419_v63 }
 0x22d   :  { %v1847_v32 = vpop.xlane.xlu0 %1846 }
 0x22e   :  { %v1888_v12 = vrot.slane %v1847_v32, %v5850_v52 }
 0x22f   :  { %v6401_v34 = vpop.xlane.xlu1 %2206 }
 0x230   :  { %v1895_v26 = vsel %vm154_vm7, %v1888_v12, %v1894_v8 }
 0x231   :  { %1898 = vst.msk [vmem:[#allocation2] sm:$0xff] %vm1897_vm11, %v1895_v26  ;;  %v2087_v0 = vpop.xlane.xlu0 %2086 }
 0x232   :  { %v2126_v11 = vrot.slane %v2087_v0, %v6200_v28 }
 0x233   :  { %v3249_v1 = vpop.xlane.xlu1 %3248 }
 0x234   :  { %v3289_v3 = vrot.slane %v3249_v1, %v6122_v40  ;;  %v2245_v1 = vrot.slane %v6401_v34, %v6299_v37  ;;  %v2260_v34 = vsel %vm146_vm3, %v2241_v17, %v6358_v24 }
 0x235   :  { %v3129_v52 = vpop.xlane.xlu0 %3128 }
 0x236   :  { %v3170_v46 = vrot.slane %v3129_v52, %v5934_v25  ;;  %v2015_v25 = vsel %vm148_vm4, %v1999_v19, %v6308_v55  ;;  %v3298_v55 = vsel %vm150_vm5, %v3285_v51, %v3297_v47 }
 0x237   :  { %v6413_v7 = vpop.xlane.xlu1 %3488  ;;  %v2016_v61 = vsel %vm150_vm5, %v2003_v22, %v2015_v25  ;;  %v3299_v20 = vsel %vm152_vm6, %v3289_v3, %v3298_v55  ;;  %v2261_v22 = vsel %vm148_vm4, %v2245_v1, %v2260_v34 }
 0x238   :  { %v3177_v9 = vsel %vm154_vm7, %v3170_v46, %v3176_v50  ;;  %v2017_v42 = vsel %vm152_vm6, %v2007_v44, %v2016_v61  ;;  %v3527_v0 = vrot.slane %v6413_v7, %v6327_v30 }
 0x239   :  { %3180 = vst.msk [vmem:[#allocation2 + $0x8] sm:$0xff] %vm3179_vm12, %v3177_v9  ;;  %v3369_v39 = vpop.xlane.xlu0 %3368 }
 0x23a   :  { %v3408_v8 = vrot.slane %v3369_v39, %v6265_v33 }
 0x23b   :  { %v2090_v48 = vpop.xlane.xlu1 %2089 }
 0x23c   :  { %v2130_v14 = vrot.slane %v2090_v48, %v6200_v28  ;;  %v3421_v35 = vsel %vm150_vm5, %v3408_v8, %v3420_v57 }
 0x23d   :  { %v1970_v58 = vpop.xlane.xlu0 %1969 }
 0x23e   :  { %v2011_v10 = vrot.slane %v1970_v58, %v6015_v16  ;;  %v2118_v16 = vrot.slane %v6352_v18, %v6200_v28  ;;  %v3519_v18 = vrot.slane %v6367_v43, %v6327_v30 }
 0x23f   :  { %v3252_v45 = vpop.xlane.xlu1 %3251 }
 0x240   :  { %v2018_v62 = vsel %vm154_vm7, %v2011_v10, %v2017_v42  ;;  %v3293_v23 = vrot.slane %v3252_v45, %v6122_v40  ;;  %v2137_v40 = vsel %vm146_vm3, %v2118_v16, %v6304_v5  ;;  %v3541_v60 = vsel %vm144_vm2, %v3519_v18, %v6342_v53 }
 0x241   :  { %2021 = vst.msk [vmem:[#allocation2] sm:$0xff] %vm2020_vm0, %v2018_v62  ;;  %v2210_v4 = vpop.xlane.xlu0 %2209  ;;  %v2138_v32 = vsel %vm148_vm4, %v2122_v21, %v2137_v40  ;;  %v3542_v50 = vsel %vm146_vm3, %v3523_v36, %v3541_v60  ;;  %vm3548_vm2 = vcmask 556520   ;;  %vm2266_vm3 = vcmask 1032120  }
 0x242   :  { %v3300_v29 = vsel %vm154_vm7, %v3293_v23, %v3299_v20  ;;  %v2139_v12 = vsel %vm150_vm5, %v2126_v11, %v2138_v32  ;;  %v2249_v52 = vrot.slane %v2210_v4, %v6299_v37  ;;  %v3543_v7 = vsel %vm148_vm4, %v3527_v0, %v3542_v50 }
 0x243   :  { %3303 = vst.msk [vmem:[#allocation2 + $0x8] sm:$0xff] %vm3302_vm13, %v3300_v29  ;;  %v3492_v59 = vpop.xlane.xlu1 %3491  ;;  %v2140_v26 = vsel %vm152_vm6, %v2130_v14, %v2139_v12  ;;  %vm2430_vm4 = vcmask 1048560   ;;  %v3664_v42 = vstv %s6513_s3 }
 0x244   :  { %v3531_v56 = vrot.slane %v3492_v59, %v6327_v30  ;;  %v2262_v48 = vsel %vm150_vm5, %v2249_v52, %v2261_v22 }
 0x245   :  { %v3372_v15 = vpop.xlane.xlu0 %3371 }
 0x246   :  { %v3412_v43 = vrot.slane %v3372_v15, %v6265_v33  ;;  %v3544_v44 = vsel %vm150_vm5, %v3531_v56, %v3543_v7 }
 0x247   :  { %v2213_v41 = vpop.xlane.xlu1 %2212 }
 0x248   :  { %v3422_v53 = vsel %vm152_vm6, %v3412_v43, %v3421_v35  ;;  %v2253_v9 = vrot.slane %v2213_v41, %v6299_v37 }
 0x249   :  { %v2093_v54 = vpop.xlane.xlu0 %2092 }
 0x24a   :  { %v2134_v5 = vrot.slane %v2093_v54, %v6200_v28  ;;  %v2263_v51 = vsel %vm152_vm6, %v2253_v9, %v2262_v48 }
 0x24b   :  { %v3495_v28 = vpop.xlane.xlu1 %3494 }
 0x24c   :  { %v2141_v6 = vsel %vm154_vm7, %v2134_v5, %v2140_v26  ;;  %v3535_v27 = vrot.slane %v3495_v28, %v6327_v30 }
 0x24d   :  { %2144 = vst.msk [vmem:[#allocation2] sm:$0xff] %vm2143_vm14, %v2141_v6  ;;  %v3375_v31 = vpop.xlane.xlu0 %3374 }
 0x24e   :  { %v3416_v46 = vrot.slane %v3375_v31, %v6265_v33  ;;  %v3545_v25 = vsel %vm152_vm6, %v3535_v27, %v3544_v44 }
 0x24f   :  { %v3498_v39 = vpop.xlane.xlu1 %3497 }
 0x250   :  { %v3423_v19 = vsel %vm154_vm7, %v3416_v46, %v3422_v53  ;;  %v3539_v33 = vrot.slane %v3498_v39, %v6327_v30 }
 0x251   :  { %3426 = vst.msk [vmem:[#allocation2 + $0x8] sm:$0xff] %vm3425_vm15, %v3423_v19  ;;  %v2216_v38 = vpop.xlane.xlu0 %2215 }
 0x252   :  { %v2257_v24 = vrot.slane %v2216_v38, %v6299_v37  ;;  %v3546_v58 = vsel %vm154_vm7, %v3539_v33, %v3545_v25  ;;  %v4098_v37 = vld [vmem:[%s6512_s2] ss:$0 sm:$0xff] }
 0x253   :  { %3549 = vst.msk [vmem:[#allocation2 + $0x8] sm:$0xff] %vm3548_vm2, %v3546_v58 }
 0x254   :  { %v2264_v61 = vsel %vm154_vm7, %v2257_v24, %v2263_v51 }
 0x255   :  { %2267 = vst.msk [vmem:[#allocation2] sm:$0xff] %vm2266_vm3, %v2264_v61 }
 0x256   :  { %2431 = vst.msk [vmem:[#allocation2] sm:$0xff] %vm2430_vm4, %v5906_v13 }
 0x25a   :  { %v3551_v30 = vld [vmem:[#allocation2 + $0x8] sm:$0xff] }
 0x25b   :  { %4100 = vmatprep.mubr.msk.f32.mxu0 %vm3584_vm8, %v3551_v30 }
 0x25d   :  { %v3550_v3 = vld [vmem:[#allocation2] sm:$0xff] }
 0x25e   :  { %3657 = vmatmul.mubr.f32.vlgmr.msra.gmra.mrb[0].mxu0 %v3550_v3 }
 0x331   :  { %v3658_v10 = vpop.f32.mrb[0].mxu0 }
 0x332   :  { %v3659_v47 = vadd.f32 %v4098_v37, %v3658_v10  ;;  %v3660_v62 = vpop.f32.mrb[1].mxu0 }
 0x334   :  { %v3665_v45 = vmul.f32 %v3664_v42, %v3659_v47  ;;  %vm3663_vm5 = vcmp.gt.f32.partialorder %v3659_v47, 0.0 }
 0x336   :  { %v3666_v13 = vsel %vm3663_vm5, %v3659_v47, %v3665_v45 }
 0x337   :  { %3667 = vst [vmem:[#allocation4] sm:$0xff] %v3666_v13 }
 0x338   :  { %4170 = shalt.err (!%p4167_p4)
}
 0x339   :  { %s4171_s3 = scalar_lea.hbm %s6514_s4, 128 }
 0x33a   :  { %p4172_p5 = scmp.ne.s32.totalorder %s6514_s4, %s4171_s3  ;;  %p4175_p6 = scmp.lt.u32.totalorder %s4171_s3, %s6514_s4 }
 0x33c   :  { %p4177_p7 = pnand %p4175_p6, %p4172_p5 }
 0x33e   :  { %4180 = shalt.err (!%p4177_p7)
}
 0x33f   :  { %3677 = dma.vmem_to_hbm [thread:$0]  %s3675_s19, 128, %s6514_s4, [#allocation5]  }
 0x340   :  { %4181 = dma.done.wait [#allocation5], 128  }
 0x341   :  { %4182 = vsyncadd [#allocation5], 4294967168 }
 0x342   :  { %3681 = vsyncpa [#allocation5], 1 }

</bundles_post_ra>
